<compile_context>
chip_gen: v5e
topology: v5e:2x2
jax: 0.10.0
libtpu: 0.0.40
codegen_flags: <defaults>
</compile_context>

<pallas_src>
import math

import jax
import jax.numpy as jnp
from jax.experimental import pallas as pl
from jax.experimental.pallas import tpu as pltpu


# -----------------------------------------------------------------------------
# Sizing helpers (hardware-padded VMEM accounting + block picking).
# -----------------------------------------------------------------------------
def _round_up(x, m):
    return ((x + m - 1) // m) * m


def _vmem_budgets():
    """(per-block VMEM budget, vmem_limit_bytes) by TPU generation."""
    try:
        cap = int(pltpu.get_tpu_info().vmem_capacity_bytes)
    except Exception:
        cap = 64 << 20                      # unknown: assume smallest (v7x-class)
    if cap <= (96 << 20):                   # v7x: 64 MiB per TensorCore
        return 14 << 20, 36 << 20
    return 24 << 20, 48 << 20               # v5e / v6e: 128 MiB


def _conv_vmem_per_img(howo, kp, n_patches, n_mm, cout, out_bytes):
    """Per-image VMEM bytes using padded shapes (lanes -> 128) and double
    buffering for the pipelined inputs / output, plus live f32 dot results."""
    return howo * (n_patches * kp * 2 * 2                     # bf16 patch tiles (x2 dbuf)
                   + 3 * _round_up(n_mm, 128) * 4             # live f32 matmul results
                   + _round_up(cout, 128) * out_bytes * 2)    # output tile (x2 dbuf)


def _const_vmem_bytes(kp, n_mm):
    """Resident weight/bias tiles (double-buffered) + compiler slack."""
    return kp * _round_up(n_mm, 128) * 2 * 2 + 128 * 4 * 2 + (1 << 20)


def _pick_block(n, howo, per_img_bytes, fixed_bytes, budget):
    """Images per block (nb) and padded batch (n_pad >= n, n_pad % nb == 0).

    Guarantees the padded per-block VMEM fits `budget` (except for the tiny
    <=8-image granule minimum), keeps nb*howo a multiple of 8 unless the block
    spans the whole (padded) batch, and prefers >=2 grid steps so the
    "parallel" axis can pipeline / use both v7x cores."""
    g = 8 // math.gcd(howo, 8)          # image-count granule for the (8, .) rule
    cap = max(1, int((budget - fixed_bytes) // max(per_img_bytes, 1)))

    if cap >= n:
        # Whole batch fits one block; still split exactly if a clean split exists.
        for nb in range(min(cap, n // 2), g - 1, -1):
            if nb % g == 0 and n % nb == 0:
                return nb, n
        return n, n                     # single block spanning the full batch

    # Batch does not fit one block: prefer the largest exact divisor near cap.
    hi = min(cap, n // 2)
    for nb in range(hi, g - 1, -1):
        if nb % g == 0 and n % nb == 0 and 2 * nb >= hi:
            return nb, n

    # Otherwise pad the batch up; pick the granule-multiple block (<= cap)
    # with the least padding waste.
    nb_hi = max(g, (cap // g) * g)
    best_nb, best_pad = nb_hi, ((n + nb_hi - 1) // nb_hi) * nb_hi
    for nb in range(nb_hi, max(g, nb_hi // 2) - 1, -g):
        n_pad = ((n + nb - 1) // nb) * nb
        if n_pad < best_pad:
            best_nb, best_pad = nb, n_pad
    return best_nb, best_pad


# -----------------------------------------------------------------------------
# Glue: per-pool-window im2col (pure data rearrangement, plain JAX).
# Column order (kh, kw, cin); K zero-padded to `kp`; cast to bf16 for the MXU.
# -----------------------------------------------------------------------------
def _pooled_window_patches(x, ksize, pad, kp, *, concat_k=False):
    n, h, w, c = x.shape
    ho, wo = h // 2, w // 2
    k = ksize * ksize * c
    xp = jnp.pad(x, ((0, 0), (pad, pad), (pad, pad), (0, 0)))
    outs = []
    for dy in range(2):
        for dx in range(2):
            cols = []
            for i in range(ksize):
                for j in range(ksize):
                    cols.append(xp[:, dy + i:dy + i + 2 * ho - 1:2,
                                      dx + j:dx + j + 2 * wo - 1:2, :])
            pq = jnp.stack(cols, axis=3)                  # (n, ho, wo, k*k, c)
            outs.append(pq.reshape(n * ho * wo, k))
    if concat_k:
        cat = jnp.concatenate(outs, axis=1)               # (rows, 4k)
        cat = jnp.pad(cat, ((0, 0), (0, kp - 4 * k)))
        return [cat.astype(jnp.bfloat16)]
    return [jnp.pad(o, ((0, 0), (0, kp - k))).astype(jnp.bfloat16) for o in outs]


# -----------------------------------------------------------------------------
# Kernels.
# -----------------------------------------------------------------------------
def _conv_pool_kernel(p0_ref, p1_ref, p2_ref, p3_ref, w_ref, b_ref, o_ref):
    # Sequential running max over the 4 pool-window matmuls (bounds live f32
    # results to 2), then bias + ReLU in f32 and a bf16 store.
    def mm(p_ref):
        return jnp.dot(p_ref[...], w_ref[...], preferred_element_type=jnp.float32)

    acc = mm(p0_ref)
    acc = jnp.maximum(acc, mm(p1_ref))
    acc = jnp.maximum(acc, mm(p2_ref))
    acc = jnp.maximum(acc, mm(p3_ref))
    o_ref[...] = jnp.maximum(acc + b_ref[...], 0.0).astype(o_ref.dtype)


def _conv1_pool_kernel(p_ref, w_ref, b_ref, o_ref):
    # Single matmul against a block-diagonal weight: output lanes hold the 4
    # pool-window results in groups of `cout`; the 2x2 max is a lane-group max.
    cout = o_ref.shape[-1]
    y = jnp.dot(p_ref[...], w_ref[...], preferred_element_type=jnp.float32)
    acc = y[:, 0:cout]
    acc = jnp.maximum(acc, y[:, cout:2 * cout])
    acc = jnp.maximum(acc, y[:, 2 * cout:3 * cout])
    acc = jnp.maximum(acc, y[:, 3 * cout:4 * cout])
    o_ref[...] = jnp.maximum(acc + b_ref[...], 0.0).astype(o_ref.dtype)


def _conv4_mlp_kernel(p0_ref, p1_ref, p2_ref, p3_ref, wc_ref, bc_ref,
                      w1_ref, b1_ref, w2_ref, b2_ref, w3_ref, b3_ref, o_ref):
    def mm(p_ref):
        return jnp.dot(p_ref[...], wc_ref[...], preferred_element_type=jnp.float32)

    acc = mm(p0_ref)
    acc = jnp.maximum(acc, mm(p1_ref))
    acc = jnp.maximum(acc, mm(p2_ref))
    acc = jnp.maximum(acc, mm(p3_ref))
    x = jnp.maximum(acc + bc_ref[...], 0.0)                       # (nb, 80) f32

    h = jnp.maximum(jnp.dot(x.astype(jnp.bfloat16), w1_ref[...],
                            preferred_element_type=jnp.float32) + b1_ref[...], 0.0)
    h = jnp.maximum(jnp.dot(h.astype(jnp.bfloat16), w2_ref[...],
                            preferred_element_type=jnp.float32) + b2_ref[...], 0.0)
    logits = jnp.dot(h.astype(jnp.bfloat16), w3_ref[...],
                     preferred_element_type=jnp.float32) + b3_ref[...]

    # Stable log-softmax in f32.
    m = jnp.max(logits, axis=-1, keepdims=True)
    s = logits - m
    lse = jnp.log(jnp.sum(jnp.exp(s), axis=-1, keepdims=True))
    o_ref[...] = s - lse


# -----------------------------------------------------------------------------
# Layer wrappers.
# -----------------------------------------------------------------------------
def conv_relu_pool(x_nhwc, w, b, *, ksize, pad, budget, vmem_limit, concat_k=False):
    # x_nhwc: (N, H, W, Cin); w: (KH, KW, Cin, Cout); b: (Cout,).  Returns bf16.
    n, h, wdim, cin = x_nhwc.shape
    cout = w.shape[-1]
    k = ksize * ksize * cin
    ho, wo = h // 2, wdim // 2
    howo = ho * wo

    if concat_k:
        kp, n_patches, n_mm = _round_up(4 * k, 128), 1, 4 * cout
    else:
        kp, n_patches, n_mm = _round_up(k, 128), 4, cout

    per_img = _conv_vmem_per_img(howo, kp, n_patches, n_mm, cout, out_bytes=2)
    fixed = _const_vmem_bytes(kp, n_mm)
    nb, n_pad = _pick_block(n, howo, per_img, fixed, budget)

    if n_pad > n:
        x_nhwc = jnp.pad(x_nhwc, ((0, n_pad - n), (0, 0), (0, 0), (0, 0)))
    patches = _pooled_window_patches(x_nhwc, ksize, pad, kp, concat_k=concat_k)

    w2d = w.reshape(k, cout).astype(jnp.float32)
    if concat_k:
        wmx = jnp.zeros((kp, 4 * cout), jnp.float32)
        for q in range(4):
            wmx = wmx.at[q * k:(q + 1) * k, q * cout:(q + 1) * cout].set(w2d)
        wmx = wmx.astype(jnp.bfloat16)
    else:
        wmx = jnp.pad(w2d, ((0, kp - k), (0, 0))).astype(jnp.bfloat16)
    b2d = b.reshape(1, cout).astype(jnp.float32)

    rows = nb * howo
    patch_spec = pl.BlockSpec((rows, kp), lambda i: (i, 0))
    kernel = _conv1_pool_kernel if concat_k else _conv_pool_kernel

    out = pl.pallas_call(
        kernel,
        out_shape=jax.ShapeDtypeStruct((n_pad * howo, cout), jnp.bfloat16),
        grid=(n_pad // nb,),
        in_specs=[patch_spec] * n_patches + [
            pl.BlockSpec((kp, wmx.shape[1]), lambda i: (0, 0)),
            pl.BlockSpec((1, cout), lambda i: (0, 0)),
        ],
        out_specs=pl.BlockSpec((rows, cout), lambda i: (i, 0)),
        compiler_params=pltpu.CompilerParams(
            dimension_semantics=("parallel",),
            vmem_limit_bytes=vmem_limit),
    )(*patches, wmx, b2d)
    return out[:n * howo].reshape(n, ho, wo, cout)


def conv4_mlp_logsoftmax(x_nhwc, cw, cb, mlp_params, *, ksize, pad, budget, vmem_limit):
    (w1, b1), (w2, b2), (w3, b3) = mlp_params
    n, h, wdim, cin = x_nhwc.shape
    cout = cw.shape[-1]
    k = ksize * ksize * cin
    howo = (h // 2) * (wdim // 2)                   # == 1 for this model
    kp = _round_up(k, 128)

    per_img = howo * (4 * kp * 2 * 2                # bf16 patch tiles (x2 dbuf)
                      + 6 * 128 * 4                 # conv acc + MLP activations (f32)
                      + 128 * 4 * 2)                # f32 output tile (x2 dbuf)
    fixed = _const_vmem_bytes(kp, cout) + (1 << 20)  # conv + (tiny) MLP weights
    nb, n_pad = _pick_block(n, howo, per_img, fixed, budget)

    if n_pad > n:
        x_nhwc = jnp.pad(x_nhwc, ((0, n_pad - n), (0, 0), (0, 0), (0, 0)))
    patches = _pooled_window_patches(x_nhwc, ksize, pad, kp)

    wc2d = jnp.pad(cw.reshape(k, cout).astype(jnp.float32),
                   ((0, kp - k), (0, 0))).astype(jnp.bfloat16)
    bc2d = cb.reshape(1, cout).astype(jnp.float32)
    w1b, w2b, w3b = (w.astype(jnp.bfloat16) for w in (w1, w2, w3))
    b1f, b2f, b3f = (b.astype(jnp.float32) for b in (b1, b2, b3))

    rows = nb * howo
    patch_spec = pl.BlockSpec((rows, kp), lambda i: (i, 0))

    def const(a):
        return pl.BlockSpec(a.shape, lambda i: (0, 0))

    out = pl.pallas_call(
        _conv4_mlp_kernel,
        out_shape=jax.ShapeDtypeStruct((n_pad, 10), jnp.float32),
        grid=(n_pad // nb,),
        in_specs=[patch_spec] * 4 + [const(wc2d), const(bc2d),
                                     const(w1b), const(b1f),
                                     const(w2b), const(b2f),
                                     const(w3b), const(b3f)],
        out_specs=pl.BlockSpec((nb, 10), lambda i: (i, 0)),
        compiler_params=pltpu.CompilerParams(
            dimension_semantics=("parallel",),
            vmem_limit_bytes=vmem_limit),
    )(*patches, wc2d, bc2d, w1b, b1f, w2b, b2f, w3b, b3f)
    return out[:n]


# -----------------------------------------------------------------------------
# Model: parameters + forward (+ pure-JAX reference for validation).
# -----------------------------------------------------------------------------
def _uniform(key, shape, fan_in):
    bound = 1.0 / (fan_in ** 0.5)
    return jax.random.uniform(key, shape, jnp.float32, -bound, bound)


def init_params(key):
    keys = jax.random.split(key, 14)

    def conv(kw_, kb_, kh, kwd, cin, cout):
        fan = kh * kwd * cin
        return (_uniform(kw_, (kh, kwd, cin, cout), fan),
                _uniform(kb_, (cout,), fan))

    def lin(kw_, kb_, din, dout):
        return (_uniform(kw_, (din, dout), din),
                _uniform(kb_, (1, dout), din))

    c1 = conv(keys[0], keys[1], 5, 5, 1, 10)
    c2 = conv(keys[2], keys[3], 5, 5, 10, 20)
    c3 = conv(keys[4], keys[5], 5, 5, 20, 40)
    c4 = conv(keys[6], keys[7], 3, 3, 40, 80)
    l1 = lin(keys[8], keys[9], 80, 40)
    l2 = lin(keys[10], keys[11], 40, 20)
    l3 = lin(keys[12], keys[13], 20, 10)
    return (c1, c2, c3, c4, (l1, l2, l3))


def forward(x_nchw, params):
    # Accept PyTorch NCHW input, transpose to NHWC for the kernels.
    x = jnp.transpose(x_nchw, (0, 2, 3, 1)).astype(jnp.float32)
    budget, vlimit = _vmem_budgets()
    (cw1, cb1), (cw2, cb2), (cw3, cb3), (cw4, cb4), mlp_params = params
    x = conv_relu_pool(x, cw1, cb1, ksize=5, pad=2, concat_k=True,
                       budget=budget, vmem_limit=vlimit)   # (N, 14, 14, 10) bf16
    x = conv_relu_pool(x, cw2, cb2, ksize=5, pad=2,
                       budget=budget, vmem_limit=vlimit)   # (N,  7,  7, 20) bf16
    x = conv_relu_pool(x, cw3, cb3, ksize=5, pad=2,
                       budget=budget, vmem_limit=vlimit)   # (N,  3,  3, 40) bf16
    return conv4_mlp_logsoftmax(x, cw4, cb4, mlp_params, ksize=3, pad=1,
                                budget=budget, vmem_limit=vlimit)   # (N, 10) f32


def forward_reference(x_nchw, params):
    # Pure-JAX f32 reference of MNModel3 (for validation only).
    x = jnp.transpose(x_nchw, (0, 2, 3, 1)).astype(jnp.float32)
    (cw1, cb1), (cw2, cb2), (cw3, cb3), (cw4, cb4), mlp = params
    (w1, b1), (w2, b2), (w3, b3) = mlp

    def block(x, w, b, pad):
        y = jax.lax.conv_general_dilated(
            x, w, (1, 1), [(pad, pad), (pad, pad)],
            dimension_numbers=("NHWC", "HWIO", "NHWC"))
        y = jnp.maximum(y + b, 0.0)
        return jax.lax.reduce_window(y, -jnp.inf, jax.lax.max,
                                     (1, 2, 2, 1), (1, 2, 2, 1), "VALID")

    x = block(x, cw1, cb1, 2)
    x = block(x, cw2, cb2, 2)
    x = block(x, cw3, cb3, 2)
    x = block(x, cw4, cb4, 1)
    x = x.reshape(x.shape[0], -1)
    x = jnp.maximum(x @ w1 + b1, 0.0)
    x = jnp.maximum(x @ w2 + b2, 0.0)
    x = x @ w3 + b3
    return jax.nn.log_softmax(x, axis=1)


if __name__ == "__main__":
    key = jax.random.PRNGKey(0)
    kx, kparam = jax.random.split(key)
    x = jax.random.normal(kx, (2, 1, 28, 28), dtype=jnp.float32)   # NCHW MNIST-sized
    params = init_params(kparam)

    out = jax.block_until_ready(jax.jit(forward)(x, params))
    ref = jax.block_until_ready(jax.jit(forward_reference)(x, params))

    assert out.shape == (2, 10), out.shape
    assert bool(jnp.all(jnp.isfinite(out)))
    # log-softmax rows exponentiate-and-sum to ~1 (computed in f32 in-kernel)
    assert bool(jnp.allclose(jnp.sum(jnp.exp(out), axis=1), 1.0, atol=1e-4))
    # bf16 matmul path vs. f32 reference: loose tolerance for bf16 drift
    assert bool(jnp.allclose(out, ref, atol=0.2)), float(jnp.max(jnp.abs(out - ref)))
    print("KERNEL_OK")
</pallas_src>

<mosaic_0001>
module attributes {stable_mosaic.version = 11 : i64} {
  func.func @_conv1_pool_kernel(%arg0: i32, %arg1: memref<392x128xbf16, #tpu.memory_space<vmem>>, %arg2: memref<128x40xbf16, #tpu.memory_space<vmem>>, %arg3: memref<1x10xf32, #tpu.memory_space<vmem>>, %arg4: memref<392x10xbf16, #tpu.memory_space<vmem>>) attributes {dimension_semantics = [#tpu.dimension_semantics<parallel>], iteration_bounds = array<i64: 1>, scalar_prefetch = 0 : i64, scratch_operands = 0 : i64, tpu.core_type = #tpu.core_type<tc>, window_params = [{transform_indices = @transform_0, window_bounds = array<i64: 392, 128>}, {pipeline_mode = #tpu.pipeline_mode<synchronous>, transform_indices = @transform_1, window_bounds = array<i64: 128, 40>}, {pipeline_mode = #tpu.pipeline_mode<synchronous>, transform_indices = @transform_2, window_bounds = array<i64: 1, 10>}, {transform_indices = @transform_3, window_bounds = array<i64: 392, 10>}]} {
    %c0 = arith.constant 0 : index
    %c0_0 = arith.constant 0 : index
    %0 = vector.load %arg1[%c0, %c0_0] : memref<392x128xbf16, #tpu.memory_space<vmem>>, vector<392x128xbf16>
    %c0_1 = arith.constant 0 : index
    %c0_2 = arith.constant 0 : index
    %1 = vector.load %arg2[%c0_1, %c0_2] : memref<128x40xbf16, #tpu.memory_space<vmem>>, vector<128x40xbf16>
    %cst = arith.constant dense<0.000000e+00> : vector<392x40xf32>
    %2 = tpu.matmul %0, %1, %cst {dimension_numbers = #tpu.dot_dimension_numbers<[1], [0], [0], [1], [0, 0, 1, 1], [], []>} : vector<392x128xbf16>, vector<128x40xbf16>, vector<392x40xf32> -> vector<392x40xf32>
    %3 = vector.extract_strided_slice %2 {offsets = [0, 0], sizes = [392, 10], strides = [1, 1]} : vector<392x40xf32> to vector<392x10xf32>
    %4 = vector.extract_strided_slice %2 {offsets = [0, 10], sizes = [392, 10], strides = [1, 1]} : vector<392x40xf32> to vector<392x10xf32>
    %5 = arith.maximumf %3, %4 : vector<392x10xf32>
    %6 = vector.extract_strided_slice %2 {offsets = [0, 20], sizes = [392, 10], strides = [1, 1]} : vector<392x40xf32> to vector<392x10xf32>
    %7 = arith.maximumf %5, %6 : vector<392x10xf32>
    %8 = vector.extract_strided_slice %2 {offsets = [0, 30], sizes = [392, 10], strides = [1, 1]} : vector<392x40xf32> to vector<392x10xf32>
    %9 = arith.maximumf %7, %8 : vector<392x10xf32>
    %c0_3 = arith.constant 0 : index
    %c0_4 = arith.constant 0 : index
    %10 = vector.load %arg3[%c0_3, %c0_4] : memref<1x10xf32, #tpu.memory_space<vmem>>, vector<1x10xf32>
    %11 = vector.broadcast %10 : vector<1x10xf32> to vector<392x10xf32>
    %12 = arith.addf %9, %11 : vector<392x10xf32>
    %cst_5 = arith.constant 0.000000e+00 : f32
    %13 = vector.broadcast %cst_5 : f32 to vector<392x10xf32>
    %14 = arith.maximumf %12, %13 : vector<392x10xf32>
    %15 = arith.truncf %14 : vector<392x10xf32> to vector<392x10xbf16>
    %c0_6 = arith.constant 0 : index
    %c0_7 = arith.constant 0 : index
    %16 = vector.load %arg4[%c0_6, %c0_7] : memref<392x10xbf16, #tpu.memory_space<vmem>>, vector<392x10xbf16>
    tpu.vector_store %arg4[%c0_6, %c0_7], %15 {strides = array<i32>} : memref<392x10xbf16, #tpu.memory_space<vmem>>, vector<392x10xbf16>,
    return
  }
  func.func @transform_0(%arg0: i32) -> (i32, i32) {
    %c0_i32 = arith.constant 0 : i32
    %c0_i32_0 = arith.constant 0 : i32
    return %arg0, %c0_i32 : i32, i32
  }
  func.func @transform_1(%arg0: i32) -> (i32, i32) {
    %c0_i32 = arith.constant 0 : i32
    %c0_i32_0 = arith.constant 0 : i32
    %c0_i32_1 = arith.constant 0 : i32
    return %c0_i32, %c0_i32_0 : i32, i32
  }
  func.func @transform_2(%arg0: i32) -> (i32, i32) {
    %c0_i32 = arith.constant 0 : i32
    %c0_i32_0 = arith.constant 0 : i32
    %c0_i32_1 = arith.constant 0 : i32
    return %c0_i32, %c0_i32_0 : i32, i32
  }
  func.func @transform_3(%arg0: i32) -> (i32, i32) {
    %c0_i32 = arith.constant 0 : i32
    %c0_i32_0 = arith.constant 0 : i32
    return %arg0, %c0_i32 : i32, i32
  }
}

module attributes {stable_mosaic.version = 11 : i64} {
  func.func @_conv_pool_kernel(%arg0: i32, %arg1: memref<98x256xbf16, #tpu.memory_space<vmem>>, %arg2: memref<98x256xbf16, #tpu.memory_space<vmem>>, %arg3: memref<98x256xbf16, #tpu.memory_space<vmem>>, %arg4: memref<98x256xbf16, #tpu.memory_space<vmem>>, %arg5: memref<256x20xbf16, #tpu.memory_space<vmem>>, %arg6: memref<1x20xf32, #tpu.memory_space<vmem>>, %arg7: memref<98x20xbf16, #tpu.memory_space<vmem>>) attributes {dimension_semantics = [#tpu.dimension_semantics<parallel>], iteration_bounds = array<i64: 1>, scalar_prefetch = 0 : i64, scratch_operands = 0 : i64, tpu.core_type = #tpu.core_type<tc>, window_params = [{transform_indices = @transform_0, window_bounds = array<i64: 98, 256>}, {transform_indices = @transform_1, window_bounds = array<i64: 98, 256>}, {transform_indices = @transform_2, window_bounds = array<i64: 98, 256>}, {transform_indices = @transform_3, window_bounds = array<i64: 98, 256>}, {pipeline_mode = #tpu.pipeline_mode<synchronous>, transform_indices = @transform_4, window_bounds = array<i64: 256, 20>}, {pipeline_mode = #tpu.pipeline_mode<synchronous>, transform_indices = @transform_5, window_bounds = array<i64: 1, 20>}, {transform_indices = @transform_6, window_bounds = array<i64: 98, 20>}]} {
    %c0 = arith.constant 0 : index
    %c0_0 = arith.constant 0 : index
    %0 = vector.load %arg1[%c0, %c0_0] : memref<98x256xbf16, #tpu.memory_space<vmem>>, vector<98x256xbf16>
    %c0_1 = arith.constant 0 : index
    %c0_2 = arith.constant 0 : index
    %1 = vector.load %arg5[%c0_1, %c0_2] : memref<256x20xbf16, #tpu.memory_space<vmem>>, vector<256x20xbf16>
    %cst = arith.constant dense<0.000000e+00> : vector<98x20xf32>
    %2 = tpu.matmul %0, %1, %cst {dimension_numbers = #tpu.dot_dimension_numbers<[1], [0], [0], [1], [0, 0, 1, 1], [], []>} : vector<98x256xbf16>, vector<256x20xbf16>, vector<98x20xf32> -> vector<98x20xf32>
    %c0_3 = arith.constant 0 : index
    %c0_4 = arith.constant 0 : index
    %3 = vector.load %arg2[%c0_3, %c0_4] : memref<98x256xbf16, #tpu.memory_space<vmem>>, vector<98x256xbf16>
    %c0_5 = arith.constant 0 : index
    %c0_6 = arith.constant 0 : index
    %4 = vector.load %arg5[%c0_5, %c0_6] : memref<256x20xbf16, #tpu.memory_space<vmem>>, vector<256x20xbf16>
    %cst_7 = arith.constant dense<0.000000e+00> : vector<98x20xf32>
    %5 = tpu.matmul %3, %4, %cst_7 {dimension_numbers = #tpu.dot_dimension_numbers<[1], [0], [0], [1], [0, 0, 1, 1], [], []>} : vector<98x256xbf16>, vector<256x20xbf16>, vector<98x20xf32> -> vector<98x20xf32>
    %6 = arith.maximumf %2, %5 : vector<98x20xf32>
    %c0_8 = arith.constant 0 : index
    %c0_9 = arith.constant 0 : index
    %7 = vector.load %arg3[%c0_8, %c0_9] : memref<98x256xbf16, #tpu.memory_space<vmem>>, vector<98x256xbf16>
    %c0_10 = arith.constant 0 : index
    %c0_11 = arith.constant 0 : index
    %8 = vector.load %arg5[%c0_10, %c0_11] : memref<256x20xbf16, #tpu.memory_space<vmem>>, vector<256x20xbf16>
    %cst_12 = arith.constant dense<0.000000e+00> : vector<98x20xf32>
    %9 = tpu.matmul %7, %8, %cst_12 {dimension_numbers = #tpu.dot_dimension_numbers<[1], [0], [0], [1], [0, 0, 1, 1], [], []>} : vector<98x256xbf16>, vector<256x20xbf16>, vector<98x20xf32> -> vector<98x20xf32>
    %10 = arith.maximumf %6, %9 : vector<98x20xf32>
    %c0_13 = arith.constant 0 : index
    %c0_14 = arith.constant 0 : index
    %11 = vector.load %arg4[%c0_13, %c0_14] : memref<98x256xbf16, #tpu.memory_space<vmem>>, vector<98x256xbf16>
    %c0_15 = arith.constant 0 : index
    %c0_16 = arith.constant 0 : index
    %12 = vector.load %arg5[%c0_15, %c0_16] : memref<256x20xbf16, #tpu.memory_space<vmem>>, vector<256x20xbf16>
    %cst_17 = arith.constant dense<0.000000e+00> : vector<98x20xf32>
    %13 = tpu.matmul %11, %12, %cst_17 {dimension_numbers = #tpu.dot_dimension_numbers<[1], [0], [0], [1], [0, 0, 1, 1], [], []>} : vector<98x256xbf16>, vector<256x20xbf16>, vector<98x20xf32> -> vector<98x20xf32>
    %14 = arith.maximumf %10, %13 : vector<98x20xf32>
    %c0_18 = arith.constant 0 : index
    %c0_19 = arith.constant 0 : index
    %15 = vector.load %arg6[%c0_18, %c0_19] : memref<1x20xf32, #tpu.memory_space<vmem>>, vector<1x20xf32>
    %16 = vector.broadcast %15 : vector<1x20xf32> to vector<98x20xf32>
    %17 = arith.addf %14, %16 : vector<98x20xf32>
    %cst_20 = arith.constant 0.000000e+00 : f32
    %18 = vector.broadcast %cst_20 : f32 to vector<98x20xf32>
    %19 = arith.maximumf %17, %18 : vector<98x20xf32>
    %20 = arith.truncf %19 : vector<98x20xf32> to vector<98x20xbf16>
    %c0_21 = arith.constant 0 : index
    %c0_22 = arith.constant 0 : index
    %21 = vector.load %arg7[%c0_21, %c0_22] : memref<98x20xbf16, #tpu.memory_space<vmem>>, vector<98x20xbf16>
    tpu.vector_store %arg7[%c0_21, %c0_22], %20 {strides = array<i32>} : memref<98x20xbf16, #tpu.memory_space<vmem>>, vector<98x20xbf16>,
    return
  }
  func.func @transform_0(%arg0: i32) -> (i32, i32) {
    %c0_i32 = arith.constant 0 : i32
    %c0_i32_0 = arith.constant 0 : i32
    return %arg0, %c0_i32 : i32, i32
  }
  func.func @transform_1(%arg0: i32) -> (i32, i32) {
    %c0_i32 = arith.constant 0 : i32
    %c0_i32_0 = arith.constant 0 : i32
    return %arg0, %c0_i32 : i32, i32
  }
  func.func @transform_2(%arg0: i32) -> (i32, i32) {
    %c0_i32 = arith.constant 0 : i32
    %c0_i32_0 = arith.constant 0 : i32
    return %arg0, %c0_i32 : i32, i32
  }
  func.func @transform_3(%arg0: i32) -> (i32, i32) {
    %c0_i32 = arith.constant 0 : i32
    %c0_i32_0 = arith.constant 0 : i32
    return %arg0, %c0_i32 : i32, i32
  }
  func.func @transform_4(%arg0: i32) -> (i32, i32) {
    %c0_i32 = arith.constant 0 : i32
    %c0_i32_0 = arith.constant 0 : i32
    %c0_i32_1 = arith.constant 0 : i32
    return %c0_i32, %c0_i32_0 : i32, i32
  }
  func.func @transform_5(%arg0: i32) -> (i32, i32) {
    %c0_i32 = arith.constant 0 : i32
    %c0_i32_0 = arith.constant 0 : i32
    %c0_i32_1 = arith.constant 0 : i32
    return %c0_i32, %c0_i32_0 : i32, i32
  }
  func.func @transform_6(%arg0: i32) -> (i32, i32) {
    %c0_i32 = arith.constant 0 : i32
    %c0_i32_0 = arith.constant 0 : i32
    return %arg0, %c0_i32 : i32, i32
  }
}

module attributes {stable_mosaic.version = 11 : i64} {
  func.func @_conv_pool_kernel(%arg0: i32, %arg1: memref<18x512xbf16, #tpu.memory_space<vmem>>, %arg2: memref<18x512xbf16, #tpu.memory_space<vmem>>, %arg3: memref<18x512xbf16, #tpu.memory_space<vmem>>, %arg4: memref<18x512xbf16, #tpu.memory_space<vmem>>, %arg5: memref<512x40xbf16, #tpu.memory_space<vmem>>, %arg6: memref<1x40xf32, #tpu.memory_space<vmem>>, %arg7: memref<18x40xbf16, #tpu.memory_space<vmem>>) attributes {dimension_semantics = [#tpu.dimension_semantics<parallel>], iteration_bounds = array<i64: 1>, scalar_prefetch = 0 : i64, scratch_operands = 0 : i64, tpu.core_type = #tpu.core_type<tc>, window_params = [{transform_indices = @transform_0, window_bounds = array<i64: 18, 512>}, {transform_indices = @transform_1, window_bounds = array<i64: 18, 512>}, {transform_indices = @transform_2, window_bounds = array<i64: 18, 512>}, {transform_indices = @transform_3, window_bounds = array<i64: 18, 512>}, {pipeline_mode = #tpu.pipeline_mode<synchronous>, transform_indices = @transform_4, window_bounds = array<i64: 512, 40>}, {pipeline_mode = #tpu.pipeline_mode<synchronous>, transform_indices = @transform_5, window_bounds = array<i64: 1, 40>}, {transform_indices = @transform_6, window_bounds = array<i64: 18, 40>}]} {
    %c0 = arith.constant 0 : index
    %c0_0 = arith.constant 0 : index
    %0 = vector.load %arg1[%c0, %c0_0] : memref<18x512xbf16, #tpu.memory_space<vmem>>, vector<18x512xbf16>
    %c0_1 = arith.constant 0 : index
    %c0_2 = arith.constant 0 : index
    %1 = vector.load %arg5[%c0_1, %c0_2] : memref<512x40xbf16, #tpu.memory_space<vmem>>, vector<512x40xbf16>
    %cst = arith.constant dense<0.000000e+00> : vector<18x40xf32>
    %2 = tpu.matmul %0, %1, %cst {dimension_numbers = #tpu.dot_dimension_numbers<[1], [0], [0], [1], [0, 0, 1, 1], [], []>} : vector<18x512xbf16>, vector<512x40xbf16>, vector<18x40xf32> -> vector<18x40xf32>
    %c0_3 = arith.constant 0 : index
    %c0_4 = arith.constant 0 : index
    %3 = vector.load %arg2[%c0_3, %c0_4] : memref<18x512xbf16, #tpu.memory_space<vmem>>, vector<18x512xbf16>
    %c0_5 = arith.constant 0 : index
    %c0_6 = arith.constant 0 : index
    %4 = vector.load %arg5[%c0_5, %c0_6] : memref<512x40xbf16, #tpu.memory_space<vmem>>, vector<512x40xbf16>
    %cst_7 = arith.constant dense<0.000000e+00> : vector<18x40xf32>
    %5 = tpu.matmul %3, %4, %cst_7 {dimension_numbers = #tpu.dot_dimension_numbers<[1], [0], [0], [1], [0, 0, 1, 1], [], []>} : vector<18x512xbf16>, vector<512x40xbf16>, vector<18x40xf32> -> vector<18x40xf32>
    %6 = arith.maximumf %2, %5 : vector<18x40xf32>
    %c0_8 = arith.constant 0 : index
    %c0_9 = arith.constant 0 : index
    %7 = vector.load %arg3[%c0_8, %c0_9] : memref<18x512xbf16, #tpu.memory_space<vmem>>, vector<18x512xbf16>
    %c0_10 = arith.constant 0 : index
    %c0_11 = arith.constant 0 : index
    %8 = vector.load %arg5[%c0_10, %c0_11] : memref<512x40xbf16, #tpu.memory_space<vmem>>, vector<512x40xbf16>
    %cst_12 = arith.constant dense<0.000000e+00> : vector<18x40xf32>
    %9 = tpu.matmul %7, %8, %cst_12 {dimension_numbers = #tpu.dot_dimension_numbers<[1], [0], [0], [1], [0, 0, 1, 1], [], []>} : vector<18x512xbf16>, vector<512x40xbf16>, vector<18x40xf32> -> vector<18x40xf32>
    %10 = arith.maximumf %6, %9 : vector<18x40xf32>
    %c0_13 = arith.constant 0 : index
    %c0_14 = arith.constant 0 : index
    %11 = vector.load %arg4[%c0_13, %c0_14] : memref<18x512xbf16, #tpu.memory_space<vmem>>, vector<18x512xbf16>
    %c0_15 = arith.constant 0 : index
    %c0_16 = arith.constant 0 : index
    %12 = vector.load %arg5[%c0_15, %c0_16] : memref<512x40xbf16, #tpu.memory_space<vmem>>, vector<512x40xbf16>
    %cst_17 = arith.constant dense<0.000000e+00> : vector<18x40xf32>
    %13 = tpu.matmul %11, %12, %cst_17 {dimension_numbers = #tpu.dot_dimension_numbers<[1], [0], [0], [1], [0, 0, 1, 1], [], []>} : vector<18x512xbf16>, vector<512x40xbf16>, vector<18x40xf32> -> vector<18x40xf32>
    %14 = arith.maximumf %10, %13 : vector<18x40xf32>
    %c0_18 = arith.constant 0 : index
    %c0_19 = arith.constant 0 : index
    %15 = vector.load %arg6[%c0_18, %c0_19] : memref<1x40xf32, #tpu.memory_space<vmem>>, vector<1x40xf32>
    %16 = vector.broadcast %15 : vector<1x40xf32> to vector<18x40xf32>
    %17 = arith.addf %14, %16 : vector<18x40xf32>
    %cst_20 = arith.constant 0.000000e+00 : f32
    %18 = vector.broadcast %cst_20 : f32 to vector<18x40xf32>
    %19 = arith.maximumf %17, %18 : vector<18x40xf32>
    %20 = arith.truncf %19 : vector<18x40xf32> to vector<18x40xbf16>
    %c0_21 = arith.constant 0 : index
    %c0_22 = arith.constant 0 : index
    %21 = vector.load %arg7[%c0_21, %c0_22] : memref<18x40xbf16, #tpu.memory_space<vmem>>, vector<18x40xbf16>
    tpu.vector_store %arg7[%c0_21, %c0_22], %20 {strides = array<i32>} : memref<18x40xbf16, #tpu.memory_space<vmem>>, vector<18x40xbf16>,
    return
  }
  func.func @transform_0(%arg0: i32) -> (i32, i32) {
    %c0_i32 = arith.constant 0 : i32
    %c0_i32_0 = arith.constant 0 : i32
    return %arg0, %c0_i32 : i32, i32
  }
  func.func @transform_1(%arg0: i32) -> (i32, i32) {
    %c0_i32 = arith.constant 0 : i32
    %c0_i32_0 = arith.constant 0 : i32
    return %arg0, %c0_i32 : i32, i32
  }
  func.func @transform_2(%arg0: i32) -> (i32, i32) {
    %c0_i32 = arith.constant 0 : i32
    %c0_i32_0 = arith.constant 0 : i32
    return %arg0, %c0_i32 : i32, i32
  }
  func.func @transform_3(%arg0: i32) -> (i32, i32) {
    %c0_i32 = arith.constant 0 : i32
    %c0_i32_0 = arith.constant 0 : i32
    return %arg0, %c0_i32 : i32, i32
  }
  func.func @transform_4(%arg0: i32) -> (i32, i32) {
    %c0_i32 = arith.constant 0 : i32
    %c0_i32_0 = arith.constant 0 : i32
    %c0_i32_1 = arith.constant 0 : i32
    return %c0_i32, %c0_i32_0 : i32, i32
  }
  func.func @transform_5(%arg0: i32) -> (i32, i32) {
    %c0_i32 = arith.constant 0 : i32
    %c0_i32_0 = arith.constant 0 : i32
    %c0_i32_1 = arith.constant 0 : i32
    return %c0_i32, %c0_i32_0 : i32, i32
  }
  func.func @transform_6(%arg0: i32) -> (i32, i32) {
    %c0_i32 = arith.constant 0 : i32
    %c0_i32_0 = arith.constant 0 : i32
    return %arg0, %c0_i32 : i32, i32
  }
}

module attributes {stable_mosaic.version = 11 : i64} {
  func.func @_conv4_mlp_kernel(%arg0: i32, %arg1: memref<2x384xbf16, #tpu.memory_space<vmem>>, %arg2: memref<2x384xbf16, #tpu.memory_space<vmem>>, %arg3: memref<2x384xbf16, #tpu.memory_space<vmem>>, %arg4: memref<2x384xbf16, #tpu.memory_space<vmem>>, %arg5: memref<384x80xbf16, #tpu.memory_space<vmem>>, %arg6: memref<1x80xf32, #tpu.memory_space<vmem>>, %arg7: memref<80x40xbf16, #tpu.memory_space<vmem>>, %arg8: memref<1x40xf32, #tpu.memory_space<vmem>>, %arg9: memref<40x20xbf16, #tpu.memory_space<vmem>>, %arg10: memref<1x20xf32, #tpu.memory_space<vmem>>, %arg11: memref<20x10xbf16, #tpu.memory_space<vmem>>, %arg12: memref<1x10xf32, #tpu.memory_space<vmem>>, %arg13: memref<2x10xf32, #tpu.memory_space<vmem>>) attributes {dimension_semantics = [#tpu.dimension_semantics<parallel>], iteration_bounds = array<i64: 1>, scalar_prefetch = 0 : i64, scratch_operands = 0 : i64, tpu.core_type = #tpu.core_type<tc>, window_params = [{transform_indices = @transform_0, window_bounds = array<i64: 2, 384>}, {transform_indices = @transform_1, window_bounds = array<i64: 2, 384>}, {transform_indices = @transform_2, window_bounds = array<i64: 2, 384>}, {transform_indices = @transform_3, window_bounds = array<i64: 2, 384>}, {pipeline_mode = #tpu.pipeline_mode<synchronous>, transform_indices = @transform_4, window_bounds = array<i64: 384, 80>}, {pipeline_mode = #tpu.pipeline_mode<synchronous>, transform_indices = @transform_5, window_bounds = array<i64: 1, 80>}, {pipeline_mode = #tpu.pipeline_mode<synchronous>, transform_indices = @transform_6, window_bounds = array<i64: 80, 40>}, {pipeline_mode = #tpu.pipeline_mode<synchronous>, transform_indices = @transform_7, window_bounds = array<i64: 1, 40>}, {pipeline_mode = #tpu.pipeline_mode<synchronous>, transform_indices = @transform_8, window_bounds = array<i64: 40, 20>}, {pipeline_mode = #tpu.pipeline_mode<synchronous>, transform_indices = @transform_9, window_bounds = array<i64: 1, 20>}, {pipeline_mode = #tpu.pipeline_mode<synchronous>, transform_indices = @transform_10, window_bounds = array<i64: 20, 10>}, {pipeline_mode = #tpu.pipeline_mode<synchronous>, transform_indices = @transform_11, window_bounds = array<i64: 1, 10>}, {transform_indices = @transform_12, window_bounds = array<i64: 2, 10>}]} {
    %c0 = arith.constant 0 : index
    %c0_0 = arith.constant 0 : index
    %0 = vector.load %arg1[%c0, %c0_0] : memref<2x384xbf16, #tpu.memory_space<vmem>>, vector<2x384xbf16>
    %c0_1 = arith.constant 0 : index
    %c0_2 = arith.constant 0 : index
    %1 = vector.load %arg5[%c0_1, %c0_2] : memref<384x80xbf16, #tpu.memory_space<vmem>>, vector<384x80xbf16>
    %cst = arith.constant dense<0.000000e+00> : vector<2x80xf32>
    %2 = tpu.matmul %0, %1, %cst {dimension_numbers = #tpu.dot_dimension_numbers<[1], [0], [0], [1], [0, 0, 1, 1], [], []>} : vector<2x384xbf16>, vector<384x80xbf16>, vector<2x80xf32> -> vector<2x80xf32>
    %c0_3 = arith.constant 0 : index
    %c0_4 = arith.constant 0 : index
    %3 = vector.load %arg2[%c0_3, %c0_4] : memref<2x384xbf16, #tpu.memory_space<vmem>>, vector<2x384xbf16>
    %c0_5 = arith.constant 0 : index
    %c0_6 = arith.constant 0 : index
    %4 = vector.load %arg5[%c0_5, %c0_6] : memref<384x80xbf16, #tpu.memory_space<vmem>>, vector<384x80xbf16>
    %cst_7 = arith.constant dense<0.000000e+00> : vector<2x80xf32>
    %5 = tpu.matmul %3, %4, %cst_7 {dimension_numbers = #tpu.dot_dimension_numbers<[1], [0], [0], [1], [0, 0, 1, 1], [], []>} : vector<2x384xbf16>, vector<384x80xbf16>, vector<2x80xf32> -> vector<2x80xf32>
    %6 = arith.maximumf %2, %5 : vector<2x80xf32>
    %c0_8 = arith.constant 0 : index
    %c0_9 = arith.constant 0 : index
    %7 = vector.load %arg3[%c0_8, %c0_9] : memref<2x384xbf16, #tpu.memory_space<vmem>>, vector<2x384xbf16>
    %c0_10 = arith.constant 0 : index
    %c0_11 = arith.constant 0 : index
    %8 = vector.load %arg5[%c0_10, %c0_11] : memref<384x80xbf16, #tpu.memory_space<vmem>>, vector<384x80xbf16>
    %cst_12 = arith.constant dense<0.000000e+00> : vector<2x80xf32>
    %9 = tpu.matmul %7, %8, %cst_12 {dimension_numbers = #tpu.dot_dimension_numbers<[1], [0], [0], [1], [0, 0, 1, 1], [], []>} : vector<2x384xbf16>, vector<384x80xbf16>, vector<2x80xf32> -> vector<2x80xf32>
    %10 = arith.maximumf %6, %9 : vector<2x80xf32>
    %c0_13 = arith.constant 0 : index
    %c0_14 = arith.constant 0 : index
    %11 = vector.load %arg4[%c0_13, %c0_14] : memref<2x384xbf16, #tpu.memory_space<vmem>>, vector<2x384xbf16>
    %c0_15 = arith.constant 0 : index
    %c0_16 = arith.constant 0 : index
    %12 = vector.load %arg5[%c0_15, %c0_16] : memref<384x80xbf16, #tpu.memory_space<vmem>>, vector<384x80xbf16>
    %cst_17 = arith.constant dense<0.000000e+00> : vector<2x80xf32>
    %13 = tpu.matmul %11, %12, %cst_17 {dimension_numbers = #tpu.dot_dimension_numbers<[1], [0], [0], [1], [0, 0, 1, 1], [], []>} : vector<2x384xbf16>, vector<384x80xbf16>, vector<2x80xf32> -> vector<2x80xf32>
    %14 = arith.maximumf %10, %13 : vector<2x80xf32>
    %c0_18 = arith.constant 0 : index
    %c0_19 = arith.constant 0 : index
    %15 = vector.load %arg6[%c0_18, %c0_19] : memref<1x80xf32, #tpu.memory_space<vmem>>, vector<1x80xf32>
    %16 = vector.broadcast %15 : vector<1x80xf32> to vector<2x80xf32>
    %17 = arith.addf %14, %16 : vector<2x80xf32>
    %cst_20 = arith.constant 0.000000e+00 : f32
    %18 = vector.broadcast %cst_20 : f32 to vector<2x80xf32>
    %19 = arith.maximumf %17, %18 : vector<2x80xf32>
    %20 = arith.truncf %19 : vector<2x80xf32> to vector<2x80xbf16>
    %c0_21 = arith.constant 0 : index
    %c0_22 = arith.constant 0 : index
    %21 = vector.load %arg7[%c0_21, %c0_22] : memref<80x40xbf16, #tpu.memory_space<vmem>>, vector<80x40xbf16>
    %cst_23 = arith.constant dense<0.000000e+00> : vector<2x40xf32>
    %22 = tpu.matmul %20, %21, %cst_23 {dimension_numbers = #tpu.dot_dimension_numbers<[1], [0], [0], [1], [0, 0, 1, 1], [], []>} : vector<2x80xbf16>, vector<80x40xbf16>, vector<2x40xf32> -> vector<2x40xf32>
    %c0_24 = arith.constant 0 : index
    %c0_25 = arith.constant 0 : index
    %23 = vector.load %arg8[%c0_24, %c0_25] : memref<1x40xf32, #tpu.memory_space<vmem>>, vector<1x40xf32>
    %24 = vector.broadcast %23 : vector<1x40xf32> to vector<2x40xf32>
    %25 = arith.addf %22, %24 : vector<2x40xf32>
    %cst_26 = arith.constant 0.000000e+00 : f32
    %26 = vector.broadcast %cst_26 : f32 to vector<2x40xf32>
    %27 = arith.maximumf %25, %26 : vector<2x40xf32>
    %28 = arith.truncf %27 : vector<2x40xf32> to vector<2x40xbf16>
    %c0_27 = arith.constant 0 : index
    %c0_28 = arith.constant 0 : index
    %29 = vector.load %arg9[%c0_27, %c0_28] : memref<40x20xbf16, #tpu.memory_space<vmem>>, vector<40x20xbf16>
    %cst_29 = arith.constant dense<0.000000e+00> : vector<2x20xf32>
    %30 = tpu.matmul %28, %29, %cst_29 {dimension_numbers = #tpu.dot_dimension_numbers<[1], [0], [0], [1], [0, 0, 1, 1], [], []>} : vector<2x40xbf16>, vector<40x20xbf16>, vector<2x20xf32> -> vector<2x20xf32>
    %c0_30 = arith.constant 0 : index
    %c0_31 = arith.constant 0 : index
    %31 = vector.load %arg10[%c0_30, %c0_31] : memref<1x20xf32, #tpu.memory_space<vmem>>, vector<1x20xf32>
    %32 = vector.broadcast %31 : vector<1x20xf32> to vector<2x20xf32>
    %33 = arith.addf %30, %32 : vector<2x20xf32>
    %cst_32 = arith.constant 0.000000e+00 : f32
    %34 = vector.broadcast %cst_32 : f32 to vector<2x20xf32>
    %35 = arith.maximumf %33, %34 : vector<2x20xf32>
    %36 = arith.truncf %35 : vector<2x20xf32> to vector<2x20xbf16>
    %c0_33 = arith.constant 0 : index
    %c0_34 = arith.constant 0 : index
    %37 = vector.load %arg11[%c0_33, %c0_34] : memref<20x10xbf16, #tpu.memory_space<vmem>>, vector<20x10xbf16>
    %cst_35 = arith.constant dense<0.000000e+00> : vector<2x10xf32>
    %38 = tpu.matmul %36, %37, %cst_35 {dimension_numbers = #tpu.dot_dimension_numbers<[1], [0], [0], [1], [0, 0, 1, 1], [], []>} : vector<2x20xbf16>, vector<20x10xbf16>, vector<2x10xf32> -> vector<2x10xf32>
    %c0_36 = arith.constant 0 : index
    %c0_37 = arith.constant 0 : index
    %39 = vector.load %arg12[%c0_36, %c0_37] : memref<1x10xf32, #tpu.memory_space<vmem>>, vector<1x10xf32>
    %40 = vector.broadcast %39 : vector<1x10xf32> to vector<2x10xf32>
    %41 = arith.addf %38, %40 : vector<2x10xf32>
    %cst_38 = arith.constant dense<0xFF800000> : vector<2xf32>
    %42 = vector.multi_reduction <maximumf>, %41, %cst_38 [1] : vector<2x10xf32> to vector<2xf32>
    %43 = vector.shape_cast %42 : vector<2xf32> to vector<2x1xf32>
    %44 = vector.broadcast %43 : vector<2x1xf32> to vector<2x10xf32>
    %45 = arith.subf %41, %44 : vector<2x10xf32>
    %46 = math.exp %45 : vector<2x10xf32>
    %cst_39 = arith.constant dense<0.000000e+00> : vector<2xf32>
    %47 = vector.multi_reduction <add>, %46, %cst_39 [1] : vector<2x10xf32> to vector<2xf32>
    %48 = vector.shape_cast %47 : vector<2xf32> to vector<2x1xf32>
    %49 = math.log %48 : vector<2x1xf32>
    %50 = vector.broadcast %49 : vector<2x1xf32> to vector<2x10xf32>
    %51 = arith.subf %45, %50 : vector<2x10xf32>
    %c0_40 = arith.constant 0 : index
    %c0_41 = arith.constant 0 : index
    %52 = vector.load %arg13[%c0_40, %c0_41] : memref<2x10xf32, #tpu.memory_space<vmem>>, vector<2x10xf32>
    tpu.vector_store %arg13[%c0_40, %c0_41], %51 {strides = array<i32>} : memref<2x10xf32, #tpu.memory_space<vmem>>, vector<2x10xf32>,
    return
  }
  func.func @transform_0(%arg0: i32) -> (i32, i32) {
    %c0_i32 = arith.constant 0 : i32
    %c0_i32_0 = arith.constant 0 : i32
    return %arg0, %c0_i32 : i32, i32
  }
  func.func @transform_1(%arg0: i32) -> (i32, i32) {
    %c0_i32 = arith.constant 0 : i32
    %c0_i32_0 = arith.constant 0 : i32
    return %arg0, %c0_i32 : i32, i32
  }
  func.func @transform_2(%arg0: i32) -> (i32, i32) {
    %c0_i32 = arith.constant 0 : i32
    %c0_i32_0 = arith.constant 0 : i32
    return %arg0, %c0_i32 : i32, i32
  }
  func.func @transform_3(%arg0: i32) -> (i32, i32) {
    %c0_i32 = arith.constant 0 : i32
    %c0_i32_0 = arith.constant 0 : i32
    return %arg0, %c0_i32 : i32, i32
  }
  func.func @transform_4(%arg0: i32) -> (i32, i32) {
    %c0_i32 = arith.constant 0 : i32
    %c0_i32_0 = arith.constant 0 : i32
    %c0_i32_1 = arith.constant 0 : i32
    return %c0_i32, %c0_i32_0 : i32, i32
  }
  func.func @transform_5(%arg0: i32) -> (i32, i32) {
    %c0_i32 = arith.constant 0 : i32
    %c0_i32_0 = arith.constant 0 : i32
    %c0_i32_1 = arith.constant 0 : i32
    return %c0_i32, %c0_i32_0 : i32, i32
  }
  func.func @transform_6(%arg0: i32) -> (i32, i32) {
    %c0_i32 = arith.constant 0 : i32
    %c0_i32_0 = arith.constant 0 : i32
    %c0_i32_1 = arith.constant 0 : i32
    return %c0_i32, %c0_i32_0 : i32, i32
  }
  func.func @transform_7(%arg0: i32) -> (i32, i32) {
    %c0_i32 = arith.constant 0 : i32
    %c0_i32_0 = arith.constant 0 : i32
    %c0_i32_1 = arith.constant 0 : i32
    return %c0_i32, %c0_i32_0 : i32, i32
  }
  func.func @transform_8(%arg0: i32) -> (i32, i32) {
    %c0_i32 = arith.constant 0 : i32
    %c0_i32_0 = arith.constant 0 : i32
    %c0_i32_1 = arith.constant 0 : i32
    return %c0_i32, %c0_i32_0 : i32, i32
  }
  func.func @transform_9(%arg0: i32) -> (i32, i32) {
    %c0_i32 = arith.constant 0 : i32
    %c0_i32_0 = arith.constant 0 : i32
    %c0_i32_1 = arith.constant 0 : i32
    return %c0_i32, %c0_i32_0 : i32, i32
  }
  func.func @transform_10(%arg0: i32) -> (i32, i32) {
    %c0_i32 = arith.constant 0 : i32
    %c0_i32_0 = arith.constant 0 : i32
    %c0_i32_1 = arith.constant 0 : i32
    return %c0_i32, %c0_i32_0 : i32, i32
  }
  func.func @transform_11(%arg0: i32) -> (i32, i32) {
    %c0_i32 = arith.constant 0 : i32
    %c0_i32_0 = arith.constant 0 : i32
    %c0_i32_1 = arith.constant 0 : i32
    return %c0_i32, %c0_i32_0 : i32, i32
  }
  func.func @transform_12(%arg0: i32) -> (i32, i32) {
    %c0_i32 = arith.constant 0 : i32
    %c0_i32_0 = arith.constant 0 : i32
    return %arg0, %c0_i32 : i32, i32
  }
}

</mosaic_0001>

<bundles_post_ra>
// kernel: forward.4
= control target key start
LH: loop header
LB: loop body
LE: loop exit
PB: predicated region body
PF: predicated region fallthrough
CT: control target
= control target key end

     0   :  { %s1439_s5 = smov 98   ;;  %s1440_s6 = smov 108   ;;  %vm1196_vm0 = vcmask 76800   ;;  %s2410_s1 = inlined_call_operand.vmem [shape: bf16[128,40], index: 1, kind: input, shape index: {}]   ;;  %s2411_s0 = inlined_call_operand.vmem [shape: bf16[392,128], index: 0, kind: input, shape index: {}]   ;;  %s2412_s2 = inlined_call_operand.vmem [shape: f32[1,10], index: 2, kind: input, shape index: {}]   ;;  %s2413_s3 = inlined_call_operand.vmem [shape: bf16[392,10], index: 3, kind: output, shape index: {}]  }
   0x1   :  { %v1409_v0 = vld [vmem:[%s2410_s1 + $0x38] sm:$0xff]  ;;  %v1408_v1 = vld [vmem:[%s2410_s1 + $0x30] sm:$0xff]  ;;  %v1407_v2 = vld [vmem:[%s2410_s1 + $0x28] sm:$0xff]  ;;  %s1441_s7 = smov 118  }
   0x2   :  { %275 = vmatpush.bf16.msra.mxu0 %v1409_v0  ;;  %1410 = vmatpush.bf16.msra.mxu1 %v1409_v0  ;;  %v1406_v3 = vld [vmem:[%s2410_s1 + $0x20] sm:$0xff]  ;;  %v1405_v4 = vld [vmem:[%s2410_s1 + $0x18] sm:$0xff]  ;;  %v1404_v5 = vld [vmem:[%s2410_s1 + $0x10] sm:$0xff] }
   0x3   :  { %1411 = vmatpush.bf16.msra.mxu2 %v1409_v0  ;;  %1412 = vmatpush.bf16.msra.mxu3 %v1409_v0  ;;  %v1403_v6 = vld [vmem:[%s2410_s1 + $0x8] sm:$0xff]  ;;  %v1402_v7 = vld [vmem:[%s2410_s1] sm:$0xff]  ;;  %v1384_v9 = vld [vmem:[%s2411_s0 + $0x30] sm:$0xff] }
   0x4   :  { %v1378_v8 = vld [vmem:[%s2411_s0] sm:$0xff]  ;;  %v1397_v11 = vld [vmem:[%s2411_s0 + $0x98] sm:$0xff]  ;;  %v1379_v12 = vld [vmem:[%s2411_s0 + $0x8] sm:$0xff] }
   0x5   :  { %v1390_v10 = vld [vmem:[%s2411_s0 + $0x60] sm:$0xff]  ;;  %v1385_v13 = vld [vmem:[%s2411_s0 + $0x38] sm:$0xff]  ;;  %v1391_v14 = vld [vmem:[%s2411_s0 + $0x68] sm:$0xff] }
   0x6   :  { %276 = vmatpush.bf16.msra.mxu0 %v1408_v1  ;;  %1413 = vmatpush.bf16.msra.mxu1 %v1408_v1  ;;  %v1398_v15 = vld [vmem:[%s2411_s0 + $0xa0] sm:$0xff]  ;;  %v1380_v16 = vld [vmem:[%s2411_s0 + $0x10] sm:$0xff]  ;;  %v1399_v18 = vld [vmem:[%s2411_s0 + $0xa8] sm:$0xff] }
   0x7   :  { %1414 = vmatpush.bf16.msra.mxu2 %v1408_v1  ;;  %1415 = vmatpush.bf16.msra.mxu3 %v1408_v1  ;;  %v1386_v17 = vld [vmem:[%s2411_s0 + $0x40] sm:$0xff]  ;;  %v1392_v19 = vld [vmem:[%s2411_s0 + $0x70] sm:$0xff]  ;;  %v1381_v20 = vld [vmem:[%s2411_s0 + $0x18] sm:$0xff] }
   0x8   :  { %v1387_v21 = vld [vmem:[%s2411_s0 + $0x48] sm:$0xff]  ;;  %v1393_v22 = vld [vmem:[%s2411_s0 + $0x78] sm:$0xff]  ;;  %v1400_v23 = vld [vmem:[%s2411_s0 + $0xb0] sm:$0xff] }
   0x9   :  { %v1382_v25 = vld [vmem:[%s2411_s0 + $0x20] sm:$0xff]  ;;  %v1388_v28 = vld [vmem:[%s2411_s0 + $0x50] sm:$0xff]  ;;  %v1401_v30 = vld [vmem:[%s2411_s0 + $0xb8] sm:$0xff] }
   0xa   :  { %277 = vmatpush.bf16.msra.mxu0 %v1407_v2  ;;  %1416 = vmatpush.bf16.msra.mxu1 %v1407_v2  ;;  %v1394_v29 = vld [vmem:[%s2411_s0 + $0x80] sm:$0xff]  ;;  %v1383_v40 = vld [vmem:[%s2411_s0 + $0x28] sm:$0xff]  ;;  %v1389_v44 = vld [vmem:[%s2411_s0 + $0x58] sm:$0xff] }
   0xb   :  { %1417 = vmatpush.bf16.msra.mxu2 %v1407_v2  ;;  %1418 = vmatpush.bf16.msra.mxu3 %v1407_v2  ;;  %v62_v39 = vld [vmem:[%s2411_s0 + $0xc0] sm:$0xf]  ;;  %v1395_v45 = vld [vmem:[%s2411_s0 + $0x88] sm:$0xff]  ;;  %v1396_v51 = vld [vmem:[%s2411_s0 + $0x90] sm:$0xff] }
   0xc   :  { %v176_v41 = vunpack.c.l.b16 %v62_v39  ;;  %v1699_v0 = vld [vmem:[%s2412_s2] ss:$0 sm:$0xff] }
   0xe   :  { %278 = vmatpush.bf16.msra.mxu0 %v1406_v3  ;;  %1419 = vmatpush.bf16.msra.mxu1 %v1406_v3  ;;  %v201_v42 = vpack.c.b16 %v176_v41, %v176_v41 }
   0xf   :  { %1420 = vmatpush.bf16.msra.mxu2 %v1406_v3  ;;  %1421 = vmatpush.bf16.msra.mxu3 %v1406_v3 }
  0x12   :  { %279 = vmatpush.bf16.msra.mxu0 %v1405_v4  ;;  %1422 = vmatpush.bf16.msra.mxu1 %v1405_v4 }
  0x13   :  { %1423 = vmatpush.bf16.msra.mxu2 %v1405_v4  ;;  %1424 = vmatpush.bf16.msra.mxu3 %v1405_v4 }
  0x16   :  { %280 = vmatpush.bf16.msra.mxu0 %v1404_v5  ;;  %1425 = vmatpush.bf16.msra.mxu1 %v1404_v5 }
  0x17   :  { %1426 = vmatpush.bf16.msra.mxu2 %v1404_v5  ;;  %1427 = vmatpush.bf16.msra.mxu3 %v1404_v5 }
  0x1a   :  { %281 = vmatpush.bf16.msra.mxu0 %v1403_v6  ;;  %1428 = vmatpush.bf16.msra.mxu1 %v1403_v6 }
  0x1b   :  { %1429 = vmatpush.bf16.msra.mxu2 %v1403_v6  ;;  %1430 = vmatpush.bf16.msra.mxu3 %v1403_v6 }
  0x1e   :  { %282 = vmatpush.bf16.msra.mxu0 %v1402_v7  ;;  %1431 = vmatpush.bf16.msra.mxu1 %v1402_v7 }
  0x1f   :  { %1432 = vmatpush.bf16.msra.mxu2 %v1402_v7  ;;  %1433 = vmatpush.bf16.msra.mxu3 %v1402_v7 }
  0x21   :  { %283 = vmatmul.bf16.vlgmr.msra.gmra.mxu0 %v1378_v8  ;;  %313 = vmatmul.bf16.vlgmr.msra.gmra.mxu1 %v1384_v9 }
  0x22   :  { %343 = vmatmul.bf16.vlgmr.msra.gmra.mxu2 %v1390_v10  ;;  %378 = vmatmul.bf16.vlgmr.msra.gmra.mxu3 %v1397_v11 }
  0x31   :  { %288 = vmatmul.bf16.gmra.mxu0 %v1379_v12  ;;  %318 = vmatmul.bf16.gmra.mxu1 %v1385_v13 }
  0x32   :  { %348 = vmatmul.bf16.gmra.mxu2 %v1391_v14  ;;  %383 = vmatmul.bf16.gmra.mxu3 %v1398_v15 }
  0x41   :  { %293 = vmatmul.bf16.gmra.mxu0 %v1380_v16  ;;  %323 = vmatmul.bf16.gmra.mxu1 %v1386_v17 }
  0x42   :  { %388 = vmatmul.bf16.gmra.mxu3 %v1399_v18  ;;  %353 = vmatmul.bf16.gmra.mxu2 %v1392_v19 }
  0x51   :  { %298 = vmatmul.bf16.gmra.mxu0 %v1381_v20  ;;  %328 = vmatmul.bf16.gmra.mxu1 %v1387_v21 }
  0x52   :  { %358 = vmatmul.bf16.gmra.mxu2 %v1393_v22  ;;  %393 = vmatmul.bf16.gmra.mxu3 %v1400_v23 }
  0x61   :  { %303 = vmatmul.bf16.gmra.mxu0 %v1382_v25  ;;  %333 = vmatmul.bf16.gmra.mxu1 %v1388_v28 }
  0x62   :  { %363 = vmatmul.bf16.gmra.mxu2 %v1394_v29  ;;  %398 = vmatmul.bf16.gmra.mxu3 %v1401_v30 }
  0x71   :  { %308 = vmatmul.bf16.gmra.mxu0 %v1383_v40  ;;  %338 = vmatmul.bf16.gmra.mxu1 %v1389_v44 }
  0x72   :  { %403 = vmatmul.bf16.gmra.mxu3 %v201_v42  ;;  %368 = vmatmul.bf16.gmra.mxu2 %v1395_v45 }
  0x82   :  { %373 = vmatmul.bf16.gmra.mxu2 %v1396_v51 }
  0x9e   :  { %v1534_v24 = vpop.f32.mrf.mxu0  ;;  %v1547_v27 = vpop.f32.mrf.mxu1 }
  0x9f   :  { %849 = vrot.lane.b32.xlu2 %v1534_v24, %s1439_s5  ;;  %653 = vrot.lane.b32.xlu1 %v1534_v24, %s1440_s6 }
  0xa0   :  { %457 = vrot.lane.b32.xlu0 %v1534_v24, %s1441_s7 }
  0xa5   :  { %v1545_v26 = vpop.f32.mrf.mxu3  ;;  %v1566_v32 = vpop.f32.mrf.mxu2 }
  0xa6   :  { %v1564_v31 = vpop.f32.mrf.mxu0  ;;  %v1574_v33 = vpop.f32.mrf.mxu1 }
  0xa7   :  { %533 = vrot.lane.b32.xlu2 %v1545_v26, %s1441_s7  ;;  %677 = vrot.lane.b32.xlu1 %v1547_v27, %s1440_s6 }
  0xa8   :  { %481 = vrot.lane.b32.xlu0 %v1547_v27, %s1441_s7 }
  0xad   :  { %v1582_v34 = vpop.f32.mrf.mxu2  ;;  %v1592_v36 = vpop.f32.mrf.mxu3 }
  0xae   :  { %v1590_v35 = vpop.f32.mrf.mxu1  ;;  %v1602_v38 = vpop.f32.mrf.mxu0 }
  0xaf   :  { %701 = vrot.lane.b32.xlu1 %v1566_v32, %s1440_s6  ;;  %655 = vrot.lane.b32.xlu2 %v1564_v31, %s1440_s6 }
  0xb0   :  { %505 = vrot.lane.b32.xlu0 %v1566_v32, %s1441_s7 }
  0xb5   :  { %v1600_v37 = vpop.f32.mrf.mxu2  ;;  %v1616_v43 = vpop.f32.mrf.mxu3 }
  0xb6   :  { %v1630_v46 = vpop.f32.mrf.mxu0  ;;  %v1642_v49 = vpop.f32.mrf.mxu1 }
  0xb7   :  { %483 = vrot.lane.b32.xlu1 %v1574_v33, %s1441_s7  ;;  %679 = vrot.lane.b32.xlu2 %v1574_v33, %s1440_s6 }
  0xb8   :  { %729 = vrot.lane.b32.xlu0 %v1545_v26, %s1440_s6 }
  0xbd   :  { %v1632_v47 = vpop.f32.mrf.mxu3  ;;  %v1650_v50 = vpop.f32.mrf.mxu2 }
  0xbe   :  { %v1640_v48 = vpop.f32.mrf.mxu0  ;;  %v1661_v52 = vpop.f32.mrf.mxu1 }
  0xbf   :  { %507 = vrot.lane.b32.xlu1 %v1582_v34, %s1441_s7  ;;  %703 = vrot.lane.b32.xlu2 %v1582_v34, %s1440_s6 }
  0xc0   :  { %459 = vrot.lane.b32.xlu0 %v1564_v31, %s1441_s7 }
  0xc5   :  { %v1669_v54 = vpop.f32.mrf.mxu2  ;;  %v1671_v55 = vpop.f32.mrf.mxu3 }
  0xc6   :  { %v1679_v57 = vpop.f32.mrf.mxu0  ;;  %v1687_v59 = vpop.f32.mrf.mxu1 }
  0xc7   :  { %731 = vrot.lane.b32.xlu1 %v1592_v36, %s1440_s6  ;;  %485 = vrot.lane.b32.xlu2 %v1590_v35, %s1441_s7 }
  0xc8   :  { %535 = vrot.lane.b32.xlu0 %v1592_v36, %s1441_s7 }
  0xcd   :  { %v1701_v2 = vpop.f32.mrf.mxu3  ;;  %v1703_v3 = vpop.f32.mrf.mxu2 }
  0xce   :  { %2415 = vst [vmem:[#allocation2_spill] sm:$0xff] %v1701_v2  ;;  %v1715_v13 = vpop.f32.mrf.mxu0  ;;  %v1732_v20 = vpop.f32.mrf.mxu1 }
  0xcf   :  { %509 = vrot.lane.b32.xlu2 %v1600_v37, %s1441_s7  ;;  %461 = vrot.lane.b32.xlu1 %v1602_v38, %s1441_s7 }
  0xd0   :  { %657 = vrot.lane.b32.xlu0 %v1602_v38, %s1440_s6 }
  0xd5   :  { %v1728_v18 = vpop.f32.mrf.mxu3  ;;  %v1748_v39 = vpop.f32.mrf.mxu2 }
  0xd6   :  { %v1746_v30 = vpop.f32.mrf.mxu0 }
  0xd7   :  { %733 = vrot.lane.b32.xlu2 %v1616_v43, %s1440_s6  ;;  %537 = vrot.lane.b32.xlu1 %v1616_v43, %s1441_s7 }
  0xd8   :  { %681 = vrot.lane.b32.xlu0 %v1590_v35, %s1440_s6 }
  0xdf   :  { %539 = vrot.lane.b32.xlu2 %v1632_v47, %s1441_s7  ;;  %463 = vrot.lane.b32.xlu1 %v1630_v46, %s1441_s7 }
  0xe0   :  { %705 = vrot.lane.b32.xlu0 %v1600_v37, %s1440_s6 }
  0xe7   :  { %659 = vrot.lane.b32.xlu1 %v1630_v46, %s1440_s6  ;;  %465 = vrot.lane.b32.xlu2 %v1640_v48, %s1441_s7 }
  0xe8   :  { %487 = vrot.lane.b32.xlu0 %v1642_v49, %s1441_s7 }
  0xef   :  { %683 = vrot.lane.b32.xlu1 %v1642_v49, %s1440_s6  ;;  %661 = vrot.lane.b32.xlu2 %v1640_v48, %s1440_s6 }
  0xf0   :  { %511 = vrot.lane.b32.xlu0 %v1650_v50, %s1441_s7 }
  0xf7   :  { %707 = vrot.lane.b32.xlu1 %v1650_v50, %s1440_s6  ;;  %685 = vrot.lane.b32.xlu2 %v1661_v52, %s1440_s6 }
  0xf8   :  { %735 = vrot.lane.b32.xlu0 %v1632_v47, %s1440_s6 }
  0xf9   :  { %v850_v53 = vpop.permute.xlu2 %849 }
  0xff   :  { %489 = vrot.lane.b32.xlu1 %v1661_v52, %s1441_s7  ;;  %709 = vrot.lane.b32.xlu2 %v1669_v54, %s1440_s6 }
 0x100   :  { %541 = vrot.lane.b32.xlu0 %v1671_v55, %s1441_s7 }
 0x101   :  { %v534_v56 = vpop.permute.xlu2 %533 }
 0x102   :  { %v642_v21 = vmax.f32 %v1545_v26, %v534_v56  ;;  %v1762_v56 = vpop.f32.mrf.mxu1 }
 0x107   :  { %513 = vrot.lane.b32.xlu1 %v1669_v54, %s1441_s7  ;;  %467 = vrot.lane.b32.xlu2 %v1679_v57, %s1441_s7 }
 0x108   :  { %663 = vrot.lane.b32.xlu0 %v1679_v57, %s1440_s6 }
 0x109   :  { %v656_v58 = vpop.permute.xlu2 %655 }
 0x10f   :  { %737 = vrot.lane.b32.xlu1 %v1671_v55, %s1440_s6  ;;  %491 = vrot.lane.b32.xlu2 %v1687_v59, %s1441_s7 }
 0x110   :  { %687 = vrot.lane.b32.xlu0 %v1687_v59, %s1440_s6 }
 0x111   :  { %v654_v60 = vpop.permute.xlu1 %653  ;;  %v680_v61 = vpop.permute.xlu2 %679 }
 0x112   :  { %v458_v62 = vpop.permute.xlu0 %457 }
 0x113   :  { %v604_v63 = vmax.f32 %v1534_v24, %v458_v62 }
 0x115   :  { %v800_v1 = vmax.f32 %v604_v63, %v654_v60 }
 0x117   :  { %v996_v4 = vmax.f32 %v800_v1, %v850_v53  ;;  %543 = vrot.lane.b32.xlu1 %v1701_v2, %s1441_s7  ;;  %515 = vrot.lane.b32.xlu2 %v1703_v3, %s1441_s7 }
 0x118   :  { %711 = vrot.lane.b32.xlu0 %v1703_v3, %s1440_s6 }
 0x119   :  { %v1049_v5 = vadd.f32 %v1699_v0, %v996_v4  ;;  %v678_v6 = vpop.permute.xlu1 %677  ;;  %v704_v7 = vpop.permute.xlu2 %703 }
 0x11a   :  { %v482_v8 = vpop.permute.xlu0 %481  ;;  %v1777_v4 = vpop.f32.mrf.mxu3 }
 0x11b   :  { %v1098_v9 = vmax.f32 %v1049_v5, 0.0  ;;  %v616_v10 = vmax.f32 %v1547_v27, %v482_v8 }
 0x11d   :  { %v1147_v11 = vpack.c.bf16 %v1098_v9, %v1098_v9  ;;  %v1713_v12 = vmax.f32 %v616_v10, %v678_v6  ;;  %v1788_v10 = vpop.f32.mrf.mxu0 }
 0x11f   :  { %2416 = vst [vmem:[#allocation3_spill] sm:$0xff] %v1713_v12  ;;  %739 = vrot.lane.b32.xlu2 %v1701_v2, %s1440_s6  ;;  %665 = vrot.lane.b32.xlu1 %v1715_v13, %s1440_s6 }
 0x120   :  { %1197 = vst.msk [vmem:[%s2413_s3] sm:$0xf] %vm1196_vm0, %v1147_v11  ;;  %469 = vrot.lane.b32.xlu0 %v1715_v13, %s1441_s7 }
 0x121   :  { %v702_v14 = vpop.permute.xlu1 %701  ;;  %v486_v15 = vpop.permute.xlu2 %485 }
 0x122   :  { %v506_v16 = vpop.permute.xlu0 %505  ;;  %v1790_v11 = vpop.f32.mrf.mxu3 }
 0x123   :  { %v628_v17 = vmax.f32 %v1566_v32, %v506_v16  ;;  %v618_v16 = vmax.f32 %v1590_v35, %v486_v15 }
 0x125   :  { %v1730_v19 = vmax.f32 %v628_v17, %v702_v14 }
 0x127   :  { %2417 = vst [vmem:[#allocation4_spill] sm:$0xff] %v1730_v19  ;;  %545 = vrot.lane.b32.xlu2 %v1728_v18, %s1441_s7  ;;  %689 = vrot.lane.b32.xlu1 %v1732_v20, %s1440_s6 }
 0x128   :  { %493 = vrot.lane.b32.xlu0 %v1732_v20, %s1441_s7 }
 0x129   :  { %v484_v22 = vpop.permute.xlu1 %483  ;;  %v510_v23 = vpop.permute.xlu2 %509 }
 0x12a   :  { %v617_v24 = vmax.f32 %v1574_v33, %v484_v22  ;;  %v730_v25 = vpop.permute.xlu0 %729  ;;  %v1815_v15 = vpop.f32.mrf.mxu3 }
 0x12b   :  { %v1742_v28 = vmax.f32 %v642_v21, %v730_v25 }
 0x12c   :  { %v1744_v29 = vmax.f32 %v617_v24, %v680_v61 }
 0x12d   :  { %2418 = vst [vmem:[#allocation5_spill] sm:$0xff] %v1742_v28 }
 0x12e   :  { %2419 = vst [vmem:[#allocation6_spill] sm:$0xff] %v1744_v29 }
 0x12f   :  { %713 = vrot.lane.b32.xlu1 %v1748_v39, %s1440_s6  ;;  %667 = vrot.lane.b32.xlu2 %v1746_v30, %s1440_s6 }
 0x130   :  { %517 = vrot.lane.b32.xlu0 %v1748_v39, %s1441_s7 }
 0x131   :  { %v508_v40 = vpop.permute.xlu1 %507  ;;  %v734_v41 = vpop.permute.xlu2 %733 }
 0x132   :  { %v629_v42 = vmax.f32 %v1582_v34, %v508_v40  ;;  %v460_v44 = vpop.permute.xlu0 %459 }
 0x133   :  { %v605_v45 = vmax.f32 %v1564_v31, %v460_v44  ;;  %v1807_v44 = vpop.f32.mrf.mxu1 }
 0x134   :  { %v1758_v51 = vmax.f32 %v629_v42, %v704_v7 }
 0x135   :  { %v1760_v53 = vmax.f32 %v605_v45, %v656_v58  ;;  %v1775_v58 = vpop.f32.mrf.mxu2  ;;  %v630_v45 = vmax.f32 %v1600_v37, %v510_v23 }
 0x136   :  { %2420 = vst [vmem:[#allocation7_spill] sm:$0xff] %v1758_v51 }
 0x137   :  { %2421 = vst [vmem:[#allocation8_spill] sm:$0xff] %v1760_v53  ;;  %691 = vrot.lane.b32.xlu2 %v1762_v56, %s1440_s6  ;;  %471 = vrot.lane.b32.xlu1 %v1746_v30, %s1441_s7 }
 0x138   :  { %741 = vrot.lane.b32.xlu0 %v1728_v18, %s1440_s6 }
 0x139   :  { %v732_v60 = vpop.permute.xlu1 %731  ;;  %v1770_v61 = vpop.permute.xlu2 %539 }
 0x13a   :  { %v536_v62 = vpop.permute.xlu0 %535 }
 0x13b   :  { %v643_v63 = vmax.f32 %v1592_v36, %v536_v62 }
 0x13d   :  { %v1773_v1 = vmax.f32 %v643_v63, %v732_v60 }
 0x13f   :  { %2422 = vst [vmem:[#allocation9_spill] sm:$0xff] %v1773_v1  ;;  %715 = vrot.lane.b32.xlu2 %v1775_v58, %s1440_s6  ;;  %495 = vrot.lane.b32.xlu1 %v1762_v56, %s1441_s7 }
 0x140   :  { %547 = vrot.lane.b32.xlu0 %v1777_v4, %s1441_s7 }
 0x141   :  { %v462_v5 = vpop.permute.xlu1 %461  ;;  %v466_v6 = vpop.permute.xlu2 %465 }
 0x142   :  { %v658_v7 = vpop.permute.xlu0 %657  ;;  %v606_v8 = vmax.f32 %v1602_v38, %v462_v5  ;;  %v608_v14 = vmax.f32 %v1640_v48, %v466_v6  ;;  %v1820_v5 = vpop.f32.mrf.mxu2 }
 0x144   :  { %v1786_v9 = vmax.f32 %v606_v8, %v658_v7  ;;  %v1829_v7 = vpop.f32.mrf.mxu3 }
 0x147   :  { %519 = vrot.lane.b32.xlu1 %v1775_v58, %s1441_s7  ;;  %473 = vrot.lane.b32.xlu2 %v1788_v10, %s1441_s7 }
 0x148   :  { %669 = vrot.lane.b32.xlu0 %v1788_v10, %s1440_s6 }
 0x149   :  { %v538_v17 = vpop.permute.xlu1 %537  ;;  %v662_v21 = vpop.permute.xlu2 %661 }
 0x14a   :  { %v682_v22 = vpop.permute.xlu0 %681  ;;  %v644_v24 = vmax.f32 %v1616_v43, %v538_v17  ;;  %v1801_v25 = vmax.f32 %v608_v14, %v662_v21  ;;  %v1833_v17 = vpop.f32.mrf.mxu0 }
 0x14b   :  { %v1803_v40 = vmax.f32 %v618_v16, %v682_v22  ;;  %v1861_v51 = vpop.f32.mrf.mxu2 }
 0x14c   :  { %2423 = vst [vmem:[#allocation10_spill] sm:$0xff] %v1801_v25  ;;  %v1805_v42 = vmax.f32 %v644_v24, %v734_v41  ;;  %v406_v22 = vpop.f32.mrf.mxu3 }
 0x14d   :  { %2424 = vst [vmem:[#allocation11_spill] sm:$0xff] %v1803_v40 }
 0x14e   :  { %2425 = vst [vmem:[#allocation12_spill] sm:$0xff] %v1805_v42 }
 0x14f   :  { %743 = vrot.lane.b32.xlu1 %v1777_v4, %s1440_s6  ;;  %497 = vrot.lane.b32.xlu2 %v1807_v44, %s1441_s7 }
 0x150   :  { %693 = vrot.lane.b32.xlu0 %v1807_v44, %s1440_s6 }
 0x151   :  { %v464_v60 = vpop.permute.xlu1 %463  ;;  %v686_v62 = vpop.permute.xlu2 %685 }
 0x152   :  { %v706_v63 = vpop.permute.xlu0 %705  ;;  %v607_v6 = vmax.f32 %v1630_v46, %v464_v60  ;;  %v1859_v1 = vpop.f32.mrf.mxu0 }
 0x153   :  { %v1818_v41 = vmax.f32 %v630_v45, %v706_v63 }
 0x155   :  { %2426 = vst [vmem:[#allocation13_spill] sm:$0xff] %v1818_v41 }
 0x157   :  { %549 = vrot.lane.b32.xlu1 %v1790_v11, %s1441_s7  ;;  %521 = vrot.lane.b32.xlu2 %v1820_v5, %s1441_s7 }
 0x158   :  { %717 = vrot.lane.b32.xlu0 %v1820_v5, %s1440_s6 }
 0x159   :  { %v660_v23 = vpop.permute.xlu1 %659  ;;  %v710_v8 = vpop.permute.xlu2 %709 }
 0x15a   :  { %v488_v14 = vpop.permute.xlu0 %487  ;;  %v1831_v16 = vmax.f32 %v607_v6, %v660_v23  ;;  %v1844_v6 = vpop.f32.mrf.mxu1 }
 0x15b   :  { %v619_v21 = vmax.f32 %v1642_v49, %v488_v14  ;;  %v645_v14 = vmax.f32 %v1632_v47, %v1770_v61 }
 0x15f   :  { %745 = vrot.lane.b32.xlu2 %v1790_v11, %s1440_s6  ;;  %671 = vrot.lane.b32.xlu1 %v1833_v17, %s1440_s6 }
 0x160   :  { %475 = vrot.lane.b32.xlu0 %v1833_v17, %s1441_s7 }
 0x161   :  { %v684_v24 = vpop.permute.xlu1 %683  ;;  %v468_v45 = vpop.permute.xlu2 %467 }
 0x162   :  { %v512_v60 = vpop.permute.xlu0 %511  ;;  %v1842_v63 = vmax.f32 %v619_v21, %v684_v24 }
 0x163   :  { %v631_v23 = vmax.f32 %v1650_v50, %v512_v60 }
 0x164   :  { %2427 = vst [vmem:[#allocation14_spill] sm:$0xff] %v1842_v63 }
 0x167   :  { %551 = vrot.lane.b32.xlu2 %v1815_v15, %s1441_s7  ;;  %695 = vrot.lane.b32.xlu1 %v1844_v6, %s1440_s6 }
 0x168   :  { %499 = vrot.lane.b32.xlu0 %v1844_v6, %s1441_s7 }
 0x169   :  { %v708_v22 = vpop.permute.xlu1 %707  ;;  %v492_v42 = vpop.permute.xlu2 %491 }
 0x16a   :  { %v736_v21 = vpop.permute.xlu0 %735  ;;  %v1855_v24 = vmax.f32 %v631_v23, %v708_v22 }
 0x16b   :  { %v1857_v28 = vmax.f32 %v645_v14, %v736_v21  ;;  %v1870_v14 = vpop.f32.mrf.mxu1  ;;  %v609_v21 = vmax.f32 %v1679_v57, %v468_v45 }
 0x16c   :  { %2428 = vst [vmem:[#allocation15_spill] sm:$0xff] %v1855_v24 }
 0x16d   :  { %2429 = vst [vmem:[#allocation16_spill] sm:$0xff] %v1857_v28 }
 0x16f   :  { %719 = vrot.lane.b32.xlu1 %v1861_v51, %s1440_s6  ;;  %673 = vrot.lane.b32.xlu2 %v1859_v1, %s1440_s6 }
 0x170   :  { %523 = vrot.lane.b32.xlu0 %v1861_v51, %s1441_s7 }
 0x171   :  { %v490_v61 = vpop.permute.xlu1 %489  ;;  %v516_v60 = vpop.permute.xlu2 %515 }
 0x172   :  { %v542_v41 = vpop.permute.xlu0 %541  ;;  %v620_v23 = vmax.f32 %v1661_v52, %v490_v61 }
 0x174   :  { %v1872_v22 = vmax.f32 %v620_v23, %v686_v62  ;;  %v1884_v62 = vpop.f32.mrf.mxu2 }
 0x176   :  { %2430 = vst [vmem:[#allocation17_spill] sm:$0xff] %v1872_v22  ;;  %v646_v22 = vmax.f32 %v1671_v55, %v542_v41 }
 0x177   :  { %697 = vrot.lane.b32.xlu2 %v1870_v14, %s1440_s6  ;;  %477 = vrot.lane.b32.xlu1 %v1859_v1, %s1441_s7 }
 0x178   :  { %747 = vrot.lane.b32.xlu0 %v1815_v15, %s1440_s6 }
 0x179   :  { %v514_v28 = vpop.permute.xlu1 %513  ;;  %v740_v24 = vpop.permute.xlu2 %739 }
 0x17a   :  { %v632_v29 = vmax.f32 %v1669_v54, %v514_v28  ;;  %v664_v61 = vpop.permute.xlu0 %663  ;;  %v621_v28 = vmax.f32 %v1687_v59, %v492_v42  ;;  %v633_v42 = vmax.f32 %v1703_v3, %v516_v60 }
 0x17b   :  { %v1882_v19 = vmax.f32 %v609_v21, %v664_v61 }
 0x17c   :  { %v1886_v23 = vmax.f32 %v632_v29, %v710_v8  ;;  %v1900_v8 = vpop.f32.mrf.mxu0 }
 0x17d   :  { %2431 = vst [vmem:[#allocation18_spill] sm:$0xff] %v1882_v19 }
 0x17e   :  { %2432 = vst [vmem:[#allocation19_spill] sm:$0xff] %v1886_v23 }
 0x17f   :  { %721 = vrot.lane.b32.xlu2 %v1884_v62, %s1440_s6  ;;  %501 = vrot.lane.b32.xlu1 %v1870_v14, %s1441_s7 }
 0x180   :  { %553 = vrot.lane.b32.xlu0 %v1829_v7, %s1441_s7 }
 0x181   :  { %v738_v45 = vpop.permute.xlu1 %737  ;;  %v546_v21 = vpop.permute.xlu2 %545 }
 0x182   :  { %v1896_v61 = vmax.f32 %v646_v22, %v738_v45  ;;  %v688_v40 = vpop.permute.xlu0 %687 }
 0x183   :  { %v1898_v29 = vmax.f32 %v621_v28, %v688_v40 }
 0x184   :  { %2433 = vst [vmem:[#allocation20_spill] sm:$0xff] %v1896_v61  ;;  %v1914_v61 = vpop.f32.mrf.mxu1 }
 0x185   :  { %2434 = vst [vmem:[#allocation21_spill] sm:$0xff] %v1898_v29 }
 0x187   :  { %525 = vrot.lane.b32.xlu1 %v1884_v62, %s1441_s7  ;;  %479 = vrot.lane.b32.xlu2 %v1900_v8, %s1441_s7 }
 0x188   :  { %675 = vrot.lane.b32.xlu0 %v1900_v8, %s1440_s6 }
 0x189   :  { %v544_v41 = vpop.permute.xlu1 %543  ;;  %v668_v23 = vpop.permute.xlu2 %667 }
 0x18a   :  { %v647_v22 = vmax.f32 %v1701_v2, %v544_v41  ;;  %v712_v45 = vpop.permute.xlu0 %711 }
 0x18b   :  { %v1910_v40 = vmax.f32 %v633_v42, %v712_v45  ;;  %v1923_v42 = vpop.f32.mrf.mxu2 }
 0x18c   :  { %v1912_v28 = vmax.f32 %v647_v22, %v740_v24 }
 0x18d   :  { %2435 = vst [vmem:[#allocation22_spill] sm:$0xff] %v1910_v40 }
 0x18e   :  { %2436 = vst [vmem:[#allocation23_spill] sm:$0xff] %v1912_v28 }
 0x18f   :  { %749 = vrot.lane.b32.xlu1 %v1829_v7, %s1440_s6  ;;  %503 = vrot.lane.b32.xlu2 %v1914_v61, %s1441_s7 }
 0x190   :  { %699 = vrot.lane.b32.xlu0 %v1914_v61, %s1440_s6 }
 0x191   :  { %v666_v60 = vpop.permute.xlu1 %665  ;;  %v692_v29 = vpop.permute.xlu2 %691 }
 0x192   :  { %v470_v25 = vpop.permute.xlu0 %469 }
 0x193   :  { %v610_v41 = vmax.f32 %v1715_v13, %v470_v25  ;;  %v1934_v63 = vpop.f32.mrf.mxu2 }
 0x195   :  { %v1925_v24 = vmax.f32 %v610_v41, %v666_v60 }
 0x197   :  { %853 = vrot.lane.b32.xlu1 %v1602_v38, %s1439_s5  ;;  %527 = vrot.lane.b32.xlu2 %v1923_v42, %s1441_s7 }
 0x198   :  { %723 = vrot.lane.b32.xlu0 %v1923_v42, %s1440_s6 }
 0x199   :  { %v690_v22 = vpop.permute.xlu1 %689  ;;  %v716_v45 = vpop.permute.xlu2 %715 }
 0x19a   :  { %v494_v28 = vpop.permute.xlu0 %493 }
 0x19b   :  { %v622_v40 = vmax.f32 %v1732_v20, %v494_v28  ;;  %v1947_v28 = vpop.f32.mrf.mxu2 }
 0x19d   :  { %v1936_v25 = vmax.f32 %v622_v40, %v690_v22 }
 0x19f   :  { %2437 = vst [vmem:[#allocation24_spill] sm:$0xff] %v1936_v25  ;;  %725 = vrot.lane.b32.xlu1 %v1934_v63, %s1440_s6  ;;  %855 = vrot.lane.b32.xlu2 %v1630_v46, %s1439_s5  ;;  %v648_v46 = vmax.f32 %v1728_v18, %v546_v21 }
 0x1a0   :  { %529 = vrot.lane.b32.xlu0 %v1934_v63, %s1441_s7 }
 0x1a1   :  { %v714_v38 = vpop.permute.xlu1 %713  ;;  %v474_v60 = vpop.permute.xlu2 %473 }
 0x1a2   :  { %v518_v41 = vpop.permute.xlu0 %517 }
 0x1a3   :  { %v634_v19 = vmax.f32 %v1748_v39, %v518_v41 }
 0x1a5   :  { %v1945_v53 = vmax.f32 %v634_v19, %v714_v38 }
 0x1a7   :  { %2438 = vst [vmem:[#allocation25_spill] sm:$0xff] %v1945_v53  ;;  %531 = vrot.lane.b32.xlu1 %v1947_v28, %s1441_s7  ;;  %727 = vrot.lane.b32.xlu2 %v1947_v28, %s1440_s6 }
 0x1a8   :  { %851 = vrot.lane.b32.xlu0 %v1564_v31, %s1439_s5 }
 0x1a9   :  { %v472_v40 = vpop.permute.xlu1 %471  ;;  %v498_v22 = vpop.permute.xlu2 %497 }
 0x1aa   :  { %v742_v25 = vpop.permute.xlu0 %741  ;;  %v611_v41 = vmax.f32 %v1746_v30, %v472_v40 }
 0x1ab   :  { %v1957_v19 = vmax.f32 %v648_v46, %v742_v25 }
 0x1ac   :  { %v1959_v38 = vmax.f32 %v611_v41, %v668_v23 }
 0x1af   :  { %859 = vrot.lane.b32.xlu1 %v1679_v57, %s1439_s5  ;;  %861 = vrot.lane.b32.xlu2 %v1715_v13, %s1439_s5  ;;  %v612_v57 = vmax.f32 %v1788_v10, %v474_v60 }
 0x1b0   :  { %857 = vrot.lane.b32.xlu0 %v1640_v48, %s1439_s5 }
 0x1b1   :  { %v496_v31 = vpop.permute.xlu1 %495  ;;  %v522_v21 = vpop.permute.xlu2 %521 }
 0x1b2   :  { %v548_v53 = vpop.permute.xlu0 %547  ;;  %v623_v12 = vmax.f32 %v1762_v56, %v496_v31 }
 0x1b4   :  { %v1968_v2 = vmax.f32 %v623_v12, %v692_v29  ;;  %v649_v29 = vmax.f32 %v1777_v4, %v548_v53 }
 0x1b7   :  { %865 = vrot.lane.b32.xlu1 %v1788_v10, %s1439_s5  ;;  %867 = vrot.lane.b32.xlu2 %v1833_v17, %s1439_s5 }
 0x1b8   :  { %863 = vrot.lane.b32.xlu0 %v1746_v30, %s1439_s5  ;;  %v624_v30 = vmax.f32 %v1807_v44, %v498_v22 }
 0x1b9   :  { %v520_v13 = vpop.permute.xlu1 %519  ;;  %v746_v48 = vpop.permute.xlu2 %745 }
 0x1ba   :  { %v635_v23 = vmax.f32 %v1775_v58, %v520_v13  ;;  %v670_v25 = vpop.permute.xlu0 %669 }
 0x1bb   :  { %v1978_v46 = vmax.f32 %v612_v57, %v670_v25 }
 0x1bc   :  { %v1980_v12 = vmax.f32 %v635_v23, %v716_v45 }
 0x1bf   :  { %871 = vrot.lane.b32.xlu1 %v1900_v8, %s1439_s5  ;;  %873 = vrot.lane.b32.xlu2 %v1547_v27, %s1439_s5  ;;  %v636_v27 = vmax.f32 %v1820_v5, %v522_v21 }
 0x1c0   :  { %869 = vrot.lane.b32.xlu0 %v1859_v1, %s1439_s5 }
 0x1c1   :  { %v744_v10 = vpop.permute.xlu1 %743  ;;  %v552_v60 = vpop.permute.xlu2 %551 }
 0x1c2   :  { %v1990_v40 = vmax.f32 %v649_v29, %v744_v10  ;;  %v694_v41 = vpop.permute.xlu0 %693 }
 0x1c3   :  { %v1992_v45 = vmax.f32 %v624_v30, %v694_v41 }
 0x1c7   :  { %877 = vrot.lane.b32.xlu1 %v1590_v35, %s1439_s5  ;;  %879 = vrot.lane.b32.xlu2 %v1642_v49, %s1439_s5 }
 0x1c8   :  { %875 = vrot.lane.b32.xlu0 %v1574_v33, %s1439_s5 }
 0x1c9   :  { %v550_v53 = vpop.permute.xlu1 %549  ;;  %v674_v22 = vpop.permute.xlu2 %673 }
 0x1ca   :  { %v650_v31 = vmax.f32 %v1790_v11, %v550_v53  ;;  %v718_v57 = vpop.permute.xlu0 %717 }
 0x1cb   :  { %v2002_v13 = vmax.f32 %v636_v27, %v718_v57 }
 0x1cc   :  { %v2004_v23 = vmax.f32 %v650_v31, %v746_v48 }
 0x1cf   :  { %883 = vrot.lane.b32.xlu1 %v1687_v59, %s1439_s5  ;;  %885 = vrot.lane.b32.xlu2 %v1732_v20, %s1439_s5 }
 0x1d0   :  { %881 = vrot.lane.b32.xlu0 %v1661_v52, %s1439_s5 }
 0x1d1   :  { %v2012_v33 = vpop.permute.xlu1 %671  ;;  %v698_v35 = vpop.permute.xlu2 %697 }
 0x1d2   :  { %v2014_v49 = vpop.permute.xlu0 %475 }
 0x1d7   :  { %889 = vrot.lane.b32.xlu1 %v1807_v44, %s1439_s5  ;;  %891 = vrot.lane.b32.xlu2 %v1844_v6, %s1439_s5 }
 0x1d8   :  { %887 = vrot.lane.b32.xlu0 %v1762_v56, %s1439_s5 }
 0x1d9   :  { %v696_v59 = vpop.permute.xlu1 %695  ;;  %v722_v21 = vpop.permute.xlu2 %721 }
 0x1da   :  { %v500_v20 = vpop.permute.xlu0 %499 }
 0x1db   :  { %v625_v48 = vmax.f32 %v1844_v6, %v500_v20 }
 0x1dd   :  { %v2023_v52 = vmax.f32 %v625_v48, %v696_v59 }
 0x1df   :  { %895 = vrot.lane.b32.xlu1 %v1914_v61, %s1439_s5  ;;  %897 = vrot.lane.b32.xlu2 %v1566_v32, %s1439_s5  ;;  %v651_v32 = vmax.f32 %v1815_v15, %v552_v60 }
 0x1e0   :  { %893 = vrot.lane.b32.xlu0 %v1870_v14, %s1439_s5 }
 0x1e1   :  { %v720_v44 = vpop.permute.xlu1 %719  ;;  %v2031_v25 = vpop.permute.xlu2 %479 }
 0x1e2   :  { %v524_v56 = vpop.permute.xlu0 %523 }
 0x1e3   :  { %v637_v29 = vmax.f32 %v1861_v51, %v524_v56 }
 0x1e5   :  { %v2034_v30 = vmax.f32 %v637_v29, %v720_v44 }
 0x1e7   :  { %901 = vrot.lane.b32.xlu1 %v1600_v37, %s1439_s5  ;;  %903 = vrot.lane.b32.xlu2 %v1650_v50, %s1439_s5 }
 0x1e8   :  { %899 = vrot.lane.b32.xlu0 %v1582_v34, %s1439_s5 }
 0x1e9   :  { %v478_v6 = vpop.permute.xlu1 %477  ;;  %v504_v10 = vpop.permute.xlu2 %503 }
 0x1ea   :  { %v748_v41 = vpop.permute.xlu0 %747  ;;  %v614_v27 = vmax.f32 %v1859_v1, %v478_v6 }
 0x1eb   :  { %v2044_v53 = vmax.f32 %v651_v32, %v748_v41 }
 0x1ec   :  { %v2046_v31 = vmax.f32 %v614_v27, %v674_v22 }
 0x1ef   :  { %907 = vrot.lane.b32.xlu1 %v1703_v3, %s1439_s5  ;;  %909 = vrot.lane.b32.xlu2 %v1748_v39, %s1439_s5 }
 0x1f0   :  { %905 = vrot.lane.b32.xlu0 %v1669_v54, %s1439_s5 }
 0x1f1   :  { %v502_v34 = vpop.permute.xlu1 %501  ;;  %v528_v37 = vpop.permute.xlu2 %527 }
 0x1f2   :  { %v554_v50 = vpop.permute.xlu0 %553  ;;  %v626_v60 = vmax.f32 %v1870_v14, %v502_v34 }
 0x1f4   :  { %v2055_v57 = vmax.f32 %v626_v60, %v698_v35 }
 0x1f7   :  { %913 = vrot.lane.b32.xlu1 %v1820_v5, %s1439_s5  ;;  %915 = vrot.lane.b32.xlu2 %v1861_v51, %s1439_s5  ;;  %v652_v51 = vmax.f32 %v1829_v7, %v554_v50  ;;  %v627_v5 = vmax.f32 %v1914_v61, %v504_v10 }
 0x1f8   :  { %911 = vrot.lane.b32.xlu0 %v1775_v58, %s1439_s5 }
 0x1f9   :  { %v526_v3 = vpop.permute.xlu1 %525  ;;  %v856_v39 = vpop.permute.xlu2 %855 }
 0x1fa   :  { %v638_v54 = vmax.f32 %v1884_v62, %v526_v3  ;;  %v2064_v1 = vpop.permute.xlu0 %675  ;;  %v999_v22 = vmax.f32 %v1831_v16, %v856_v39  ;;  %v2439_v3 = vld [vmem:[#allocation2_spill] sm:$0xff] }
 0x1fc   :  { %v1052_v14 = vadd.f32 %v1699_v0, %v999_v22  ;;  %v2068_v35 = vmax.f32 %v638_v54, %v722_v21 }
 0x1fe   :  { %v1101_v59 = vmax.f32 %v1052_v14, 0.0  ;;  %v2440_v14 = vld [vmem:[#allocation3_spill] sm:$0xff] }
 0x1ff   :  { %919 = vrot.lane.b32.xlu1 %v1923_v42, %s1439_s5  ;;  %921 = vrot.lane.b32.xlu2 %v1934_v63, %s1439_s5 }
 0x200   :  { %v1150_v58 = vpack.c.bf16 %v1101_v59, %v1101_v59  ;;  %917 = vrot.lane.b32.xlu0 %v1884_v62, %s1439_s5  ;;  %v639_v62 = vmax.f32 %v1923_v42, %v528_v37 }
 0x201   :  { %v750_v16 = vpop.permute.xlu1 %749  ;;  %v728_v20 = vpop.permute.xlu2 %727 }
 0x202   :  { %1200 = vst.msk [vmem:[%s2413_s3 + $0xc] sm:$0xf] %vm1196_vm0, %v1150_v58  ;;  %v2082_v21 = vmax.f32 %v652_v51, %v750_v16  ;;  %v700_v48 = vpop.permute.xlu0 %699 }
 0x203   :  { %v2084_v44 = vmax.f32 %v627_v5, %v700_v48 }
 0x207   :  { %925 = vrot.lane.b32.xlu1 %v1545_v26, %s1439_s5  ;;  %927 = vrot.lane.b32.xlu2 %v1592_v36, %s1439_s5  ;;  %v613_v26 = vmax.f32 %v1833_v17, %v2014_v49 }
 0x208   :  { %923 = vrot.lane.b32.xlu0 %v1947_v28, %s1439_s5 }
 0x209   :  { %v854_v61 = vpop.permute.xlu1 %853  ;;  %v862_v56 = vpop.permute.xlu2 %861 }
 0x20a   :  { %v998_v29 = vmax.f32 %v1786_v9, %v854_v61  ;;  %v724_v32 = vpop.permute.xlu0 %723  ;;  %v1002_v6 = vmax.f32 %v1925_v24, %v862_v56  ;;  %v809_v24 = vmax.f32 %v613_v26, %v2012_v33 }
 0x20b   :  { %v2095_v10 = vmax.f32 %v639_v62, %v724_v32 }
 0x20c   :  { %v1051_v41 = vadd.f32 %v1699_v0, %v998_v29  ;;  %v1055_v36 = vadd.f32 %v1699_v0, %v1002_v6  ;;  %v2443_v6 = vld [vmem:[#allocation14_spill] sm:$0xff] }
 0x20e   :  { %v1100_v27 = vmax.f32 %v1051_v41, 0.0  ;;  %v1104_v34 = vmax.f32 %v1055_v36, 0.0 }
 0x20f   :  { %931 = vrot.lane.b32.xlu1 %v1632_v47, %s1439_s5  ;;  %933 = vrot.lane.b32.xlu2 %v1671_v55, %s1439_s5 }
 0x210   :  { %v1149_v9 = vpack.c.bf16 %v1100_v27, %v1100_v27  ;;  %v1153_v42 = vpack.c.bf16 %v1104_v34, %v1104_v34  ;;  %929 = vrot.lane.b32.xlu0 %v1616_v43, %s1439_s5 }
 0x211   :  { %v726_v17 = vpop.permute.xlu1 %725  ;;  %v868_v49 = vpop.permute.xlu2 %867 }
 0x212   :  { %1199 = vst.msk [vmem:[%s2413_s3 + $0x8] sm:$0xf] %vm1196_vm0, %v1149_v9  ;;  %v530_v37 = vpop.permute.xlu0 %529  ;;  %v1005_v50 = vmax.f32 %v809_v24, %v868_v49 }
 0x213   :  { %1203 = vst.msk [vmem:[%s2413_s3 + $0x18] sm:$0xf] %vm1196_vm0, %v1153_v42  ;;  %v640_v47 = vmax.f32 %v1934_v63, %v530_v37 }
 0x214   :  { %v1058_v43 = vadd.f32 %v1699_v0, %v1005_v50 }
 0x215   :  { %v2118_v55 = vmax.f32 %v640_v47, %v726_v17 }
 0x216   :  { %v1107_v33 = vmax.f32 %v1058_v43, 0.0  ;;  %v2445_v43 = vld [vmem:[#allocation24_spill] sm:$0xff] }
 0x217   :  { %937 = vrot.lane.b32.xlu1 %v1728_v18, %s1439_s5  ;;  %939 = vrot.lane.b32.xlu2 %v1777_v4, %s1439_s5  ;;  %v2441_v18 = vld [vmem:[#allocation8_spill] sm:$0xff] }
 0x218   :  { %v1156_v60 = vpack.c.bf16 %v1107_v33, %v1107_v33  ;;  %935 = vrot.lane.b32.xlu0 %v2439_v3, %s1439_s5 }
 0x219   :  { %v532_v39 = vpop.permute.xlu1 %531  ;;  %v874_v54 = vpop.permute.xlu2 %873 }
 0x21a   :  { %1206 = vst.msk [vmem:[%s2413_s3 + $0x24] sm:$0xf] %vm1196_vm0, %v1156_v60  ;;  %v641_v63 = vmax.f32 %v1947_v28, %v532_v39  ;;  %v852_v22 = vpop.permute.xlu0 %851  ;;  %v1008_v59 = vmax.f32 %v2440_v14, %v874_v54  ;;  %v615_v54 = vmax.f32 %v1900_v8, %v2031_v25 }
 0x21b   :  { %v997_v51 = vmax.f32 %v2441_v18, %v852_v22 }
 0x21c   :  { %v1061_v4 = vadd.f32 %v1699_v0, %v1008_v59  ;;  %v2134_v58 = vmax.f32 %v641_v63, %v728_v20  ;;  %v2442_v20 = vld [vmem:[#allocation18_spill] sm:$0xff]  ;;  %v811_v59 = vmax.f32 %v615_v54, %v2064_v1 }
 0x21d   :  { %v1050_v5 = vadd.f32 %v1699_v0, %v997_v51 }
 0x21e   :  { %v1110_v16 = vmax.f32 %v1061_v4, 0.0 }
 0x21f   :  { %v1099_v48 = vmax.f32 %v1050_v5, 0.0  ;;  %943 = vrot.lane.b32.xlu1 %v1815_v15, %s1439_s5  ;;  %945 = vrot.lane.b32.xlu2 %v1829_v7, %s1439_s5  ;;  %v2444_v7 = vld [vmem:[#allocation10_spill] sm:$0xff] }
 0x220   :  { %v1159_v28 = vpack.c.bf16 %v1110_v16, %v1110_v16  ;;  %941 = vrot.lane.b32.xlu0 %v1790_v11, %s1439_s5 }
 0x221   :  { %v1148_v62 = vpack.c.bf16 %v1099_v48, %v1099_v48  ;;  %v860_v61 = vpop.permute.xlu1 %859  ;;  %v880_v56 = vpop.permute.xlu2 %879 }
 0x222   :  { %1209 = vst.msk [vmem:[%s2413_s3 + $0x30] sm:$0xf] %vm1196_vm0, %v1159_v28  ;;  %v1001_v29 = vmax.f32 %v2442_v20, %v860_v61  ;;  %v858_v32 = vpop.permute.xlu0 %857  ;;  %v1011_v15 = vmax.f32 %v2443_v6, %v880_v56 }
 0x223   :  { %1198 = vst.msk [vmem:[%s2413_s3 + $0x4] sm:$0xf] %vm1196_vm0, %v1148_v62  ;;  %v1000_v11 = vmax.f32 %v2444_v7, %v858_v32 }
 0x224   :  { %v1054_v26 = vadd.f32 %v1699_v0, %v1001_v29  ;;  %v1064_v41 = vadd.f32 %v1699_v0, %v1011_v15 }
 0x225   :  { %v1053_v36 = vadd.f32 %v1699_v0, %v1000_v11 }
 0x226   :  { %v1103_v27 = vmax.f32 %v1054_v26, 0.0  ;;  %v1113_v34 = vmax.f32 %v1064_v41, 0.0  ;;  %v2447_v26 = vld [vmem:[#allocation4_spill] sm:$0xff] }
 0x227   :  { %v1102_v9 = vmax.f32 %v1053_v36, 0.0  ;;  %v2448_v36 = vld [vmem:[#allocation6_spill] sm:$0xff] }
 0x228   :  { %v1152_v42 = vpack.c.bf16 %v1103_v27, %v1103_v27  ;;  %v1162_v24 = vpack.c.bf16 %v1113_v34, %v1113_v34 }
 0x229   :  { %v1151_v17 = vpack.c.bf16 %v1102_v9, %v1102_v9  ;;  %v866_v49 = vpop.permute.xlu1 %865  ;;  %v886_v37 = vpop.permute.xlu2 %885 }
 0x22a   :  { %1202 = vst.msk [vmem:[%s2413_s3 + $0x14] sm:$0xf] %vm1196_vm0, %v1152_v42  ;;  %v1004_v50 = vmax.f32 %v1978_v46, %v866_v49  ;;  %v864_v47 = vpop.permute.xlu0 %863  ;;  %v1014_v33 = vmax.f32 %v2445_v43, %v886_v37 }
 0x22b   :  { %1201 = vst.msk [vmem:[%s2413_s3 + $0x10] sm:$0xf] %vm1196_vm0, %v1151_v17  ;;  %v1003_v60 = vmax.f32 %v1959_v38, %v864_v47 }
 0x22c   :  { %1212 = vst.msk [vmem:[%s2413_s3 + $0x3c] sm:$0xf] %vm1196_vm0, %v1162_v24  ;;  %v1057_v3 = vadd.f32 %v1699_v0, %v1004_v50  ;;  %v1067_v39 = vadd.f32 %v1699_v0, %v1014_v33 }
 0x22d   :  { %v1056_v46 = vadd.f32 %v1699_v0, %v1003_v60  ;;  %v2449_v60 = vld [vmem:[#allocation21_spill] sm:$0xff] }
 0x22e   :  { %v1106_v63 = vmax.f32 %v1057_v3, 0.0  ;;  %v1116_v22 = vmax.f32 %v1067_v39, 0.0 }
 0x22f   :  { %v1105_v14 = vmax.f32 %v1056_v46, 0.0  ;;  %v2450_v46 = vld [vmem:[#allocation15_spill] sm:$0xff] }
 0x230   :  { %v1155_v38 = vpack.c.bf16 %v1106_v63, %v1106_v63  ;;  %v1165_v18 = vpack.c.bf16 %v1116_v22, %v1116_v22  ;;  %v2451_v63 = vld [vmem:[#allocation17_spill] sm:$0xff] }
 0x231   :  { %v1154_v51 = vpack.c.bf16 %v1105_v14, %v1105_v14  ;;  %v872_v4 = vpop.permute.xlu1 %871  ;;  %v892_v5 = vpop.permute.xlu2 %891 }
 0x232   :  { %1205 = vst.msk [vmem:[%s2413_s3 + $0x20] sm:$0xf] %vm1196_vm0, %v1155_v38  ;;  %v1007_v16 = vmax.f32 %v811_v59, %v872_v4  ;;  %v870_v48 = vpop.permute.xlu0 %869  ;;  %v1017_v28 = vmax.f32 %v2023_v52, %v892_v5 }
 0x233   :  { %1204 = vst.msk [vmem:[%s2413_s3 + $0x1c] sm:$0xf] %vm1196_vm0, %v1154_v51  ;;  %v1006_v8 = vmax.f32 %v2046_v31, %v870_v48  ;;  %v2446_v31 = vld [vmem:[#allocation11_spill] sm:$0xff] }
 0x234   :  { %1215 = vst.msk [vmem:[%s2413_s3 + $0x48] sm:$0xf] %vm1196_vm0, %v1165_v18  ;;  %v1060_v25 = vadd.f32 %v1699_v0, %v1007_v16  ;;  %v1070_v1 = vadd.f32 %v1699_v0, %v1017_v28 }
 0x235   :  { %v1059_v62 = vadd.f32 %v1699_v0, %v1006_v8 }
 0x236   :  { %v1109_v61 = vmax.f32 %v1060_v25, 0.0  ;;  %v1119_v52 = vmax.f32 %v1070_v1, 0.0 }
 0x237   :  { %v1108_v56 = vmax.f32 %v1059_v62, 0.0  ;;  %v2452_v62 = vld [vmem:[#allocation25_spill] sm:$0xff] }
 0x238   :  { %v1158_v20 = vpack.c.bf16 %v1109_v61, %v1109_v61  ;;  %v1168_v29 = vpack.c.bf16 %v1119_v52, %v1119_v52 }
 0x239   :  { %v1157_v32 = vpack.c.bf16 %v1108_v56, %v1108_v56  ;;  %v878_v6 = vpop.permute.xlu1 %877  ;;  %v898_v15 = vpop.permute.xlu2 %897 }
 0x23a   :  { %1208 = vst.msk [vmem:[%s2413_s3 + $0x2c] sm:$0xf] %vm1196_vm0, %v1158_v20  ;;  %v1010_v7 = vmax.f32 %v2446_v31, %v878_v6  ;;  %v876_v11 = vpop.permute.xlu0 %875  ;;  %v1020_v41 = vmax.f32 %v2447_v26, %v898_v15 }
 0x23b   :  { %1207 = vst.msk [vmem:[%s2413_s3 + $0x28] sm:$0xf] %vm1196_vm0, %v1157_v32  ;;  %v1009_v27 = vmax.f32 %v2448_v36, %v876_v11 }
 0x23c   :  { %1218 = vst.msk [vmem:[%s2413_s3 + $0x54] sm:$0xf] %vm1196_vm0, %v1168_v29  ;;  %v1063_v34 = vadd.f32 %v1699_v0, %v1010_v7  ;;  %v1073_v9 = vadd.f32 %v1699_v0, %v1020_v41 }
 0x23d   :  { %v1062_v42 = vadd.f32 %v1699_v0, %v1009_v27 }
 0x23e   :  { %v1112_v24 = vmax.f32 %v1063_v34, 0.0  ;;  %v1122_v17 = vmax.f32 %v1073_v9, 0.0 }
 0x23f   :  { %v1111_v49 = vmax.f32 %v1062_v42, 0.0 }
 0x240   :  { %v1161_v37 = vpack.c.bf16 %v1112_v24, %v1112_v24  ;;  %v1171_v50 = vpack.c.bf16 %v1122_v17, %v1122_v17 }
 0x241   :  { %v1160_v47 = vpack.c.bf16 %v1111_v49, %v1111_v49  ;;  %v884_v43 = vpop.permute.xlu1 %883  ;;  %v904_v33 = vpop.permute.xlu2 %903 }
 0x242   :  { %1211 = vst.msk [vmem:[%s2413_s3 + $0x38] sm:$0xf] %vm1196_vm0, %v1161_v37  ;;  %v1013_v3 = vmax.f32 %v2449_v60, %v884_v43  ;;  %v882_v39 = vpop.permute.xlu0 %881  ;;  %v1023_v54 = vmax.f32 %v2450_v46, %v904_v33 }
 0x243   :  { %1210 = vst.msk [vmem:[%s2413_s3 + $0x34] sm:$0xf] %vm1196_vm0, %v1160_v47  ;;  %v1012_v22 = vmax.f32 %v2451_v63, %v882_v39 }
 0x244   :  { %1221 = vst.msk [vmem:[%s2413_s3 + $0x60] sm:$0xf] %vm1196_vm0, %v1171_v50  ;;  %v1066_v14 = vadd.f32 %v1699_v0, %v1013_v3  ;;  %v1076_v59 = vadd.f32 %v1699_v0, %v1023_v54  ;;  %v2454_v3 = vld [vmem:[#allocation7_spill] sm:$0xff] }
 0x245   :  { %v1065_v38 = vadd.f32 %v1699_v0, %v1012_v22 }
 0x246   :  { %v1115_v18 = vmax.f32 %v1066_v14, 0.0  ;;  %v1125_v51 = vmax.f32 %v1076_v59, 0.0 }
 0x247   :  { %v1114_v4 = vmax.f32 %v1065_v38, 0.0 }
 0x248   :  { %v1164_v5 = vpack.c.bf16 %v1115_v18, %v1115_v18  ;;  %v1174_v16 = vpack.c.bf16 %v1125_v51, %v1125_v51 }
 0x249   :  { %v1163_v48 = vpack.c.bf16 %v1114_v4, %v1114_v4  ;;  %v890_v28 = vpop.permute.xlu1 %889  ;;  %v910_v8 = vpop.permute.xlu2 %909 }
 0x24a   :  { %1214 = vst.msk [vmem:[%s2413_s3 + $0x44] sm:$0xf] %vm1196_vm0, %v1164_v5  ;;  %v1016_v25 = vmax.f32 %v1992_v45, %v890_v28  ;;  %v888_v1 = vpop.permute.xlu0 %887  ;;  %v1026_v61 = vmax.f32 %v2452_v62, %v910_v8  ;;  %v2455_v5 = vld [vmem:[#allocation22_spill] sm:$0xff]  ;;  %v2456_v28 = vld [vmem:[#allocation9_spill] sm:$0xff] }
 0x24b   :  { %1213 = vst.msk [vmem:[%s2413_s3 + $0x40] sm:$0xf] %vm1196_vm0, %v1163_v48  ;;  %v1015_v52 = vmax.f32 %v1968_v2, %v888_v1  ;;  %v2303_v1 = vld [vmem:[%s2412_s2] ss:$0 sm:$0xff] }
 0x24c   :  { %1224 = vst.msk [vmem:[%s2413_s3 + $0x6c] sm:$0xf] %vm1196_vm0, %v1174_v16  ;;  %v1069_v56 = vadd.f32 %v1699_v0, %v1016_v25  ;;  %v1079_v20 = vadd.f32 %v1699_v0, %v1026_v61 }
 0x24d   :  { %v1068_v45 = vadd.f32 %v1699_v0, %v1015_v52 }
 0x24e   :  { %v1118_v29 = vmax.f32 %v1069_v56, 0.0  ;;  %v1128_v32 = vmax.f32 %v1079_v20, 0.0 }
 0x24f   :  { %v1117_v6 = vmax.f32 %v1068_v45, 0.0 }
 0x250   :  { %v1167_v15 = vpack.c.bf16 %v1118_v29, %v1118_v29  ;;  %v1177_v31 = vpack.c.bf16 %v1128_v32, %v1128_v32 }
 0x251   :  { %v1166_v7 = vpack.c.bf16 %v1117_v6, %v1117_v6  ;;  %v896_v11 = vpop.permute.xlu1 %895  ;;  %v916_v26 = vpop.permute.xlu2 %915 }
 0x252   :  { %1217 = vst.msk [vmem:[%s2413_s3 + $0x50] sm:$0xf] %vm1196_vm0, %v1167_v15  ;;  %v1019_v2 = vmax.f32 %v2084_v44, %v896_v11  ;;  %v894_v41 = vpop.permute.xlu0 %893  ;;  %v1029_v36 = vmax.f32 %v2034_v30, %v916_v26  ;;  %v2458_v26 = vld [vmem:[#allocation20_spill] sm:$0xff] }
 0x253   :  { %1216 = vst.msk [vmem:[%s2413_s3 + $0x4c] sm:$0xf] %vm1196_vm0, %v1166_v7  ;;  %v1018_v27 = vmax.f32 %v2055_v57, %v894_v41  ;;  %v2453_v57 = vld [vmem:[#allocation13_spill] sm:$0xff] }
 0x254   :  { %1227 = vst.msk [vmem:[%s2413_s3 + $0x78] sm:$0xf] %vm1196_vm0, %v1177_v31  ;;  %v1072_v34 = vadd.f32 %v1699_v0, %v1019_v2  ;;  %v1082_v9 = vadd.f32 %v1699_v0, %v1029_v36 }
 0x255   :  { %v1071_v44 = vadd.f32 %v1699_v0, %v1018_v27 }
 0x256   :  { %v1121_v42 = vmax.f32 %v1072_v34, 0.0  ;;  %v1131_v30 = vmax.f32 %v1082_v9, 0.0 }
 0x257   :  { %v1120_v24 = vmax.f32 %v1071_v44, 0.0 }
 0x258   :  { %v1170_v17 = vpack.c.bf16 %v1121_v42, %v1121_v42  ;;  %v1180_v49 = vpack.c.bf16 %v1131_v30, %v1131_v30 }
 0x259   :  { %v1169_v37 = vpack.c.bf16 %v1120_v24, %v1120_v24  ;;  %v902_v50 = vpop.permute.xlu1 %901  ;;  %v922_v47 = vpop.permute.xlu2 %921 }
 0x25a   :  { %1220 = vst.msk [vmem:[%s2413_s3 + $0x5c] sm:$0xf] %vm1196_vm0, %v1170_v17  ;;  %v1022_v43 = vmax.f32 %v2453_v57, %v902_v50  ;;  %v900_v33 = vpop.permute.xlu0 %899  ;;  %v1032_v60 = vmax.f32 %v2118_v55, %v922_v47 }
 0x25b   :  { %1219 = vst.msk [vmem:[%s2413_s3 + $0x58] sm:$0xf] %vm1196_vm0, %v1169_v37  ;;  %v1021_v39 = vmax.f32 %v2454_v3, %v900_v33 }
 0x25c   :  { %1230 = vst.msk [vmem:[%s2413_s3 + $0x84] sm:$0xf] %vm1196_vm0, %v1180_v49  ;;  %v1075_v46 = vadd.f32 %v1699_v0, %v1022_v43  ;;  %v1085_v54 = vadd.f32 %v1699_v0, %v1032_v60 }
 0x25d   :  { %v1074_v63 = vadd.f32 %v1699_v0, %v1021_v39  ;;  %v2457_v0 = vld [vmem:[#allocation19_spill] sm:$0xff] }
 0x25e   :  { %v1124_v22 = vmax.f32 %v1075_v46, 0.0  ;;  %v1134_v55 = vmax.f32 %v1085_v54, 0.0 }
 0x25f   :  { %v1123_v14 = vmax.f32 %v1074_v63, 0.0 }
 0x260   :  { %v1173_v59 = vpack.c.bf16 %v1124_v22, %v1124_v22  ;;  %v1183_v38 = vpack.c.bf16 %v1134_v55, %v1134_v55 }
 0x261   :  { %v1172_v18 = vpack.c.bf16 %v1123_v14, %v1123_v14  ;;  %v908_v51 = vpop.permute.xlu1 %907  ;;  %v928_v4 = vpop.permute.xlu2 %927 }
 0x262   :  { %1223 = vst.msk [vmem:[%s2413_s3 + $0x68] sm:$0xf] %vm1196_vm0, %v1173_v59  ;;  %v1025_v16 = vmax.f32 %v2455_v5, %v908_v51  ;;  %v906_v48 = vpop.permute.xlu0 %905  ;;  %v1035_v8 = vmax.f32 %v2456_v28, %v928_v4 }
 0x263   :  { %1222 = vst.msk [vmem:[%s2413_s3 + $0x64] sm:$0xf] %vm1196_vm0, %v1172_v18  ;;  %v1024_v25 = vmax.f32 %v2457_v0, %v906_v48 }
 0x264   :  { %1233 = vst.msk [vmem:[%s2413_s3 + $0x90] sm:$0xf] %vm1196_vm0, %v1183_v38  ;;  %v1078_v62 = vadd.f32 %v2303_v1, %v1025_v16  ;;  %v1088_v61 = vadd.f32 %v2303_v1, %v1035_v8 }
 0x265   :  { %v1077_v52 = vadd.f32 %v2303_v1, %v1024_v25 }
 0x266   :  { %v1127_v56 = vmax.f32 %v1078_v62, 0.0  ;;  %v1137_v20 = vmax.f32 %v1088_v61, 0.0  ;;  %v2461_v62 = vld [vmem:[#allocation12_spill] sm:$0xff] }
 0x267   :  { %v1126_v45 = vmax.f32 %v1077_v52, 0.0 }
 0x268   :  { %v1176_v29 = vpack.c.bf16 %v1127_v56, %v1127_v56  ;;  %v1186_v32 = vpack.c.bf16 %v1137_v20, %v1137_v20 }
 0x269   :  { %v1175_v6 = vpack.c.bf16 %v1126_v45, %v1126_v45  ;;  %v914_v15 = vpop.permute.xlu1 %913  ;;  %v934_v31 = vpop.permute.xlu2 %933 }
 0x26a   :  { %1226 = vst.msk [vmem:[%s2413_s3 + $0x74] sm:$0xf] %vm1196_vm0, %v1176_v29  ;;  %v1028_v7 = vmax.f32 %v2002_v13, %v914_v15  ;;  %v912_v11 = vpop.permute.xlu0 %911  ;;  %v1038_v2 = vmax.f32 %v2458_v26, %v934_v31 }
 0x26b   :  { %1225 = vst.msk [vmem:[%s2413_s3 + $0x70] sm:$0xf] %vm1196_vm0, %v1175_v6  ;;  %v1027_v41 = vmax.f32 %v1980_v12, %v912_v11 }
 0x26c   :  { %1236 = vst.msk [vmem:[%s2413_s3 + $0x9c] sm:$0xf] %vm1196_vm0, %v1186_v32  ;;  %v1081_v36 = vadd.f32 %v2303_v1, %v1028_v7  ;;  %v1091_v27 = vadd.f32 %v2303_v1, %v1038_v2  ;;  %v2462_v7 = vld [vmem:[#allocation23_spill] sm:$0xff] }
 0x26d   :  { %v1080_v13 = vadd.f32 %v2303_v1, %v1027_v41 }
 0x26e   :  { %v1130_v34 = vmax.f32 %v1081_v36, 0.0  ;;  %v1140_v9 = vmax.f32 %v1091_v27, 0.0 }
 0x26f   :  { %v1129_v44 = vmax.f32 %v1080_v13, 0.0 }
 0x270   :  { %v1179_v42 = vpack.c.bf16 %v1130_v34, %v1130_v34  ;;  %v1189_v30 = vpack.c.bf16 %v1140_v9, %v1140_v9 }
 0x271   :  { %v1178_v24 = vpack.c.bf16 %v1129_v44, %v1129_v44  ;;  %v920_v17 = vpop.permute.xlu1 %919  ;;  %v940_v49 = vpop.permute.xlu2 %939 }
 0x272   :  { %1229 = vst.msk [vmem:[%s2413_s3 + $0x80] sm:$0xf] %vm1196_vm0, %v1179_v42  ;;  %v1031_v12 = vmax.f32 %v2095_v10, %v920_v17  ;;  %v918_v37 = vpop.permute.xlu0 %917  ;;  %v1041_v50 = vmax.f32 %v1990_v40, %v940_v49 }
 0x273   :  { %1228 = vst.msk [vmem:[%s2413_s3 + $0x7c] sm:$0xf] %vm1196_vm0, %v1178_v24  ;;  %v1030_v47 = vmax.f32 %v2068_v35, %v918_v37  ;;  %v2459_v35 = vld [vmem:[#allocation5_spill] sm:$0xff] }
 0x274   :  { %1239 = vst.msk [vmem:[%s2413_s3 + $0xa8] sm:$0xf] %vm1196_vm0, %v1189_v30  ;;  %v1084_v57 = vadd.f32 %v2303_v1, %v1031_v12  ;;  %v1094_v43 = vadd.f32 %v2303_v1, %v1041_v50 }
 0x275   :  { %v1083_v10 = vadd.f32 %v2303_v1, %v1030_v47 }
 0x276   :  { %v1133_v33 = vmax.f32 %v1084_v57, 0.0  ;;  %v1143_v40 = vmax.f32 %v1094_v43, 0.0 }
 0x277   :  { %v1132_v60 = vmax.f32 %v1083_v10, 0.0 }
 0x278   :  { %v1182_v3 = vpack.c.bf16 %v1133_v33, %v1133_v33  ;;  %v1192_v39 = vpack.c.bf16 %v1143_v40, %v1143_v40 }
 0x279   :  { %v1181_v46 = vpack.c.bf16 %v1132_v60, %v1132_v60  ;;  %v926_v54 = vpop.permute.xlu1 %925  ;;  %v946_v63 = vpop.permute.xlu2 %945 }
 0x27a   :  { %1232 = vst.msk [vmem:[%s2413_s3 + $0x8c] sm:$0xf] %vm1196_vm0, %v1182_v3  ;;  %v1034_v22 = vmax.f32 %v2459_v35, %v926_v54  ;;  %v924_v55 = vpop.permute.xlu0 %923  ;;  %v1044_v14 = vmax.f32 %v2082_v21, %v946_v63 }
 0x27b   :  { %1231 = vst.msk [vmem:[%s2413_s3 + $0x88] sm:$0xf] %vm1196_vm0, %v1181_v46  ;;  %v1033_v59 = vmax.f32 %v2134_v58, %v924_v55  ;;  %v2460_v58 = vld [vmem:[#allocation16_spill] sm:$0xff] }
 0x27c   :  { %1242 = vst.msk [vmem:[%s2413_s3 + $0xb4] sm:$0xf] %vm1196_vm0, %v1192_v39  ;;  %v1087_v38 = vadd.f32 %v2303_v1, %v1034_v22  ;;  %v1097_v18 = vadd.f32 %v2303_v1, %v1044_v14 }
 0x27d   :  { %v1086_v51 = vadd.f32 %v2303_v1, %v1033_v59 }
 0x27e   :  { %v1136_v4 = vmax.f32 %v1087_v38, 0.0  ;;  %v1146_v21 = vmax.f32 %v1097_v18, 0.0 }
 0x27f   :  { %v1135_v5 = vmax.f32 %v1086_v51, 0.0 }
 0x280   :  { %v1185_v16 = vpack.c.bf16 %v1136_v4, %v1136_v4  ;;  %v1195_v48 = vpack.c.bf16 %v1146_v21, %v1146_v21 }
 0x281   :  { %v1184_v28 = vpack.c.bf16 %v1135_v5, %v1135_v5  ;;  %v932_v8 = vpop.permute.xlu1 %931 }
 0x282   :  { %1235 = vst.msk [vmem:[%s2413_s3 + $0x98] sm:$0xf] %vm1196_vm0, %v1185_v16  ;;  %v1037_v0 = vmax.f32 %v2460_v58, %v932_v8  ;;  %v930_v25 = vpop.permute.xlu0 %929 }
 0x283   :  { %1234 = vst.msk [vmem:[%s2413_s3 + $0x94] sm:$0xf] %vm1196_vm0, %v1184_v28  ;;  %v1036_v61 = vmax.f32 %v2461_v62, %v930_v25 }
 0x284   :  { %1245 = vst.msk [vmem:[%s2413_s3 + $0xc0] sm:$0xf] %vm1196_vm0, %v1195_v48  ;;  %v1090_v52 = vadd.f32 %v2303_v1, %v1037_v0 }
 0x285   :  { %v1089_v56 = vadd.f32 %v2303_v1, %v1036_v61 }
 0x286   :  { %v1139_v20 = vmax.f32 %v1090_v52, 0.0 }
 0x287   :  { %v1138_v45 = vmax.f32 %v1089_v56, 0.0 }
 0x288   :  { %v1188_v29 = vpack.c.bf16 %v1139_v20, %v1139_v20 }
 0x289   :  { %v1187_v32 = vpack.c.bf16 %v1138_v45, %v1138_v45  ;;  %v938_v6 = vpop.permute.xlu1 %937 }
 0x28a   :  { %1238 = vst.msk [vmem:[%s2413_s3 + $0xa4] sm:$0xf] %vm1196_vm0, %v1188_v29  ;;  %v1040_v15 = vmax.f32 %v1957_v19, %v938_v6  ;;  %v936_v31 = vpop.permute.xlu0 %935 }
 0x28b   :  { %1237 = vst.msk [vmem:[%s2413_s3 + $0xa0] sm:$0xf] %vm1196_vm0, %v1187_v32  ;;  %v1039_v11 = vmax.f32 %v2462_v7, %v936_v31 }
 0x28c   :  { %v1093_v26 = vadd.f32 %v2303_v1, %v1040_v15 }
 0x28d   :  { %v1092_v2 = vadd.f32 %v2303_v1, %v1039_v11 }
 0x28e   :  { %v1142_v41 = vmax.f32 %v1093_v26, 0.0 }
 0x28f   :  { %v1141_v36 = vmax.f32 %v1092_v2, 0.0 }
 0x290   :  { %v1191_v27 = vpack.c.bf16 %v1142_v41, %v1142_v41 }
 0x291   :  { %v1190_v13 = vpack.c.bf16 %v1141_v36, %v1141_v36  ;;  %v944_v34 = vpop.permute.xlu1 %943 }
 0x292   :  { %1241 = vst.msk [vmem:[%s2413_s3 + $0xb0] sm:$0xf] %vm1196_vm0, %v1191_v27  ;;  %v1043_v19 = vmax.f32 %v2044_v53, %v944_v34  ;;  %v942_v9 = vpop.permute.xlu0 %941 }
 0x293   :  { %1240 = vst.msk [vmem:[%s2413_s3 + $0xac] sm:$0xf] %vm1196_vm0, %v1190_v13  ;;  %v1042_v44 = vmax.f32 %v2004_v23, %v942_v9 }
 0x294   :  { %v1096_v42 = vadd.f32 %v2303_v1, %v1043_v19 }
 0x295   :  { %v1095_v30 = vadd.f32 %v2303_v1, %v1042_v44 }
 0x296   :  { %v1145_v24 = vmax.f32 %v1096_v42, 0.0 }
 0x297   :  { %v1144_v17 = vmax.f32 %v1095_v30, 0.0 }
 0x298   :  { %v1194_v49 = vpack.c.bf16 %v1145_v24, %v1145_v24 }
 0x299   :  { %v1193_v12 = vpack.c.bf16 %v1144_v17, %v1144_v17 }
 0x29a   :  { %1244 = vst.msk [vmem:[%s2413_s3 + $0xbc] sm:$0xf] %vm1196_vm0, %v1194_v49 }
 0x29b   :  { %1243 = vst.msk [vmem:[%s2413_s3 + $0xb8] sm:$0xf] %vm1196_vm0, %v1193_v12 }

// kernel: forward.5
= control target key start
LH: loop header
LB: loop body
LE: loop exit
PB: predicated region body
PF: predicated region fallthrough
CT: control target
= control target key end

     0   :  { %vm897_vm0 = vcmask 158720   ;;  %vm910_vm1 = vcmask 155648   ;;  %s1902_s4 = inlined_call_operand.vmem [shape: bf16[256,20], index: 4, kind: input, shape index: {}]   ;;  %s1903_s0 = inlined_call_operand.vmem [shape: bf16[98,256], index: 0, kind: input, shape index: {}]   ;;  %s1904_s1 = inlined_call_operand.vmem [shape: bf16[98,256], index: 1, kind: input, shape index: {}]   ;;  %s1905_s2 = inlined_call_operand.vmem [shape: bf16[98,256], index: 2, kind: input, shape index: {}]   ;;  %s1906_s3 = inlined_call_operand.vmem [shape: bf16[98,256], index: 3, kind: input, shape index: {}]   ;;  %s1907_s5 = inlined_call_operand.vmem [shape: f32[1,20], index: 5, kind: input, shape index: {}]   ;;  %s1908_s6 = inlined_call_operand.vmem [shape: bf16[98,20], index: 6, kind: output, shape index: {}]  }
   0x1   :  { %v1275_v0 = vld [vmem:[%s1902_s4 + $0x38] sm:$0xff]  ;;  %v1287_v2 = vld [vmem:[%s1902_s4 + $0x30] sm:$0xff]  ;;  %v1301_v4 = vld [vmem:[%s1902_s4 + $0x28] sm:$0xff] }
   0x2   :  { %v1280_v1 = vld [vmem:[%s1902_s4 + $0x78] sm:$0xff]  ;;  %231 = vmatpush.bf16.msra.mxu0 %v1275_v0  ;;  %v1292_v3 = vld [vmem:[%s1902_s4 + $0x70] sm:$0xff]  ;;  %397 = vmatpush.bf16.msra.mxu2 %v1275_v0  ;;  %v1306_v5 = vld [vmem:[%s1902_s4 + $0x68] sm:$0xff] }
   0x3   :  { %274 = vmatpush.bf16.msra.mxu1 %v1280_v1  ;;  %440 = vmatpush.bf16.msra.mxu3 %v1280_v1  ;;  %v1315_v6 = vld [vmem:[%s1902_s4 + $0x20] sm:$0xff]  ;;  %v1329_v8 = vld [vmem:[%s1902_s4 + $0x18] sm:$0xff]  ;;  %v1343_v10 = vld [vmem:[%s1902_s4 + $0x10] sm:$0xff] }
   0x4   :  { %v1320_v7 = vld [vmem:[%s1902_s4 + $0x60] sm:$0xff]  ;;  %v1334_v9 = vld [vmem:[%s1902_s4 + $0x58] sm:$0xff]  ;;  %v1348_v11 = vld [vmem:[%s1902_s4 + $0x50] sm:$0xff] }
   0x5   :  { %v1357_v12 = vld [vmem:[%s1902_s4 + $0x8] sm:$0xff]  ;;  %v1369_v14 = vld [vmem:[%s1902_s4] sm:$0xff]  ;;  %v926_v28 = vld [vmem:[%s1903_s0 + $0x10] sm:$0xf] }
   0x6   :  { %232 = vmatpush.bf16.msra.mxu0 %v1287_v2  ;;  %398 = vmatpush.bf16.msra.mxu2 %v1287_v2  ;;  %v1362_v13 = vld [vmem:[%s1902_s4 + $0x48] sm:$0xff]  ;;  %v1374_v15 = vld [vmem:[%s1902_s4 + $0x40] sm:$0xff]  ;;  %v1175_v29 = vld [vmem:[%s1903_s0 + $0x14] sm:$0xf0] }
   0x7   :  { %275 = vmatpush.bf16.msra.mxu1 %v1292_v3  ;;  %441 = vmatpush.bf16.msra.mxu3 %v1292_v3  ;;  %v918_v16 = vld [vmem:[%s1903_s0] sm:$0xf]  ;;  %v1173_v17 = vld [vmem:[%s1903_s0 + $0x4] sm:$0xf0]  ;;  %v1172_v18 = vld [vmem:[%s1903_s0 + $0x4] sm:$0xf]  ;;  %v927_v36 = vor.u32 %v1175_v29, %v926_v28 }
   0x8   :  { %v920_v19 = vld [vmem:[%s1903_s0 + $0x8] sm:$0xf0]  ;;  %v1030_v20 = vld [vmem:[%s1904_s1] sm:$0xf]  ;;  %v1201_v21 = vld [vmem:[%s1904_s1 + $0x4] sm:$0xf0]  ;;  %v919_v24 = vor.u32 %v1173_v17, %v918_v16 }
   0x9   :  { %v1200_v22 = vld [vmem:[%s1904_s1 + $0x4] sm:$0xf]  ;;  %v1032_v23 = vld [vmem:[%s1904_s1 + $0x8] sm:$0xf0]  ;;  %v923_v25 = vor.u32 %v1172_v18, %v920_v19  ;;  %v1031_v26 = vor.u32 %v1201_v21, %v1030_v20  ;;  %v1174_v30 = vld [vmem:[%s1903_s0 + $0x14] sm:$0xf] }
   0xa   :  { %233 = vmatpush.bf16.msra.mxu0 %v1301_v4  ;;  %399 = vmatpush.bf16.msra.mxu2 %v1301_v4  ;;  %v1035_v27 = vor.u32 %v1200_v22, %v1032_v23  ;;  %v928_v31 = vld [vmem:[%s1903_s0 + $0x18] sm:$0xf0]  ;;  %v1038_v32 = vld [vmem:[%s1904_s1 + $0x10] sm:$0xf]  ;;  %v1203_v33 = vld [vmem:[%s1904_s1 + $0x14] sm:$0xf0] }
   0xb   :  { %276 = vmatpush.bf16.msra.mxu1 %v1306_v5  ;;  %442 = vmatpush.bf16.msra.mxu3 %v1306_v5  ;;  %v1202_v34 = vld [vmem:[%s1904_s1 + $0x14] sm:$0xf]  ;;  %v1040_v35 = vld [vmem:[%s1904_s1 + $0x18] sm:$0xf0]  ;;  %v931_v37 = vor.u32 %v1174_v30, %v928_v31  ;;  %v1039_v38 = vor.u32 %v1203_v33, %v1038_v32  ;;  %v934_v40 = vld [vmem:[%s1903_s0 + $0x20] sm:$0xf] }
   0xc   :  { %v1043_v39 = vor.u32 %v1202_v34, %v1040_v35  ;;  %v1177_v41 = vld [vmem:[%s1903_s0 + $0x24] sm:$0xf0]  ;;  %v1176_v42 = vld [vmem:[%s1903_s0 + $0x24] sm:$0xf]  ;;  %v936_v43 = vld [vmem:[%s1903_s0 + $0x28] sm:$0xf0] }
   0xd   :  { %v1046_v44 = vld [vmem:[%s1904_s1 + $0x20] sm:$0xf]  ;;  %v1205_v45 = vld [vmem:[%s1904_s1 + $0x24] sm:$0xf0]  ;;  %v1204_v46 = vld [vmem:[%s1904_s1 + $0x24] sm:$0xf]  ;;  %v935_v48 = vor.u32 %v1177_v41, %v934_v40  ;;  %v939_v49 = vor.u32 %v1176_v42, %v936_v43 }
   0xe   :  { %234 = vmatpush.bf16.msra.mxu0 %v1315_v6  ;;  %400 = vmatpush.bf16.msra.mxu2 %v1315_v6  ;;  %v1048_v47 = vld [vmem:[%s1904_s1 + $0x28] sm:$0xf0]  ;;  %v1047_v50 = vor.u32 %v1205_v45, %v1046_v44  ;;  %v942_v52 = vld [vmem:[%s1903_s0 + $0x30] sm:$0xf]  ;;  %v1179_v53 = vld [vmem:[%s1903_s0 + $0x34] sm:$0xf0] }
   0xf   :  { %277 = vmatpush.bf16.msra.mxu1 %v1320_v7  ;;  %443 = vmatpush.bf16.msra.mxu3 %v1320_v7  ;;  %v1051_v51 = vor.u32 %v1204_v46, %v1048_v47  ;;  %v1178_v54 = vld [vmem:[%s1903_s0 + $0x34] sm:$0xf]  ;;  %v944_v55 = vld [vmem:[%s1903_s0 + $0x38] sm:$0xf0]  ;;  %v1054_v56 = vld [vmem:[%s1904_s1 + $0x30] sm:$0xf]  ;;  %v943_v60 = vor.u32 %v1179_v53, %v942_v52 }
  0x10   :  { %v1207_v57 = vld [vmem:[%s1904_s1 + $0x34] sm:$0xf0]  ;;  %v1206_v58 = vld [vmem:[%s1904_s1 + $0x34] sm:$0xf]  ;;  %v1056_v59 = vld [vmem:[%s1904_s1 + $0x38] sm:$0xf0]  ;;  %v947_v61 = vor.u32 %v1178_v54, %v944_v55 }
  0x11   :  { %v1055_v62 = vor.u32 %v1207_v57, %v1054_v56  ;;  %v1059_v63 = vor.u32 %v1206_v58, %v1056_v59  ;;  %v1070_v16 = vld [vmem:[%s1904_s1 + $0x50] sm:$0xf]  ;;  %v1211_v17 = vld [vmem:[%s1904_s1 + $0x54] sm:$0xf0]  ;;  %v1210_v18 = vld [vmem:[%s1904_s1 + $0x54] sm:$0xf] }
  0x12   :  { %235 = vmatpush.bf16.msra.mxu0 %v1329_v8  ;;  %401 = vmatpush.bf16.msra.mxu2 %v1329_v8  ;;  %v1072_v19 = vld [vmem:[%s1904_s1 + $0x58] sm:$0xf0]  ;;  %v1071_v22 = vor.u32 %v1211_v17, %v1070_v16  ;;  %v1078_v34 = vld [vmem:[%s1905_s2] sm:$0xf]  ;;  %v1213_v35 = vld [vmem:[%s1905_s2 + $0x4] sm:$0xf0] }
  0x13   :  { %278 = vmatpush.bf16.msra.mxu1 %v1334_v9  ;;  %444 = vmatpush.bf16.msra.mxu3 %v1334_v9  ;;  %v1075_v23 = vor.u32 %v1210_v18, %v1072_v19  ;;  %v1224_v40 = vld [vmem:[%s1906_s3 + $0x4] sm:$0xf]  ;;  %v1128_v41 = vld [vmem:[%s1906_s3 + $0x8] sm:$0xf0]  ;;  %v1079_v42 = vor.u32 %v1213_v35, %v1078_v34  ;;  %v1086_v46 = vld [vmem:[%s1905_s2 + $0x10] sm:$0xf] }
  0x14   :  { %v1131_v45 = vor.u32 %v1224_v40, %v1128_v41  ;;  %v1215_v47 = vld [vmem:[%s1905_s2 + $0x14] sm:$0xf0]  ;;  %v1226_v52 = vld [vmem:[%s1906_s3 + $0x14] sm:$0xf]  ;;  %v1136_v53 = vld [vmem:[%s1906_s3 + $0x18] sm:$0xf0] }
  0x15   :  { %v1087_v54 = vor.u32 %v1215_v47, %v1086_v46  ;;  %v1139_v59 = vor.u32 %v1226_v52, %v1136_v53  ;;  %v1150_v34 = vld [vmem:[%s1906_s3 + $0x30] sm:$0xf]  ;;  %v1231_v35 = vld [vmem:[%s1906_s3 + $0x34] sm:$0xf0] }
  0x16   :  { %236 = vmatpush.bf16.msra.mxu0 %v1343_v10  ;;  %402 = vmatpush.bf16.msra.mxu2 %v1343_v10 }
  0x17   :  { %279 = vmatpush.bf16.msra.mxu1 %v1348_v11  ;;  %445 = vmatpush.bf16.msra.mxu3 %v1348_v11 }
  0x1a   :  { %237 = vmatpush.bf16.msra.mxu0 %v1357_v12  ;;  %403 = vmatpush.bf16.msra.mxu2 %v1357_v12 }
  0x1b   :  { %280 = vmatpush.bf16.msra.mxu1 %v1362_v13  ;;  %446 = vmatpush.bf16.msra.mxu3 %v1362_v13 }
  0x1e   :  { %238 = vmatpush.bf16.msra.mxu0 %v1369_v14  ;;  %404 = vmatpush.bf16.msra.mxu2 %v1369_v14 }
  0x1f   :  { %281 = vmatpush.bf16.msra.mxu1 %v1374_v15  ;;  %447 = vmatpush.bf16.msra.mxu3 %v1374_v15 }
  0x21   :  { %239 = vmatmul.bf16.vlgmr.msra.gmra.mxu0 %v919_v24  ;;  %405 = vmatmul.bf16.vlgmr.msra.gmra.mxu2 %v1031_v26  ;;  %v35_v24 = vld [vmem:[%s1903_s0 + $0x60] sm:$0x11] }
  0x22   :  { %755 = vmatpush.bf16.msrb.mxu2 %v1275_v0  ;;  %282 = vmatmul.bf16.vlgmr.msra.gmra.mxu1 %v923_v25  ;;  %v329_v25 = vld [vmem:[%s1904_s1 + $0x60] sm:$0x11]  ;;  %v105_v26 = vunpack.c.l.b16 %v35_v24 }
  0x23   :  { %798 = vmatpush.bf16.msrb.mxu3 %v1280_v1  ;;  %576 = vmatpush.bf16.msrb.mxu0 %v1275_v0  ;;  %v950_v0 = vld [vmem:[%s1903_s0 + $0x40] sm:$0xf]  ;;  %v367_v28 = vunpack.c.l.b16 %v329_v25  ;;  %v368_v29 = vunpack.c.h.b16 %v329_v25 }
  0x24   :  { %448 = vmatmul.bf16.vlgmr.msra.gmra.mxu3 %v1035_v27  ;;  %619 = vmatpush.bf16.msrb.mxu1 %v1280_v1  ;;  %v1181_v1 = vld [vmem:[%s1903_s0 + $0x44] sm:$0xf0]  ;;  %v106_v27 = vunpack.c.h.b16 %v35_v24  ;;  %v119_v30 = vpack.c.b16 %v105_v26, %v105_v26 }
  0x25   :  { %v381_v32 = vpack.c.b16 %v367_v28, %v367_v28  ;;  %v382_v33 = vpack.c.b16 %v368_v29, %v368_v29 }
  0x26   :  { %756 = vmatpush.bf16.msrb.mxu2 %v1287_v2  ;;  %v120_v31 = vpack.c.b16 %v106_v27, %v106_v27 }
  0x27   :  { %799 = vmatpush.bf16.msrb.mxu3 %v1292_v3  ;;  %577 = vmatpush.bf16.msrb.mxu0 %v1287_v2  ;;  %v1180_v2 = vld [vmem:[%s1903_s0 + $0x44] sm:$0xf] }
  0x28   :  { %620 = vmatpush.bf16.msrb.mxu1 %v1292_v3  ;;  %v952_v3 = vld [vmem:[%s1903_s0 + $0x48] sm:$0xf0] }
  0x2a   :  { %757 = vmatpush.bf16.msrb.mxu2 %v1301_v4 }
  0x2b   :  { %800 = vmatpush.bf16.msrb.mxu3 %v1306_v5  ;;  %578 = vmatpush.bf16.msrb.mxu0 %v1301_v4  ;;  %v1062_v4 = vld [vmem:[%s1904_s1 + $0x40] sm:$0xf] }
  0x2c   :  { %621 = vmatpush.bf16.msrb.mxu1 %v1306_v5  ;;  %v1209_v5 = vld [vmem:[%s1904_s1 + $0x44] sm:$0xf0] }
  0x2e   :  { %758 = vmatpush.bf16.msrb.mxu2 %v1315_v6 }
  0x2f   :  { %801 = vmatpush.bf16.msrb.mxu3 %v1320_v7  ;;  %579 = vmatpush.bf16.msrb.mxu0 %v1315_v6  ;;  %v1208_v6 = vld [vmem:[%s1904_s1 + $0x44] sm:$0xf] }
  0x30   :  { %622 = vmatpush.bf16.msrb.mxu1 %v1320_v7  ;;  %v1064_v7 = vld [vmem:[%s1904_s1 + $0x48] sm:$0xf0] }
  0x31   :  { %244 = vmatmul.bf16.gmra.mxu0 %v927_v36  ;;  %410 = vmatmul.bf16.gmra.mxu2 %v1039_v38  ;;  %v1212_v36 = vld [vmem:[%s1905_s2 + $0x4] sm:$0xf]  ;;  %v1126_v38 = vld [vmem:[%s1906_s3] sm:$0xf] }
  0x32   :  { %759 = vmatpush.bf16.msrb.mxu2 %v1329_v8  ;;  %287 = vmatmul.bf16.gmra.mxu1 %v931_v37  ;;  %v1080_v37 = vld [vmem:[%s1905_s2 + $0x8] sm:$0xf0] }
  0x33   :  { %802 = vmatpush.bf16.msrb.mxu3 %v1334_v9  ;;  %580 = vmatpush.bf16.msrb.mxu0 %v1329_v8  ;;  %v951_v8 = vor.u32 %v1181_v1, %v950_v0  ;;  %v1083_v43 = vor.u32 %v1212_v36, %v1080_v37  ;;  %v1230_v36 = vld [vmem:[%s1906_s3 + $0x34] sm:$0xf]  ;;  %v1152_v37 = vld [vmem:[%s1906_s3 + $0x38] sm:$0xf0] }
  0x34   :  { %453 = vmatmul.bf16.gmra.mxu3 %v1043_v39  ;;  %623 = vmatpush.bf16.msrb.mxu1 %v1334_v9  ;;  %v955_v9 = vor.u32 %v1180_v2, %v952_v3  ;;  %v1225_v39 = vld [vmem:[%s1906_s3 + $0x4] sm:$0xf0]  ;;  %v1155_v46 = vor.u32 %v1230_v36, %v1152_v37 }
  0x35   :  { %v1127_v44 = vor.u32 %v1225_v39, %v1126_v38 }
  0x36   :  { %760 = vmatpush.bf16.msrb.mxu2 %v1343_v10 }
  0x37   :  { %803 = vmatpush.bf16.msrb.mxu3 %v1348_v11  ;;  %581 = vmatpush.bf16.msrb.mxu0 %v1343_v10  ;;  %v1063_v10 = vor.u32 %v1209_v5, %v1062_v4  ;;  %v1094_v4 = vld [vmem:[%s1905_s2 + $0x20] sm:$0xf]  ;;  %v1217_v5 = vld [vmem:[%s1905_s2 + $0x24] sm:$0xf0] }
  0x38   :  { %624 = vmatpush.bf16.msrb.mxu1 %v1348_v11  ;;  %v1067_v11 = vor.u32 %v1208_v6, %v1064_v7  ;;  %v1216_v6 = vld [vmem:[%s1905_s2 + $0x24] sm:$0xf]  ;;  %v1096_v7 = vld [vmem:[%s1905_s2 + $0x28] sm:$0xf0] }
  0x3a   :  { %761 = vmatpush.bf16.msrb.mxu2 %v1357_v12 }
  0x3b   :  { %804 = vmatpush.bf16.msrb.mxu3 %v1362_v13  ;;  %582 = vmatpush.bf16.msrb.mxu0 %v1357_v12  ;;  %v958_v12 = vld [vmem:[%s1903_s0 + $0x50] sm:$0xf] }
  0x3c   :  { %625 = vmatpush.bf16.msrb.mxu1 %v1362_v13  ;;  %v1183_v13 = vld [vmem:[%s1903_s0 + $0x54] sm:$0xf0] }
  0x3d   :  { %v959_v20 = vor.u32 %v1183_v13, %v958_v12 }
  0x3e   :  { %762 = vmatpush.bf16.msrb.mxu2 %v1369_v14 }
  0x3f   :  { %805 = vmatpush.bf16.msrb.mxu3 %v1374_v15  ;;  %583 = vmatpush.bf16.msrb.mxu0 %v1369_v14  ;;  %v1182_v14 = vld [vmem:[%s1903_s0 + $0x54] sm:$0xf] }
  0x40   :  { %626 = vmatpush.bf16.msrb.mxu1 %v1374_v15  ;;  %v960_v15 = vld [vmem:[%s1903_s0 + $0x58] sm:$0xf0] }
  0x41   :  { %249 = vmatmul.bf16.gmra.mxu0 %v935_v48  ;;  %415 = vmatmul.bf16.gmra.mxu2 %v1047_v50  ;;  %v963_v21 = vor.u32 %v1182_v14, %v960_v15  ;;  %v1214_v48 = vld [vmem:[%s1905_s2 + $0x14] sm:$0xf]  ;;  %v1134_v50 = vld [vmem:[%s1906_s3 + $0x10] sm:$0xf]  ;;  %v1095_v14 = vor.u32 %v1217_v5, %v1094_v4  ;;  %v1099_v15 = vor.u32 %v1216_v6, %v1096_v7 }
  0x42   :  { %292 = vmatmul.bf16.gmra.mxu1 %v939_v49  ;;  %v1088_v49 = vld [vmem:[%s1905_s2 + $0x18] sm:$0xf0] }
  0x43   :  { %v1091_v55 = vor.u32 %v1214_v48, %v1088_v49 }
  0x44   :  { %458 = vmatmul.bf16.gmra.mxu3 %v1051_v51  ;;  %v1227_v51 = vld [vmem:[%s1906_s3 + $0x14] sm:$0xf0] }
  0x45   :  { %v1135_v58 = vor.u32 %v1227_v51, %v1134_v50 }
  0x51   :  { %254 = vmatmul.bf16.gmra.mxu0 %v943_v60  ;;  %420 = vmatmul.bf16.gmra.mxu2 %v1055_v62 }
  0x52   :  { %297 = vmatmul.bf16.gmra.mxu1 %v947_v61 }
  0x54   :  { %463 = vmatmul.bf16.gmra.mxu3 %v1059_v63 }
  0x61   :  { %259 = vmatmul.bf16.gmra.mxu0 %v951_v8  ;;  %425 = vmatmul.bf16.gmra.mxu2 %v1063_v10  ;;  %v1142_v8 = vld [vmem:[%s1906_s3 + $0x20] sm:$0xf]  ;;  %v1228_v10 = vld [vmem:[%s1906_s3 + $0x24] sm:$0xf] }
  0x62   :  { %302 = vmatmul.bf16.gmra.mxu1 %v955_v9  ;;  %v1229_v9 = vld [vmem:[%s1906_s3 + $0x24] sm:$0xf0] }
  0x63   :  { %v1143_v19 = vor.u32 %v1229_v9, %v1142_v8 }
  0x64   :  { %468 = vmatmul.bf16.gmra.mxu3 %v1067_v11  ;;  %v1144_v11 = vld [vmem:[%s1906_s3 + $0x28] sm:$0xf0] }
  0x71   :  { %264 = vmatmul.bf16.gmra.mxu0 %v959_v20  ;;  %430 = vmatmul.bf16.gmra.mxu2 %v1071_v22  ;;  %v1147_v20 = vor.u32 %v1228_v10, %v1144_v11 }
  0x72   :  { %307 = vmatmul.bf16.gmra.mxu1 %v963_v21 }
  0x74   :  { %473 = vmatmul.bf16.gmra.mxu3 %v1075_v23 }
  0x81   :  { %269 = vmatmul.bf16.gmra.mxu0 %v119_v30  ;;  %435 = vmatmul.bf16.gmra.mxu2 %v381_v32  ;;  %v1102_v30 = vld [vmem:[%s1905_s2 + $0x30] sm:$0xf]  ;;  %v1218_v32 = vld [vmem:[%s1905_s2 + $0x34] sm:$0xf] }
  0x82   :  { %312 = vmatmul.bf16.gmra.mxu1 %v120_v31  ;;  %v1219_v31 = vld [vmem:[%s1905_s2 + $0x34] sm:$0xf0] }
  0x83   :  { %v1103_v40 = vor.u32 %v1219_v31, %v1102_v30  ;;  %v1222_v30 = vld [vmem:[%s1905_s2 + $0x54] sm:$0xf]  ;;  %v1120_v31 = vld [vmem:[%s1905_s2 + $0x58] sm:$0xf0] }
  0x84   :  { %478 = vmatmul.bf16.gmra.mxu3 %v382_v33  ;;  %v1104_v33 = vld [vmem:[%s1905_s2 + $0x38] sm:$0xf0] }
  0x85   :  { %v1107_v41 = vor.u32 %v1218_v32, %v1104_v33  ;;  %v1166_v32 = vld [vmem:[%s1906_s3 + $0x50] sm:$0xf]  ;;  %v1235_v33 = vld [vmem:[%s1906_s3 + $0x54] sm:$0xf0] }
  0x91   :  { %584 = vmatmul.bf16.vlgmr.msrb.gmra.mxu0 %v1079_v42  ;;  %763 = vmatmul.bf16.vlgmr.msrb.gmra.mxu2 %v1127_v44 }
  0x92   :  { %627 = vmatmul.bf16.vlgmr.msrb.gmra.mxu1 %v1083_v43 }
  0x94   :  { %806 = vmatmul.bf16.vlgmr.msrb.gmra.mxu3 %v1131_v45  ;;  %v1151_v45 = vor.u32 %v1231_v35, %v1150_v34  ;;  %v1234_v34 = vld [vmem:[%s1906_s3 + $0x54] sm:$0xf]  ;;  %v1168_v35 = vld [vmem:[%s1906_s3 + $0x58] sm:$0xf0] }
  0x9e   :  { %v240_v56 = vpop.f32.mrf.mxu0 }
  0x9f   :  { %v283_v57 = vpop.f32.mrf.mxu1 }
  0xa0   :  { %v1614_v60 = vadd.f32 %v283_v57, %v240_v56  ;;  %v1110_v56 = vld [vmem:[%s1905_s2 + $0x40] sm:$0xf]  ;;  %v1221_v57 = vld [vmem:[%s1905_s2 + $0x44] sm:$0xf0] }
  0xa1   :  { %589 = vmatmul.bf16.gmra.mxu0 %v1087_v54  ;;  %768 = vmatmul.bf16.gmra.mxu2 %v1135_v58  ;;  %v1220_v58 = vld [vmem:[%s1905_s2 + $0x44] sm:$0xf]  ;;  %v1111_v6 = vor.u32 %v1221_v57, %v1110_v56 }
  0xa2   :  { %632 = vmatmul.bf16.gmra.mxu1 %v1091_v55 }
  0xa4   :  { %811 = vmatmul.bf16.gmra.mxu3 %v1139_v59  ;;  %v406_v61 = vpop.f32.mrf.mxu2  ;;  %v1112_v59 = vld [vmem:[%s1905_s2 + $0x48] sm:$0xf0] }
  0xa5   :  { %v1115_v7 = vor.u32 %v1220_v58, %v1112_v59  ;;  %v508_v58 = vld [vmem:[%s1905_s2 + $0x60] sm:$0x11] }
  0xa6   :  { %v242_v0 = vpop.f32.mrf.mxu0 }
  0xa7   :  { %v449_v62 = vpop.f32.mrf.mxu3  ;;  %v285_v1 = vpop.f32.mrf.mxu1 }
  0xa8   :  { %v1616_v63 = vadd.f32 %v449_v62, %v406_v61  ;;  %v1618_v2 = vadd.f32 %v285_v1, %v242_v0  ;;  %v1158_v61 = vld [vmem:[%s1906_s3 + $0x40] sm:$0xf]  ;;  %v1233_v62 = vld [vmem:[%s1906_s3 + $0x44] sm:$0xf0]  ;;  %v1232_v0 = vld [vmem:[%s1906_s3 + $0x44] sm:$0xf] }
  0xa9   :  { %v1160_v1 = vld [vmem:[%s1906_s3 + $0x48] sm:$0xf0]  ;;  %v1159_v11 = vor.u32 %v1233_v62, %v1158_v61  ;;  %v687_v61 = vld [vmem:[%s1906_s3 + $0x60] sm:$0x11] }
  0xaa   :  { %v483_v3 = vmax.f32 %v1614_v60, %v1616_v63 }
  0xac   :  { %v408_v12 = vpop.f32.mrf.mxu2 }
  0xae   :  { %v245_v17 = vpop.f32.mrf.mxu0 }
  0xaf   :  { %v451_v13 = vpop.f32.mrf.mxu3  ;;  %v288_v18 = vpop.f32.mrf.mxu1 }
  0xb0   :  { %v1646_v16 = vadd.f32 %v451_v13, %v408_v12  ;;  %v1648_v21 = vadd.f32 %v288_v18, %v245_v17  ;;  %v1163_v12 = vor.u32 %v1232_v0, %v1160_v1  ;;  %v546_v0 = vunpack.c.l.b16 %v508_v58 }
  0xb1   :  { %594 = vmatmul.bf16.gmra.mxu0 %v1095_v14  ;;  %773 = vmatmul.bf16.gmra.mxu2 %v1143_v19  ;;  %v547_v1 = vunpack.c.h.b16 %v508_v58 }
  0xb2   :  { %v484_v22 = vmax.f32 %v1618_v2, %v1646_v16  ;;  %637 = vmatmul.bf16.gmra.mxu1 %v1099_v15 }
  0xb4   :  { %816 = vmatmul.bf16.gmra.mxu3 %v1147_v20  ;;  %v411_v23 = vpop.f32.mrf.mxu2 }
  0xb6   :  { %v247_v26 = vpop.f32.mrf.mxu0 }
  0xb7   :  { %v454_v24 = vpop.f32.mrf.mxu3  ;;  %v290_v27 = vpop.f32.mrf.mxu1 }
  0xb8   :  { %v1652_v25 = vadd.f32 %v454_v24, %v411_v23  ;;  %v1654_v28 = vadd.f32 %v290_v27, %v247_v26  ;;  %v1118_v26 = vld [vmem:[%s1905_s2 + $0x50] sm:$0xf]  ;;  %v1223_v27 = vld [vmem:[%s1905_s2 + $0x54] sm:$0xf0] }
  0xba   :  { %v485_v29 = vmax.f32 %v1648_v21, %v1652_v25 }
  0xbc   :  { %v413_v38 = vpop.f32.mrf.mxu2 }
  0xbe   :  { %v250_v43 = vpop.f32.mrf.mxu0 }
  0xbf   :  { %v456_v39 = vpop.f32.mrf.mxu3  ;;  %v293_v44 = vpop.f32.mrf.mxu1 }
  0xc0   :  { %v1682_v42 = vadd.f32 %v456_v39, %v413_v38  ;;  %v1684_v47 = vadd.f32 %v293_v44, %v250_v43  ;;  %v1119_v38 = vor.u32 %v1223_v27, %v1118_v26  ;;  %v1123_v39 = vor.u32 %v1222_v30, %v1120_v31 }
  0xc1   :  { %599 = vmatmul.bf16.gmra.mxu0 %v1103_v40  ;;  %778 = vmatmul.bf16.gmra.mxu2 %v1151_v45  ;;  %v1167_v44 = vor.u32 %v1235_v33, %v1166_v32  ;;  %v1171_v45 = vor.u32 %v1234_v34, %v1168_v35 }
  0xc2   :  { %v486_v48 = vmax.f32 %v1654_v28, %v1682_v42  ;;  %642 = vmatmul.bf16.gmra.mxu1 %v1107_v41 }
  0xc4   :  { %821 = vmatmul.bf16.gmra.mxu3 %v1155_v46  ;;  %v416_v49 = vpop.f32.mrf.mxu2 }
  0xc6   :  { %v252_v52 = vpop.f32.mrf.mxu0 }
  0xc7   :  { %v459_v50 = vpop.f32.mrf.mxu3  ;;  %v295_v53 = vpop.f32.mrf.mxu1 }
  0xc8   :  { %v1688_v51 = vadd.f32 %v459_v50, %v416_v49  ;;  %v1690_v54 = vadd.f32 %v295_v53, %v252_v52 }
  0xca   :  { %v487_v55 = vmax.f32 %v1684_v47, %v1688_v51 }
  0xcc   :  { %v418_v4 = vpop.f32.mrf.mxu2 }
  0xce   :  { %v255_v9 = vpop.f32.mrf.mxu0 }
  0xcf   :  { %v461_v5 = vpop.f32.mrf.mxu3  ;;  %v298_v10 = vpop.f32.mrf.mxu1 }
  0xd0   :  { %v1718_v8 = vadd.f32 %v461_v5, %v418_v4  ;;  %v1720_v13 = vadd.f32 %v298_v10, %v255_v9  ;;  %v725_v4 = vunpack.c.l.b16 %v687_v61  ;;  %v726_v5 = vunpack.c.h.b16 %v687_v61 }
  0xd1   :  { %604 = vmatmul.bf16.gmra.mxu0 %v1111_v6  ;;  %783 = vmatmul.bf16.gmra.mxu2 %v1159_v11  ;;  %v560_v9 = vpack.c.b16 %v546_v0, %v546_v0  ;;  %v561_v10 = vpack.c.b16 %v547_v1, %v547_v1 }
  0xd2   :  { %v488_v14 = vmax.f32 %v1690_v54, %v1718_v8  ;;  %647 = vmatmul.bf16.gmra.mxu1 %v1115_v7 }
  0xd4   :  { %826 = vmatmul.bf16.gmra.mxu3 %v1163_v12  ;;  %v421_v15 = vpop.f32.mrf.mxu2 }
  0xd6   :  { %v257_v19 = vpop.f32.mrf.mxu0 }
  0xd7   :  { %v464_v17 = vpop.f32.mrf.mxu3  ;;  %v300_v20 = vpop.f32.mrf.mxu1 }
  0xd8   :  { %v1724_v18 = vadd.f32 %v464_v17, %v421_v15  ;;  %v1726_v23 = vadd.f32 %v300_v20, %v257_v19  ;;  %v739_v17 = vpack.c.b16 %v725_v4, %v725_v4  ;;  %v740_v19 = vpack.c.b16 %v726_v5, %v726_v5 }
  0xda   :  { %v489_v24 = vmax.f32 %v1720_v13, %v1724_v18 }
  0xdc   :  { %v423_v36 = vpop.f32.mrf.mxu2 }
  0xde   :  { %v260_v41 = vpop.f32.mrf.mxu0 }
  0xdf   :  { %v466_v37 = vpop.f32.mrf.mxu3  ;;  %v303_v43 = vpop.f32.mrf.mxu1 }
  0xe0   :  { %v1754_v40 = vadd.f32 %v466_v37, %v423_v36  ;;  %v1756_v46 = vadd.f32 %v303_v43, %v260_v41 }
  0xe1   :  { %609 = vmatmul.bf16.gmra.mxu0 %v1119_v38  ;;  %788 = vmatmul.bf16.gmra.mxu2 %v1167_v44 }
  0xe2   :  { %v490_v49 = vmax.f32 %v1726_v23, %v1754_v40  ;;  %652 = vmatmul.bf16.gmra.mxu1 %v1123_v39 }
  0xe4   :  { %831 = vmatmul.bf16.gmra.mxu3 %v1171_v45  ;;  %v426_v50 = vpop.f32.mrf.mxu2 }
  0xe6   :  { %v262_v56 = vpop.f32.mrf.mxu0 }
  0xe7   :  { %v469_v52 = vpop.f32.mrf.mxu3  ;;  %v305_v57 = vpop.f32.mrf.mxu1 }
  0xe8   :  { %v1760_v53 = vadd.f32 %v469_v52, %v426_v50  ;;  %v1765_v59 = vadd.f32 %v305_v57, %v262_v56 }
  0xea   :  { %v491_v62 = vmax.f32 %v1756_v46, %v1760_v53 }
  0xec   :  { %v428_v6 = vpop.f32.mrf.mxu2 }
  0xee   :  { %v265_v12 = vpop.f32.mrf.mxu0 }
  0xef   :  { %v471_v7 = vpop.f32.mrf.mxu3  ;;  %v308_v15 = vpop.f32.mrf.mxu1 }
  0xf0   :  { %v1772_v11 = vadd.f32 %v471_v7, %v428_v6  ;;  %v1774_v20 = vadd.f32 %v308_v15, %v265_v12  ;;  %v1800_v12 = vld [vmem:[%s1907_s5] ss:$0 sm:$0xff] }
  0xf1   :  { %614 = vmatmul.bf16.gmra.mxu0 %v560_v9  ;;  %793 = vmatmul.bf16.gmra.mxu2 %v739_v17 }
  0xf2   :  { %v492_v26 = vmax.f32 %v1765_v59, %v1772_v11  ;;  %657 = vmatmul.bf16.gmra.mxu1 %v561_v10 }
  0xf4   :  { %836 = vmatmul.bf16.gmra.mxu3 %v740_v19  ;;  %v431_v27 = vpop.f32.mrf.mxu2 }
  0xf6   :  { %v267_v32 = vpop.f32.mrf.mxu0 }
  0xf7   :  { %v474_v30 = vpop.f32.mrf.mxu3  ;;  %v310_v33 = vpop.f32.mrf.mxu1 }
  0xf8   :  { %v1778_v31 = vadd.f32 %v474_v30, %v431_v27  ;;  %v1780_v34 = vadd.f32 %v310_v33, %v267_v32 }
  0xfa   :  { %v493_v35 = vmax.f32 %v1774_v20, %v1778_v31 }
  0xfc   :  { %v433_v36 = vpop.f32.mrf.mxu2 }
  0xfe   :  { %v270_v39 = vpop.f32.mrf.mxu0 }
  0xff   :  { %v476_v37 = vpop.f32.mrf.mxu3  ;;  %v313_v41 = vpop.f32.mrf.mxu1 }
 0x100   :  { %v1784_v38 = vadd.f32 %v476_v37, %v433_v36  ;;  %v1786_v43 = vadd.f32 %v313_v41, %v270_v39 }
 0x102   :  { %v494_v44 = vmax.f32 %v1780_v34, %v1784_v38 }
 0x104   :  { %v436_v45 = vpop.f32.mrf.mxu2 }
 0x106   :  { %v272_v56 = vpop.f32.mrf.mxu0 }
 0x107   :  { %v479_v50 = vpop.f32.mrf.mxu3  ;;  %v315_v57 = vpop.f32.mrf.mxu1 }
 0x108   :  { %v1790_v52 = vadd.f32 %v479_v50, %v436_v45 }
 0x10a   :  { %v495_v58 = vmax.f32 %v1786_v43, %v1790_v52 }
 0x10c   :  { %v438_v61 = vpop.f32.mrf.mxu2 }
 0x10e   :  { %v585_v1 = vpop.f32.mrf.mxu0 }
 0x10f   :  { %v481_v0 = vpop.f32.mrf.mxu3  ;;  %v628_v4 = vpop.f32.mrf.mxu1 }
 0x110   :  { %v629_v5 = vadd.f32 %v628_v4, %v585_v1 }
 0x112   :  { %v662_v9 = vmax.f32 %v483_v3, %v629_v5 }
 0x114   :  { %v764_v6 = vpop.f32.mrf.mxu2 }
 0x116   :  { %v587_v15 = vpop.f32.mrf.mxu0 }
 0x117   :  { %v807_v7 = vpop.f32.mrf.mxu3  ;;  %v630_v17 = vpop.f32.mrf.mxu1 }
 0x118   :  { %v808_v10 = vadd.f32 %v807_v7, %v764_v6  ;;  %v631_v30 = vadd.f32 %v630_v17, %v587_v15 }
 0x11a   :  { %v841_v19 = vmax.f32 %v662_v9, %v808_v10  ;;  %v663_v60 = vmax.f32 %v484_v22, %v631_v30 }
 0x11c   :  { %v858_v27 = vadd.f32 %v1800_v12, %v841_v19  ;;  %v766_v33 = vpop.f32.mrf.mxu2 }
 0x11e   :  { %v871_v32 = vmax.f32 %v858_v27, 0.0  ;;  %v590_v3 = vpop.f32.mrf.mxu0 }
 0x11f   :  { %v809_v36 = vpop.f32.mrf.mxu3  ;;  %v633_v39 = vpop.f32.mrf.mxu1 }
 0x120   :  { %v884_v37 = vpack.c.bf16 %v871_v32, %v871_v32  ;;  %v810_v63 = vadd.f32 %v809_v36, %v766_v33  ;;  %v634_v50 = vadd.f32 %v633_v39, %v590_v3 }
 0x122   :  { %898 = vst.msk [vmem:[%s1908_s6] sm:$0xf] %vm897_vm0, %v884_v37  ;;  %v842_v41 = vmax.f32 %v663_v60, %v810_v63  ;;  %v664_v2 = vmax.f32 %v485_v29, %v634_v50 }
 0x124   :  { %v859_v45 = vadd.f32 %v1800_v12, %v842_v41  ;;  %v769_v57 = vpop.f32.mrf.mxu2 }
 0x126   :  { %v872_v56 = vmax.f32 %v859_v45, 0.0  ;;  %v592_v22 = vpop.f32.mrf.mxu0 }
 0x127   :  { %v812_v61 = vpop.f32.mrf.mxu3  ;;  %v635_v1 = vpop.f32.mrf.mxu1 }
 0x128   :  { %v885_v0 = vpack.c.bf16 %v872_v56, %v872_v56  ;;  %v813_v16 = vadd.f32 %v812_v61, %v769_v57  ;;  %v636_v6 = vadd.f32 %v635_v1, %v592_v22 }
 0x12a   :  { %899 = vst.msk [vmem:[%s1908_s6 + $0x4] sm:$0xf] %vm897_vm0, %v885_v0  ;;  %v843_v4 = vmax.f32 %v664_v2, %v813_v16  ;;  %v665_v21 = vmax.f32 %v486_v48, %v636_v6 }
 0x12c   :  { %v860_v5 = vadd.f32 %v1800_v12, %v843_v4  ;;  %v771_v9 = vpop.f32.mrf.mxu2 }
 0x12e   :  { %v873_v7 = vmax.f32 %v860_v5, 0.0  ;;  %v595_v29 = vpop.f32.mrf.mxu0 }
 0x12f   :  { %v814_v10 = vpop.f32.mrf.mxu3  ;;  %v638_v17 = vpop.f32.mrf.mxu1 }
 0x130   :  { %v886_v15 = vpack.c.bf16 %v873_v7, %v873_v7  ;;  %v815_v25 = vadd.f32 %v814_v10, %v771_v9  ;;  %v639_v30 = vadd.f32 %v638_v17, %v595_v29 }
 0x132   :  { %900 = vst.msk [vmem:[%s1908_s6 + $0x8] sm:$0xf] %vm897_vm0, %v886_v15  ;;  %v844_v19 = vmax.f32 %v665_v21, %v815_v25  ;;  %v666_v28 = vmax.f32 %v487_v55, %v639_v30 }
 0x134   :  { %v861_v27 = vadd.f32 %v1800_v12, %v844_v19  ;;  %v774_v33 = vpop.f32.mrf.mxu2 }
 0x136   :  { %v874_v32 = vmax.f32 %v861_v27, 0.0  ;;  %v597_v48 = vpop.f32.mrf.mxu0 }
 0x137   :  { %v817_v36 = vpop.f32.mrf.mxu3  ;;  %v640_v60 = vpop.f32.mrf.mxu1 }
 0x138   :  { %v887_v37 = vpack.c.bf16 %v874_v32, %v874_v32  ;;  %v818_v42 = vadd.f32 %v817_v36, %v774_v33  ;;  %v641_v39 = vadd.f32 %v640_v60, %v597_v48 }
 0x13a   :  { %901 = vst.msk [vmem:[%s1908_s6 + $0xc] sm:$0xf] %vm897_vm0, %v887_v37  ;;  %v845_v63 = vmax.f32 %v666_v28, %v818_v42  ;;  %v667_v47 = vmax.f32 %v488_v14, %v641_v39 }
 0x13c   :  { %v862_v3 = vadd.f32 %v1800_v12, %v845_v63  ;;  %v776_v45 = vpop.f32.mrf.mxu2 }
 0x13e   :  { %v875_v41 = vmax.f32 %v862_v3, 0.0  ;;  %v600_v55 = vpop.f32.mrf.mxu0 }
 0x13f   :  { %v819_v50 = vpop.f32.mrf.mxu3  ;;  %v643_v57 = vpop.f32.mrf.mxu1 }
 0x140   :  { %v888_v56 = vpack.c.bf16 %v875_v41, %v875_v41  ;;  %v820_v51 = vadd.f32 %v819_v50, %v776_v45  ;;  %v644_v2 = vadd.f32 %v643_v57, %v600_v55 }
 0x142   :  { %902 = vst.msk [vmem:[%s1908_s6 + $0x10] sm:$0xf] %vm897_vm0, %v888_v56  ;;  %v846_v61 = vmax.f32 %v667_v47, %v820_v51  ;;  %v668_v54 = vmax.f32 %v489_v24, %v644_v2 }
 0x144   :  { %v863_v0 = vadd.f32 %v1800_v12, %v846_v61  ;;  %v779_v22 = vpop.f32.mrf.mxu2 }
 0x146   :  { %v876_v16 = vmax.f32 %v863_v0, 0.0  ;;  %v602_v14 = vpop.f32.mrf.mxu0 }
 0x147   :  { %v822_v1 = vpop.f32.mrf.mxu3  ;;  %v645_v5 = vpop.f32.mrf.mxu1 }
 0x148   :  { %v889_v4 = vpack.c.bf16 %v876_v16, %v876_v16  ;;  %v823_v8 = vadd.f32 %v822_v1, %v779_v22  ;;  %v646_v9 = vadd.f32 %v645_v5, %v602_v14 }
 0x14a   :  { %903 = vst.msk [vmem:[%s1908_s6 + $0x14] sm:$0xf] %vm897_vm0, %v889_v4  ;;  %v847_v6 = vmax.f32 %v668_v54, %v823_v8  ;;  %v669_v13 = vmax.f32 %v490_v49, %v646_v9 }
 0x14c   :  { %v864_v7 = vadd.f32 %v1800_v12, %v847_v6  ;;  %v781_v15 = vpop.f32.mrf.mxu2 }
 0x14e   :  { %v877_v10 = vmax.f32 %v864_v7, 0.0  ;;  %v605_v24 = vpop.f32.mrf.mxu0 }
 0x14f   :  { %v824_v21 = vpop.f32.mrf.mxu3  ;;  %v648_v29 = vpop.f32.mrf.mxu1 }
 0x150   :  { %v890_v25 = vpack.c.bf16 %v877_v10, %v877_v10  ;;  %v825_v18 = vadd.f32 %v824_v21, %v781_v15  ;;  %v649_v27 = vadd.f32 %v648_v29, %v605_v24 }
 0x152   :  { %904 = vst.msk [vmem:[%s1908_s6 + $0x18] sm:$0xf] %vm897_vm0, %v890_v25  ;;  %v848_v17 = vmax.f32 %v669_v13, %v825_v18  ;;  %v670_v23 = vmax.f32 %v491_v62, %v649_v27 }
 0x154   :  { %v865_v19 = vadd.f32 %v1800_v12, %v848_v17  ;;  %v784_v32 = vpop.f32.mrf.mxu2 }
 0x156   :  { %v878_v30 = vmax.f32 %v865_v19, 0.0  ;;  %v607_v49 = vpop.f32.mrf.mxu0 }
 0x157   :  { %v827_v33 = vpop.f32.mrf.mxu3  ;;  %v650_v37 = vpop.f32.mrf.mxu1 }
 0x158   :  { %v891_v36 = vpack.c.bf16 %v878_v30, %v878_v30  ;;  %v828_v40 = vadd.f32 %v827_v33, %v784_v32  ;;  %v651_v48 = vadd.f32 %v650_v37, %v607_v49 }
 0x15a   :  { %905 = vst.msk [vmem:[%s1908_s6 + $0x1c] sm:$0xf] %vm897_vm0, %v891_v36  ;;  %v849_v28 = vmax.f32 %v670_v23, %v828_v40  ;;  %v671_v46 = vmax.f32 %v492_v26, %v651_v48 }
 0x15c   :  { %v866_v42 = vadd.f32 %v1800_v12, %v849_v28  ;;  %v786_v63 = vpop.f32.mrf.mxu2 }
 0x15e   :  { %v879_v60 = vmax.f32 %v866_v42, 0.0  ;;  %v610_v62 = vpop.f32.mrf.mxu0 }
 0x15f   :  { %v829_v3 = vpop.f32.mrf.mxu3  ;;  %v653_v41 = vpop.f32.mrf.mxu1 }
 0x160   :  { %v892_v39 = vpack.c.bf16 %v879_v60, %v879_v60  ;;  %v830_v53 = vadd.f32 %v829_v3, %v786_v63  ;;  %v654_v56 = vadd.f32 %v653_v41, %v610_v62 }
 0x162   :  { %906 = vst.msk [vmem:[%s1908_s6 + $0x20] sm:$0xf] %vm897_vm0, %v892_v39  ;;  %v850_v45 = vmax.f32 %v671_v46, %v830_v53  ;;  %v672_v59 = vmax.f32 %v493_v35, %v654_v56 }
 0x164   :  { %v867_v50 = vadd.f32 %v1800_v12, %v850_v45  ;;  %v789_v51 = vpop.f32.mrf.mxu2 }
 0x166   :  { %v880_v47 = vmax.f32 %v867_v50, 0.0  ;;  %v612_v26 = vpop.f32.mrf.mxu0 }
 0x167   :  { %v832_v55 = vpop.f32.mrf.mxu3  ;;  %v655_v61 = vpop.f32.mrf.mxu1 }
 0x168   :  { %v893_v57 = vpack.c.bf16 %v880_v47, %v880_v47  ;;  %v833_v11 = vadd.f32 %v832_v55, %v789_v51  ;;  %v656_v16 = vadd.f32 %v655_v61, %v612_v26 }
 0x16a   :  { %907 = vst.msk [vmem:[%s1908_s6 + $0x24] sm:$0xf] %vm897_vm0, %v893_v57  ;;  %v851_v0 = vmax.f32 %v672_v59, %v833_v11  ;;  %v673_v20 = vmax.f32 %v494_v44, %v656_v16 }
 0x16c   :  { %v868_v2 = vadd.f32 %v1800_v12, %v851_v0  ;;  %v791_v1 = vpop.f32.mrf.mxu2 }
 0x16e   :  { %v881_v22 = vmax.f32 %v868_v2, 0.0  ;;  %v615_v35 = vpop.f32.mrf.mxu0 }
 0x16f   :  { %v834_v4 = vpop.f32.mrf.mxu3  ;;  %v658_v8 = vpop.f32.mrf.mxu1 }
 0x170   :  { %v894_v54 = vpack.c.bf16 %v881_v22, %v881_v22  ;;  %v835_v31 = vadd.f32 %v834_v4, %v791_v1  ;;  %v659_v6 = vadd.f32 %v658_v8, %v615_v35 }
 0x172   :  { %908 = vst.msk [vmem:[%s1908_s6 + $0x28] sm:$0xf] %vm897_vm0, %v894_v54  ;;  %v852_v14 = vmax.f32 %v673_v20, %v835_v31  ;;  %v674_v34 = vmax.f32 %v495_v58, %v659_v6 }
 0x174   :  { %v869_v5 = vadd.f32 %v1800_v12, %v852_v14  ;;  %v794_v9 = vpop.f32.mrf.mxu2 }
 0x176   :  { %v882_v7 = vmax.f32 %v869_v5, 0.0  ;;  %v617_v44 = vpop.f32.mrf.mxu0 }
 0x177   :  { %v837_v10 = vpop.f32.mrf.mxu3  ;;  %v660_v21 = vpop.f32.mrf.mxu1 }
 0x178   :  { %v895_v15 = vpack.c.bf16 %v882_v7, %v882_v7  ;;  %v838_v38 = vadd.f32 %v837_v10, %v794_v9 }
 0x17a   :  { %909 = vst.msk [vmem:[%s1908_s6 + $0x2c] sm:$0xf] %vm897_vm0, %v895_v15  ;;  %v853_v25 = vmax.f32 %v674_v34, %v838_v38 }
 0x17c   :  { %v870_v13 = vadd.f32 %v1800_v12, %v853_v25  ;;  %v796_v24 = vpop.f32.mrf.mxu2 }
 0x17e   :  { %v883_v18 = vmax.f32 %v870_v13, 0.0 }
 0x17f   :  { %v839_v29 = vpop.f32.mrf.mxu3 }
 0x180   :  { %v896_v17 = vpack.c.bf16 %v883_v18, %v883_v18 }
 0x182   :  { %911 = vst.msk [vmem:[%s1908_s6 + $0x30] sm:$0x1] %vm910_vm1, %v896_v17 }

// kernel: forward.6
= control target key start
LH: loop header
LB: loop body
LE: loop exit
PB: predicated region body
PF: predicated region fallthrough
CT: control target
= control target key end

     0   :  { %vm749_vm0 = vcmask 322560   ;;  %vm752_vm1 = vcmask 319488   ;;  %s1471_s4 = inlined_call_operand.vmem [shape: bf16[512,40], index: 4, kind: input, shape index: {}]   ;;  %s1472_s0 = inlined_call_operand.vmem [shape: bf16[18,512], index: 0, kind: input, shape index: {}]   ;;  %s1473_s1 = inlined_call_operand.vmem [shape: bf16[18,512], index: 1, kind: input, shape index: {}]   ;;  %s1474_s2 = inlined_call_operand.vmem [shape: bf16[18,512], index: 2, kind: input, shape index: {}]   ;;  %s1475_s3 = inlined_call_operand.vmem [shape: bf16[18,512], index: 3, kind: input, shape index: {}]   ;;  %s1476_s5 = inlined_call_operand.vmem [shape: f32[1,40], index: 5, kind: input, shape index: {}]   ;;  %s1477_s6 = inlined_call_operand.vmem [shape: bf16[18,40], index: 6, kind: output, shape index: {}]  }
   0x1   :  { %v1037_v0 = vld [vmem:[%s1471_s4 + $0x38] sm:$0xff]  ;;  %v1059_v4 = vld [vmem:[%s1471_s4 + $0x30] sm:$0xff]  ;;  %v1083_v8 = vld [vmem:[%s1471_s4 + $0x28] sm:$0xff] }
   0x2   :  { %v1042_v1 = vld [vmem:[%s1471_s4 + $0x78] sm:$0xff]  ;;  %319 = vmatpush.bf16.msra.mxu0 %v1037_v0  ;;  %v1064_v5 = vld [vmem:[%s1471_s4 + $0x70] sm:$0xff]  ;;  %v1088_v9 = vld [vmem:[%s1471_s4 + $0x68] sm:$0xff] }
   0x3   :  { %v1047_v2 = vld [vmem:[%s1471_s4 + $0xb8] sm:$0xff]  ;;  %337 = vmatpush.bf16.msra.mxu1 %v1042_v1  ;;  %v1071_v6 = vld [vmem:[%s1471_s4 + $0xb0] sm:$0xff]  ;;  %v1095_v10 = vld [vmem:[%s1471_s4 + $0xa8] sm:$0xff] }
   0x4   :  { %v1052_v3 = vld [vmem:[%s1471_s4 + $0xf8] sm:$0xff]  ;;  %355 = vmatpush.bf16.msra.mxu2 %v1047_v2  ;;  %v1076_v7 = vld [vmem:[%s1471_s4 + $0xf0] sm:$0xff]  ;;  %v1100_v11 = vld [vmem:[%s1471_s4 + $0xe8] sm:$0xff] }
   0x5   :  { %373 = vmatpush.bf16.msra.mxu3 %v1052_v3  ;;  %v1107_v12 = vld [vmem:[%s1471_s4 + $0x20] sm:$0xff]  ;;  %v1131_v16 = vld [vmem:[%s1471_s4 + $0x18] sm:$0xff]  ;;  %v1155_v20 = vld [vmem:[%s1471_s4 + $0x10] sm:$0xff] }
   0x6   :  { %320 = vmatpush.bf16.msra.mxu0 %v1059_v4  ;;  %v1112_v13 = vld [vmem:[%s1471_s4 + $0x60] sm:$0xff]  ;;  %v1136_v17 = vld [vmem:[%s1471_s4 + $0x58] sm:$0xff]  ;;  %v1160_v21 = vld [vmem:[%s1471_s4 + $0x50] sm:$0xff] }
   0x7   :  { %338 = vmatpush.bf16.msra.mxu1 %v1064_v5  ;;  %v1119_v14 = vld [vmem:[%s1471_s4 + $0xa0] sm:$0xff]  ;;  %v1143_v18 = vld [vmem:[%s1471_s4 + $0x98] sm:$0xff]  ;;  %v1167_v22 = vld [vmem:[%s1471_s4 + $0x90] sm:$0xff] }
   0x8   :  { %356 = vmatpush.bf16.msra.mxu2 %v1071_v6  ;;  %v1124_v15 = vld [vmem:[%s1471_s4 + $0xe0] sm:$0xff]  ;;  %v1148_v19 = vld [vmem:[%s1471_s4 + $0xd8] sm:$0xff]  ;;  %v1172_v23 = vld [vmem:[%s1471_s4 + $0xd0] sm:$0xff] }
   0x9   :  { %374 = vmatpush.bf16.msra.mxu3 %v1076_v7  ;;  %v1179_v24 = vld [vmem:[%s1471_s4 + $0x8] sm:$0xff]  ;;  %v1201_v28 = vld [vmem:[%s1471_s4] sm:$0xff]  ;;  %v952_v33 = vld [vmem:[%s1472_s0 + $0xc] sm:$0xf0] }
   0xa   :  { %321 = vmatpush.bf16.msra.mxu0 %v1083_v8  ;;  %v1184_v25 = vld [vmem:[%s1471_s4 + $0x48] sm:$0xff]  ;;  %v1206_v29 = vld [vmem:[%s1471_s4 + $0x40] sm:$0xff]  ;;  %v762_v35 = vld [vmem:[%s1472_s0 + $0x10] sm:$0xf0] }
   0xb   :  { %339 = vmatpush.bf16.msra.mxu1 %v1088_v9  ;;  %v1191_v26 = vld [vmem:[%s1471_s4 + $0x88] sm:$0xff]  ;;  %v1211_v30 = vld [vmem:[%s1471_s4 + $0x80] sm:$0xff]  ;;  %v953_v37 = vld [vmem:[%s1472_s0 + $0x14] sm:$0xf0] }
   0xc   :  { %357 = vmatpush.bf16.msra.mxu2 %v1095_v10  ;;  %v1196_v27 = vld [vmem:[%s1471_s4 + $0xc8] sm:$0xff]  ;;  %v1216_v31 = vld [vmem:[%s1471_s4 + $0xc0] sm:$0xff]  ;;  %v770_v39 = vld [vmem:[%s1472_s0 + $0x18] sm:$0xf0] }
   0xd   :  { %375 = vmatpush.bf16.msra.mxu3 %v1100_v11  ;;  %v760_v32 = vld [vmem:[%s1472_s0] sm:$0xf]  ;;  %v950_v34 = vld [vmem:[%s1472_s0 + $0x4] sm:$0xf]  ;;  %v768_v36 = vld [vmem:[%s1472_s0 + $0x8] sm:$0xf] }
   0xe   :  { %322 = vmatpush.bf16.msra.mxu0 %v1107_v12  ;;  %v951_v38 = vld [vmem:[%s1472_s0 + $0xc] sm:$0xf]  ;;  %v761_v40 = vor.u32 %v952_v33, %v760_v32  ;;  %v765_v41 = vor.u32 %v950_v34, %v762_v35  ;;  %v769_v42 = vor.u32 %v953_v37, %v768_v36  ;;  %v27_v44 = vld [vmem:[%s1472_s0 + $0x20] sm:$0x11]  ;;  %v988_v55 = vld [vmem:[%s1473_s1 + $0xc] sm:$0xf0] }
   0xf   :  { %340 = vmatpush.bf16.msra.mxu1 %v1112_v13  ;;  %v773_v43 = vor.u32 %v951_v38, %v770_v39  ;;  %v28_v45 = vld [vmem:[%s1472_s0 + $0x28] sm:$0x11]  ;;  %v107_v46 = vunpack.c.l.b16 %v27_v44  ;;  %v108_v47 = vunpack.c.h.b16 %v27_v44  ;;  %v904_v54 = vld [vmem:[%s1473_s1] sm:$0xf]  ;;  %v986_v56 = vld [vmem:[%s1473_s1 + $0x4] sm:$0xf] }
  0x10   :  { %358 = vmatpush.bf16.msra.mxu2 %v1119_v14  ;;  %v109_v48 = vunpack.c.l.b16 %v28_v45  ;;  %v110_v49 = vunpack.c.h.b16 %v28_v45  ;;  %v906_v57 = vld [vmem:[%s1473_s1 + $0x10] sm:$0xf0]  ;;  %v912_v58 = vld [vmem:[%s1473_s1 + $0x8] sm:$0xf]  ;;  %v989_v59 = vld [vmem:[%s1473_s1 + $0x14] sm:$0xf0]  ;;  %v905_v62 = vor.u32 %v988_v55, %v904_v54 }
  0x11   :  { %376 = vmatpush.bf16.msra.mxu3 %v1124_v15  ;;  %v115_v50 = vpack.c.b16 %v107_v46, %v107_v46  ;;  %v116_v51 = vpack.c.b16 %v108_v47, %v108_v47  ;;  %v987_v60 = vld [vmem:[%s1473_s1 + $0xc] sm:$0xf]  ;;  %v914_v61 = vld [vmem:[%s1473_s1 + $0x18] sm:$0xf0]  ;;  %v909_v63 = vor.u32 %v986_v56, %v906_v57  ;;  %v913_v32 = vor.u32 %v989_v59, %v912_v58  ;;  %v395_v34 = vld [vmem:[%s1473_s1 + $0x20] sm:$0x11] }
  0x12   :  { %323 = vmatpush.bf16.msra.mxu0 %v1131_v16  ;;  %v117_v52 = vpack.c.b16 %v109_v48, %v109_v48  ;;  %v118_v53 = vpack.c.b16 %v110_v49, %v110_v49  ;;  %v917_v33 = vor.u32 %v987_v60, %v914_v61  ;;  %v396_v35 = vld [vmem:[%s1473_s1 + $0x28] sm:$0x11]  ;;  %v411_v36 = vunpack.c.l.b16 %v395_v34  ;;  %v920_v44 = vld [vmem:[%s1474_s2] sm:$0xf]  ;;  %v992_v45 = vld [vmem:[%s1474_s2 + $0xc] sm:$0xf0] }
  0x13   :  { %341 = vmatpush.bf16.msra.mxu1 %v1136_v17  ;;  %v412_v37 = vunpack.c.h.b16 %v395_v34  ;;  %v413_v38 = vunpack.c.l.b16 %v396_v35  ;;  %v414_v39 = vunpack.c.h.b16 %v396_v35  ;;  %v990_v46 = vld [vmem:[%s1474_s2 + $0x4] sm:$0xf]  ;;  %v922_v47 = vld [vmem:[%s1474_s2 + $0x10] sm:$0xf0]  ;;  %v928_v48 = vld [vmem:[%s1474_s2 + $0x8] sm:$0xf] }
  0x14   :  { %359 = vmatpush.bf16.msra.mxu2 %v1143_v18  ;;  %v993_v49 = vld [vmem:[%s1474_s2 + $0x14] sm:$0xf0] }
  0x15   :  { %377 = vmatpush.bf16.msra.mxu3 %v1148_v19 }
  0x16   :  { %324 = vmatpush.bf16.msra.mxu0 %v1155_v20 }
  0x17   :  { %342 = vmatpush.bf16.msra.mxu1 %v1160_v21 }
  0x18   :  { %360 = vmatpush.bf16.msra.mxu2 %v1167_v22 }
  0x19   :  { %378 = vmatpush.bf16.msra.mxu3 %v1172_v23 }
  0x1a   :  { %325 = vmatpush.bf16.msra.mxu0 %v1179_v24 }
  0x1b   :  { %343 = vmatpush.bf16.msra.mxu1 %v1184_v25 }
  0x1c   :  { %361 = vmatpush.bf16.msra.mxu2 %v1191_v26 }
  0x1d   :  { %379 = vmatpush.bf16.msra.mxu3 %v1196_v27 }
  0x1e   :  { %326 = vmatpush.bf16.msra.mxu0 %v1201_v28 }
  0x1f   :  { %344 = vmatpush.bf16.msra.mxu1 %v1206_v29 }
  0x20   :  { %362 = vmatpush.bf16.msra.mxu2 %v1211_v30 }
  0x21   :  { %380 = vmatpush.bf16.msra.mxu3 %v1216_v31  ;;  %327 = vmatmul.bf16.vlgmr.msra.gmra.mxu0 %v761_v40  ;;  %v419_v40 = vpack.c.b16 %v411_v36, %v411_v36 }
  0x22   :  { %431 = vmatpush.bf16.msrb.mxu0 %v1037_v0  ;;  %345 = vmatmul.bf16.vlgmr.msra.gmra.mxu1 %v765_v41  ;;  %v420_v41 = vpack.c.b16 %v412_v37, %v412_v37 }
  0x23   :  { %363 = vmatmul.bf16.vlgmr.msra.gmra.mxu2 %v769_v42  ;;  %449 = vmatpush.bf16.msrb.mxu1 %v1042_v1  ;;  %v421_v42 = vpack.c.b16 %v413_v38, %v413_v38 }
  0x24   :  { %467 = vmatpush.bf16.msrb.mxu2 %v1047_v2  ;;  %381 = vmatmul.bf16.vlgmr.msra.gmra.mxu3 %v773_v43  ;;  %v422_v43 = vpack.c.b16 %v414_v39, %v414_v39 }
  0x25   :  { %485 = vmatpush.bf16.msrb.mxu3 %v1052_v3 }
  0x26   :  { %432 = vmatpush.bf16.msrb.mxu0 %v1059_v4 }
  0x27   :  { %450 = vmatpush.bf16.msrb.mxu1 %v1064_v5 }
  0x28   :  { %468 = vmatpush.bf16.msrb.mxu2 %v1071_v6 }
  0x29   :  { %486 = vmatpush.bf16.msrb.mxu3 %v1076_v7 }
  0x2a   :  { %433 = vmatpush.bf16.msrb.mxu0 %v1083_v8 }
  0x2b   :  { %451 = vmatpush.bf16.msrb.mxu1 %v1088_v9 }
  0x2c   :  { %469 = vmatpush.bf16.msrb.mxu2 %v1095_v10 }
  0x2d   :  { %487 = vmatpush.bf16.msrb.mxu3 %v1100_v11 }
  0x2e   :  { %434 = vmatpush.bf16.msrb.mxu0 %v1107_v12 }
  0x2f   :  { %452 = vmatpush.bf16.msrb.mxu1 %v1112_v13 }
  0x30   :  { %470 = vmatpush.bf16.msrb.mxu2 %v1119_v14 }
  0x31   :  { %488 = vmatpush.bf16.msrb.mxu3 %v1124_v15  ;;  %332 = vmatmul.bf16.gmra.mxu0 %v115_v50  ;;  %v930_v50 = vld [vmem:[%s1474_s2 + $0x18] sm:$0xf0] }
  0x32   :  { %435 = vmatpush.bf16.msrb.mxu0 %v1131_v16  ;;  %350 = vmatmul.bf16.gmra.mxu1 %v116_v51  ;;  %v921_v51 = vor.u32 %v992_v45, %v920_v44 }
  0x33   :  { %368 = vmatmul.bf16.gmra.mxu2 %v117_v52  ;;  %453 = vmatpush.bf16.msrb.mxu1 %v1136_v17  ;;  %v925_v52 = vor.u32 %v990_v46, %v922_v47 }
  0x34   :  { %471 = vmatpush.bf16.msrb.mxu2 %v1143_v18  ;;  %386 = vmatmul.bf16.gmra.mxu3 %v118_v53  ;;  %v929_v53 = vor.u32 %v993_v49, %v928_v48 }
  0x35   :  { %489 = vmatpush.bf16.msrb.mxu3 %v1148_v19 }
  0x36   :  { %436 = vmatpush.bf16.msrb.mxu0 %v1155_v20 }
  0x37   :  { %454 = vmatpush.bf16.msrb.mxu1 %v1160_v21 }
  0x38   :  { %472 = vmatpush.bf16.msrb.mxu2 %v1167_v22 }
  0x39   :  { %490 = vmatpush.bf16.msrb.mxu3 %v1172_v23 }
  0x3a   :  { %437 = vmatpush.bf16.msrb.mxu0 %v1179_v24 }
  0x3b   :  { %455 = vmatpush.bf16.msrb.mxu1 %v1184_v25 }
  0x3c   :  { %473 = vmatpush.bf16.msrb.mxu2 %v1191_v26 }
  0x3d   :  { %491 = vmatpush.bf16.msrb.mxu3 %v1196_v27 }
  0x3e   :  { %438 = vmatpush.bf16.msrb.mxu0 %v1201_v28 }
  0x3f   :  { %456 = vmatpush.bf16.msrb.mxu1 %v1206_v29 }
  0x40   :  { %474 = vmatpush.bf16.msrb.mxu2 %v1211_v30 }
  0x41   :  { %492 = vmatpush.bf16.msrb.mxu3 %v1216_v31  ;;  %439 = vmatmul.bf16.vlgmr.msrb.gmra.mxu0 %v905_v62 }
  0x42   :  { %546 = vmatpush.bf16.msra.mxu0 %v1037_v0  ;;  %457 = vmatmul.bf16.vlgmr.msrb.gmra.mxu1 %v909_v63 }
  0x43   :  { %564 = vmatpush.bf16.msra.mxu1 %v1042_v1  ;;  %475 = vmatmul.bf16.vlgmr.msrb.gmra.mxu2 %v913_v32 }
  0x44   :  { %582 = vmatpush.bf16.msra.mxu2 %v1047_v2  ;;  %493 = vmatmul.bf16.vlgmr.msrb.gmra.mxu3 %v917_v33 }
  0x45   :  { %600 = vmatpush.bf16.msra.mxu3 %v1052_v3 }
  0x46   :  { %547 = vmatpush.bf16.msra.mxu0 %v1059_v4 }
  0x47   :  { %565 = vmatpush.bf16.msra.mxu1 %v1064_v5 }
  0x48   :  { %583 = vmatpush.bf16.msra.mxu2 %v1071_v6 }
  0x49   :  { %601 = vmatpush.bf16.msra.mxu3 %v1076_v7 }
  0x4a   :  { %548 = vmatpush.bf16.msra.mxu0 %v1083_v8 }
  0x4b   :  { %566 = vmatpush.bf16.msra.mxu1 %v1088_v9 }
  0x4c   :  { %584 = vmatpush.bf16.msra.mxu2 %v1095_v10 }
  0x4d   :  { %602 = vmatpush.bf16.msra.mxu3 %v1100_v11 }
  0x4e   :  { %549 = vmatpush.bf16.msra.mxu0 %v1107_v12 }
  0x4f   :  { %567 = vmatpush.bf16.msra.mxu1 %v1112_v13 }
  0x50   :  { %585 = vmatpush.bf16.msra.mxu2 %v1119_v14 }
  0x51   :  { %603 = vmatpush.bf16.msra.mxu3 %v1124_v15  ;;  %444 = vmatmul.bf16.gmra.mxu0 %v419_v40 }
  0x52   :  { %550 = vmatpush.bf16.msra.mxu0 %v1131_v16  ;;  %462 = vmatmul.bf16.gmra.mxu1 %v420_v41 }
  0x53   :  { %568 = vmatpush.bf16.msra.mxu1 %v1136_v17  ;;  %480 = vmatmul.bf16.gmra.mxu2 %v421_v42 }
  0x54   :  { %586 = vmatpush.bf16.msra.mxu2 %v1143_v18  ;;  %498 = vmatmul.bf16.gmra.mxu3 %v422_v43 }
  0x55   :  { %604 = vmatpush.bf16.msra.mxu3 %v1148_v19 }
  0x56   :  { %551 = vmatpush.bf16.msra.mxu0 %v1155_v20 }
  0x57   :  { %569 = vmatpush.bf16.msra.mxu1 %v1160_v21 }
  0x58   :  { %587 = vmatpush.bf16.msra.mxu2 %v1167_v22 }
  0x59   :  { %605 = vmatpush.bf16.msra.mxu3 %v1172_v23 }
  0x5a   :  { %552 = vmatpush.bf16.msra.mxu0 %v1179_v24 }
  0x5b   :  { %570 = vmatpush.bf16.msra.mxu1 %v1184_v25 }
  0x5c   :  { %588 = vmatpush.bf16.msra.mxu2 %v1191_v26 }
  0x5d   :  { %606 = vmatpush.bf16.msra.mxu3 %v1196_v27 }
  0x5e   :  { %553 = vmatpush.bf16.msra.mxu0 %v1201_v28 }
  0x5f   :  { %571 = vmatpush.bf16.msra.mxu1 %v1206_v29 }
  0x60   :  { %589 = vmatpush.bf16.msra.mxu2 %v1211_v30 }
  0x61   :  { %607 = vmatpush.bf16.msra.mxu3 %v1216_v31  ;;  %554 = vmatmul.bf16.vlgmr.msra.gmra.mxu0 %v921_v51 }
  0x62   :  { %661 = vmatpush.bf16.msrb.mxu0 %v1037_v0  ;;  %572 = vmatmul.bf16.vlgmr.msra.gmra.mxu1 %v925_v52  ;;  %v510_v0 = vld [vmem:[%s1474_s2 + $0x20] sm:$0x11] }
  0x63   :  { %679 = vmatpush.bf16.msrb.mxu1 %v1042_v1  ;;  %590 = vmatmul.bf16.vlgmr.msra.gmra.mxu2 %v929_v53  ;;  %v511_v1 = vld [vmem:[%s1474_s2 + $0x28] sm:$0x11] }
  0x64   :  { %697 = vmatpush.bf16.msrb.mxu2 %v1047_v2  ;;  %v991_v2 = vld [vmem:[%s1474_s2 + $0xc] sm:$0xf] }
  0x65   :  { %715 = vmatpush.bf16.msrb.mxu3 %v1052_v3  ;;  %v933_v54 = vor.u32 %v991_v2, %v930_v50  ;;  %v526_v3 = vunpack.c.l.b16 %v510_v0 }
  0x66   :  { %662 = vmatpush.bf16.msrb.mxu0 %v1059_v4  ;;  %v527_v4 = vunpack.c.h.b16 %v510_v0 }
  0x67   :  { %680 = vmatpush.bf16.msrb.mxu1 %v1064_v5  ;;  %608 = vmatmul.bf16.vlgmr.msra.gmra.mxu3 %v933_v54  ;;  %v528_v5 = vunpack.c.l.b16 %v511_v1 }
  0x68   :  { %698 = vmatpush.bf16.msrb.mxu2 %v1071_v6  ;;  %v529_v6 = vunpack.c.h.b16 %v511_v1 }
  0x69   :  { %716 = vmatpush.bf16.msrb.mxu3 %v1076_v7  ;;  %v534_v7 = vpack.c.b16 %v526_v3, %v526_v3 }
  0x6a   :  { %663 = vmatpush.bf16.msrb.mxu0 %v1083_v8  ;;  %v535_v8 = vpack.c.b16 %v527_v4, %v527_v4 }
  0x6b   :  { %681 = vmatpush.bf16.msrb.mxu1 %v1088_v9  ;;  %v536_v9 = vpack.c.b16 %v528_v5, %v528_v5 }
  0x6c   :  { %699 = vmatpush.bf16.msrb.mxu2 %v1095_v10  ;;  %v537_v10 = vpack.c.b16 %v529_v6, %v529_v6 }
  0x6d   :  { %717 = vmatpush.bf16.msrb.mxu3 %v1100_v11  ;;  %v936_v11 = vld [vmem:[%s1475_s3] sm:$0xf] }
  0x6e   :  { %664 = vmatpush.bf16.msrb.mxu0 %v1107_v12  ;;  %v996_v12 = vld [vmem:[%s1475_s3 + $0xc] sm:$0xf0] }
  0x6f   :  { %682 = vmatpush.bf16.msrb.mxu1 %v1112_v13  ;;  %v994_v13 = vld [vmem:[%s1475_s3 + $0x4] sm:$0xf] }
  0x70   :  { %700 = vmatpush.bf16.msrb.mxu2 %v1119_v14  ;;  %v938_v14 = vld [vmem:[%s1475_s3 + $0x10] sm:$0xf0] }
  0x71   :  { %718 = vmatpush.bf16.msrb.mxu3 %v1124_v15  ;;  %559 = vmatmul.bf16.gmra.mxu0 %v534_v7  ;;  %v944_v15 = vld [vmem:[%s1475_s3 + $0x8] sm:$0xf] }
  0x72   :  { %665 = vmatpush.bf16.msrb.mxu0 %v1131_v16  ;;  %577 = vmatmul.bf16.gmra.mxu1 %v535_v8  ;;  %v997_v16 = vld [vmem:[%s1475_s3 + $0x14] sm:$0xf0] }
  0x73   :  { %683 = vmatpush.bf16.msrb.mxu1 %v1136_v17  ;;  %595 = vmatmul.bf16.gmra.mxu2 %v536_v9  ;;  %v995_v17 = vld [vmem:[%s1475_s3 + $0xc] sm:$0xf] }
  0x74   :  { %701 = vmatpush.bf16.msrb.mxu2 %v1143_v18  ;;  %v946_v18 = vld [vmem:[%s1475_s3 + $0x18] sm:$0xf0] }
  0x75   :  { %719 = vmatpush.bf16.msrb.mxu3 %v1148_v19  ;;  %v937_v19 = vor.u32 %v996_v12, %v936_v11 }
  0x76   :  { %666 = vmatpush.bf16.msrb.mxu0 %v1155_v20  ;;  %v941_v20 = vor.u32 %v994_v13, %v938_v14 }
  0x77   :  { %684 = vmatpush.bf16.msrb.mxu1 %v1160_v21  ;;  %613 = vmatmul.bf16.gmra.mxu3 %v537_v10  ;;  %v945_v21 = vor.u32 %v997_v16, %v944_v15 }
  0x78   :  { %702 = vmatpush.bf16.msrb.mxu2 %v1167_v22  ;;  %v949_v22 = vor.u32 %v995_v17, %v946_v18 }
  0x79   :  { %720 = vmatpush.bf16.msrb.mxu3 %v1172_v23  ;;  %v625_v23 = vld [vmem:[%s1475_s3 + $0x20] sm:$0x11] }
  0x7a   :  { %667 = vmatpush.bf16.msrb.mxu0 %v1179_v24  ;;  %v626_v24 = vld [vmem:[%s1475_s3 + $0x28] sm:$0x11] }
  0x7b   :  { %685 = vmatpush.bf16.msrb.mxu1 %v1184_v25  ;;  %v641_v25 = vunpack.c.l.b16 %v625_v23 }
  0x7c   :  { %703 = vmatpush.bf16.msrb.mxu2 %v1191_v26  ;;  %v642_v26 = vunpack.c.h.b16 %v625_v23 }
  0x7d   :  { %721 = vmatpush.bf16.msrb.mxu3 %v1196_v27  ;;  %v643_v27 = vunpack.c.l.b16 %v626_v24 }
  0x7e   :  { %668 = vmatpush.bf16.msrb.mxu0 %v1201_v28  ;;  %v644_v28 = vunpack.c.h.b16 %v626_v24 }
  0x7f   :  { %686 = vmatpush.bf16.msrb.mxu1 %v1206_v29  ;;  %v649_v29 = vpack.c.b16 %v641_v25, %v641_v25 }
  0x80   :  { %704 = vmatpush.bf16.msrb.mxu2 %v1211_v30  ;;  %v650_v30 = vpack.c.b16 %v642_v26, %v642_v26  ;;  %v652_v55 = vpack.c.b16 %v644_v28, %v644_v28 }
  0x81   :  { %722 = vmatpush.bf16.msrb.mxu3 %v1216_v31  ;;  %669 = vmatmul.bf16.vlgmr.msrb.gmra.mxu0 %v937_v19  ;;  %v651_v31 = vpack.c.b16 %v643_v27, %v643_v27 }
  0x82   :  { %687 = vmatmul.bf16.vlgmr.msrb.gmra.mxu1 %v941_v20 }
  0x83   :  { %705 = vmatmul.bf16.vlgmr.msrb.gmra.mxu2 %v945_v21 }
  0x87   :  { %723 = vmatmul.bf16.vlgmr.msrb.gmra.mxu3 %v949_v22 }
  0x91   :  { %674 = vmatmul.bf16.gmra.mxu0 %v649_v29 }
  0x92   :  { %692 = vmatmul.bf16.gmra.mxu1 %v650_v30 }
  0x93   :  { %710 = vmatmul.bf16.gmra.mxu2 %v651_v31 }
  0x97   :  { %728 = vmatmul.bf16.gmra.mxu3 %v652_v55 }
  0x9e   :  { %v328_v56 = vpop.f32.mrf.mxu0 }
  0x9f   :  { %v346_v57 = vpop.f32.mrf.mxu1 }
  0xa0   :  { %v347_v58 = vadd.f32 %v346_v57, %v328_v56 }
  0xa6   :  { %v364_v59 = vpop.f32.mrf.mxu2  ;;  %v330_v62 = vpop.f32.mrf.mxu0 }
  0xa7   :  { %v382_v60 = vpop.f32.mrf.mxu3  ;;  %v365_v61 = vadd.f32 %v364_v59, %v347_v58  ;;  %v348_v63 = vpop.f32.mrf.mxu1 }
  0xa8   :  { %v349_v32 = vadd.f32 %v348_v63, %v330_v62 }
  0xa9   :  { %v1442_v33 = vadd.f32 %v382_v60, %v365_v61 }
  0xae   :  { %v366_v34 = vpop.f32.mrf.mxu2  ;;  %v333_v37 = vpop.f32.mrf.mxu0 }
  0xaf   :  { %v384_v35 = vpop.f32.mrf.mxu3  ;;  %v367_v36 = vadd.f32 %v366_v34, %v349_v32  ;;  %v351_v38 = vpop.f32.mrf.mxu1 }
  0xb0   :  { %v352_v39 = vadd.f32 %v351_v38, %v333_v37 }
  0xb1   :  { %v1444_v40 = vadd.f32 %v384_v35, %v367_v36 }
  0xb6   :  { %v369_v41 = vpop.f32.mrf.mxu2  ;;  %v335_v44 = vpop.f32.mrf.mxu0 }
  0xb7   :  { %v387_v42 = vpop.f32.mrf.mxu3  ;;  %v370_v43 = vadd.f32 %v369_v41, %v352_v39  ;;  %v353_v45 = vpop.f32.mrf.mxu1  ;;  %v998_v44 = vld [vmem:[%s1476_s5] ss:$0 sm:$0xff] }
  0xb9   :  { %v1446_v46 = vadd.f32 %v387_v42, %v370_v43 }
  0xbe   :  { %v371_v47 = vpop.f32.mrf.mxu2  ;;  %v440_v49 = vpop.f32.mrf.mxu0 }
  0xbf   :  { %v389_v48 = vpop.f32.mrf.mxu3  ;;  %v458_v2 = vpop.f32.mrf.mxu1 }
  0xc0   :  { %v459_v50 = vadd.f32 %v458_v2, %v440_v49 }
  0xc6   :  { %v476_v51 = vpop.f32.mrf.mxu2  ;;  %v442_v54 = vpop.f32.mrf.mxu0 }
  0xc7   :  { %v477_v52 = vadd.f32 %v476_v51, %v459_v50  ;;  %v494_v53 = vpop.f32.mrf.mxu3  ;;  %v460_v0 = vpop.f32.mrf.mxu1 }
  0xc8   :  { %v461_v3 = vadd.f32 %v460_v0, %v442_v54 }
  0xc9   :  { %v495_v1 = vadd.f32 %v494_v53, %v477_v52 }
  0xcb   :  { %v503_v4 = vmax.f32 %v1442_v33, %v495_v1 }
  0xce   :  { %v478_v5 = vpop.f32.mrf.mxu2  ;;  %v445_v8 = vpop.f32.mrf.mxu0 }
  0xcf   :  { %v479_v6 = vadd.f32 %v478_v5, %v461_v3  ;;  %v496_v7 = vpop.f32.mrf.mxu3  ;;  %v463_v9 = vpop.f32.mrf.mxu1 }
  0xd0   :  { %v464_v11 = vadd.f32 %v463_v9, %v445_v8 }
  0xd1   :  { %v497_v10 = vadd.f32 %v496_v7, %v479_v6 }
  0xd3   :  { %v504_v12 = vmax.f32 %v1444_v40, %v497_v10 }
  0xd6   :  { %v481_v13 = vpop.f32.mrf.mxu2  ;;  %v447_v16 = vpop.f32.mrf.mxu0 }
  0xd7   :  { %v482_v14 = vadd.f32 %v481_v13, %v464_v11  ;;  %v499_v15 = vpop.f32.mrf.mxu3  ;;  %v465_v17 = vpop.f32.mrf.mxu1 }
  0xd9   :  { %v1450_v18 = vadd.f32 %v499_v15, %v482_v14 }
  0xdb   :  { %v505_v19 = vmax.f32 %v1446_v46, %v1450_v18 }
  0xde   :  { %v483_v20 = vpop.f32.mrf.mxu2  ;;  %v555_v22 = vpop.f32.mrf.mxu0 }
  0xdf   :  { %v501_v21 = vpop.f32.mrf.mxu3  ;;  %v573_v23 = vpop.f32.mrf.mxu1 }
  0xe0   :  { %v574_v59 = vadd.f32 %v573_v23, %v555_v22 }
  0xe6   :  { %v591_v24 = vpop.f32.mrf.mxu2  ;;  %v557_v26 = vpop.f32.mrf.mxu0 }
  0xe7   :  { %v575_v27 = vpop.f32.mrf.mxu1  ;;  %v592_v32 = vadd.f32 %v591_v24, %v574_v59 }
  0xe8   :  { %v576_v36 = vadd.f32 %v575_v27, %v557_v26 }
  0xea   :  { %v609_v25 = vpop.f32.mrf.mxu3 }
  0xeb   :  { %v610_v34 = vadd.f32 %v609_v25, %v592_v32 }
  0xed   :  { %v618_v41 = vmax.f32 %v503_v4, %v610_v34 }
  0xee   :  { %v593_v28 = vpop.f32.mrf.mxu2  ;;  %v560_v30 = vpop.f32.mrf.mxu0 }
  0xef   :  { %v578_v31 = vpop.f32.mrf.mxu1  ;;  %v594_v42 = vadd.f32 %v593_v28, %v576_v36 }
  0xf0   :  { %v579_v48 = vadd.f32 %v578_v31, %v560_v30 }
  0xf2   :  { %v611_v29 = vpop.f32.mrf.mxu3 }
  0xf3   :  { %v612_v47 = vadd.f32 %v611_v29, %v594_v42 }
  0xf5   :  { %v619_v1 = vmax.f32 %v504_v12, %v612_v47 }
  0xf6   :  { %v596_v55 = vpop.f32.mrf.mxu2  ;;  %v562_v57 = vpop.f32.mrf.mxu0 }
  0xf7   :  { %v580_v58 = vpop.f32.mrf.mxu1  ;;  %v597_v3 = vadd.f32 %v596_v55, %v579_v48 }
  0xfa   :  { %v614_v56 = vpop.f32.mrf.mxu3 }
  0xfb   :  { %v615_v8 = vadd.f32 %v614_v56, %v597_v3 }
  0xfd   :  { %v620_v12 = vmax.f32 %v505_v19, %v615_v8 }
  0xfe   :  { %v598_v60 = vpop.f32.mrf.mxu2  ;;  %v670_v62 = vpop.f32.mrf.mxu0 }
  0xff   :  { %v688_v63 = vpop.f32.mrf.mxu1 }
 0x100   :  { %v689_v33 = vadd.f32 %v688_v63, %v670_v62 }
 0x102   :  { %v616_v61 = vpop.f32.mrf.mxu3 }
 0x106   :  { %v706_v35 = vpop.f32.mrf.mxu2  ;;  %v672_v39 = vpop.f32.mrf.mxu0 }
 0x107   :  { %v707_v37 = vadd.f32 %v706_v35, %v689_v33  ;;  %v690_v40 = vpop.f32.mrf.mxu1 }
 0x108   :  { %v691_v2 = vadd.f32 %v690_v40, %v672_v39 }
 0x10a   :  { %v724_v38 = vpop.f32.mrf.mxu3 }
 0x10b   :  { %v725_v43 = vadd.f32 %v724_v38, %v707_v37 }
 0x10d   :  { %v733_v45 = vmax.f32 %v618_v41, %v725_v43 }
 0x10e   :  { %v708_v50 = vpop.f32.mrf.mxu2  ;;  %v675_v54 = vpop.f32.mrf.mxu0 }
 0x10f   :  { %v740_v49 = vadd.f32 %v998_v44, %v733_v45  ;;  %v709_v52 = vadd.f32 %v708_v50, %v691_v2  ;;  %v693_v0 = vpop.f32.mrf.mxu1 }
 0x110   :  { %v694_v7 = vadd.f32 %v693_v0, %v675_v54 }
 0x111   :  { %v743_v51 = vmax.f32 %v740_v49, 0.0 }
 0x112   :  { %v726_v53 = vpop.f32.mrf.mxu3 }
 0x113   :  { %v746_v4 = vpack.c.bf16 %v743_v51, %v743_v51  ;;  %v727_v5 = vadd.f32 %v726_v53, %v709_v52 }
 0x115   :  { %750 = vst.msk [vmem:[%s1477_s6] sm:$0xf] %vm749_vm0, %v746_v4  ;;  %v734_v6 = vmax.f32 %v619_v1, %v727_v5 }
 0x116   :  { %v711_v10 = vpop.f32.mrf.mxu2  ;;  %v677_v15 = vpop.f32.mrf.mxu0 }
 0x117   :  { %v741_v9 = vadd.f32 %v998_v44, %v734_v6  ;;  %v712_v13 = vadd.f32 %v711_v10, %v694_v7  ;;  %v695_v16 = vpop.f32.mrf.mxu1 }
 0x119   :  { %v744_v11 = vmax.f32 %v741_v9, 0.0 }
 0x11a   :  { %v729_v14 = vpop.f32.mrf.mxu3 }
 0x11b   :  { %v747_v17 = vpack.c.bf16 %v744_v11, %v744_v11  ;;  %v730_v20 = vadd.f32 %v729_v14, %v712_v13 }
 0x11d   :  { %751 = vst.msk [vmem:[%s1477_s6 + $0x4] sm:$0xf] %vm749_vm0, %v747_v17  ;;  %v735_v21 = vmax.f32 %v620_v12, %v730_v20 }
 0x11e   :  { %v713_v23 = vpop.f32.mrf.mxu2 }
 0x11f   :  { %v742_v22 = vadd.f32 %v998_v44, %v735_v21 }
 0x121   :  { %v745_v24 = vmax.f32 %v742_v22, 0.0 }
 0x122   :  { %v731_v25 = vpop.f32.mrf.mxu3 }
 0x123   :  { %v748_v26 = vpack.c.bf16 %v745_v24, %v745_v24 }
 0x125   :  { %753 = vst.msk [vmem:[%s1477_s6 + $0x8] sm:$0x1] %vm752_vm1, %v748_v26 }

// kernel: forward.7
= control target key start
LH: loop header
LB: loop body
LE: loop exit
PB: predicated region body
PF: predicated region fallthrough
CT: control target
= control target key end

     0   :  { %s1154_s0 = inlined_call_operand.vmem [shape: bf16[2,384], index: 0, kind: input, shape index: {}]   ;;  %s1155_s1 = inlined_call_operand.vmem [shape: bf16[2,384], index: 1, kind: input, shape index: {}]   ;;  %s1156_s2 = inlined_call_operand.vmem [shape: bf16[2,384], index: 2, kind: input, shape index: {}]   ;;  %s1157_s3 = inlined_call_operand.vmem [shape: bf16[2,384], index: 3, kind: input, shape index: {}]   ;;  %s1158_s4 = inlined_call_operand.vmem [shape: bf16[384,80], index: 4, kind: input, shape index: {}]   ;;  %s1159_s5 = inlined_call_operand.vmem [shape: f32[1,80], index: 5, kind: input, shape index: {}]   ;;  %s1160_s6 = inlined_call_operand.vmem [shape: bf16[80,40], index: 6, kind: input, shape index: {}]   ;;  %s1161_s7 = inlined_call_operand.vmem [shape: f32[1,40], index: 7, kind: input, shape index: {}]   ;;  %s1162_s8 = inlined_call_operand.vmem [shape: bf16[40,20], index: 8, kind: input, shape index: {}]   ;;  %s1163_s9 = inlined_call_operand.vmem [shape: f32[1,20], index: 9, kind: input, shape index: {}]   ;;  %s1164_s10 = inlined_call_operand.vmem [shape: bf16[20,10], index: 10, kind: input, shape index: {}]   ;;  %s1165_s11 = inlined_call_operand.vmem [shape: f32[1,10], index: 11, kind: input, shape index: {}]   ;;  %s1166_s12 = inlined_call_operand.hbm [shape: f32[2,10], index: 12, kind: output, shape index: {}]  }
   0x1   :  { %v881_v0 = vld [vmem:[%s1158_s4 + $0x38] sm:$0xff]  ;;  %v898_v3 = vld [vmem:[%s1158_s4 + $0x30] sm:$0xff]  ;;  %v917_v6 = vld [vmem:[%s1158_s4 + $0x28] sm:$0xff] }
   0x2   :  { %v886_v1 = vld [vmem:[%s1158_s4 + $0x78] sm:$0xff]  ;;  %244 = vmatpush.bf16.msra.mxu0 %v881_v0  ;;  %v903_v4 = vld [vmem:[%s1158_s4 + $0x70] sm:$0xff]  ;;  %292 = vmatpush.bf16.msra.mxu3 %v881_v0  ;;  %v922_v7 = vld [vmem:[%s1158_s4 + $0x68] sm:$0xff] }
   0x3   :  { %v891_v2 = vld [vmem:[%s1158_s4 + $0xb8] sm:$0xff]  ;;  %257 = vmatpush.bf16.msra.mxu1 %v886_v1  ;;  %v910_v5 = vld [vmem:[%s1158_s4 + $0xb0] sm:$0xff]  ;;  %v929_v8 = vld [vmem:[%s1158_s4 + $0xa8] sm:$0xff] }
   0x4   :  { %270 = vmatpush.bf16.msra.mxu2 %v891_v2  ;;  %v43_v9 = vld [vmem:[%s1154_s0] sm:$0x7] }
   0x5   :  { %93 = vst [vmem:[#allocation1] ss:$9 sm:$0xff] %v43_v9  ;;  %v939_v10 = vld [vmem:[%s1158_s4 + $0x20] sm:$0xff] }
   0x6   :  { %245 = vmatpush.bf16.msra.mxu0 %v898_v3  ;;  %293 = vmatpush.bf16.msra.mxu3 %v898_v3  ;;  %v944_v11 = vld [vmem:[%s1158_s4 + $0x60] sm:$0xff] }
   0x7   :  { %258 = vmatpush.bf16.msra.mxu1 %v903_v4 }
   0x8   :  { %271 = vmatpush.bf16.msra.mxu2 %v910_v5 }
   0xa   :  { %246 = vmatpush.bf16.msra.mxu0 %v917_v6 }
   0xb   :  { %259 = vmatpush.bf16.msra.mxu1 %v922_v7 }
   0xc   :  { %17 = vsyncpa [#allocation3], 0  ;;  %272 = vmatpush.bf16.msra.mxu2 %v929_v8  ;;  %294 = vmatpush.bf16.msra.mxu3 %v917_v6  ;;  %v951_v12 = vld [vmem:[%s1158_s4 + $0xa0] sm:$0xff]  ;;  %v958_v13 = vld [vmem:[%s1158_s4 + $0x18] sm:$0xff]  ;;  %vm528_vm0 = vcmask 1043456   ;;  %vm481_vm1 = vcmask 654336  }
   0xd   :  { %v963_v14 = vld [vmem:[%s1158_s4 + $0x58] sm:$0xff]  ;;  %v283_v15 = vld [vmem:[%s1155_s1] sm:$0x7]  ;;  %v95_v18 = vld [vmem:[#allocation1 + $0x9] sm:$0xff]  ;;  %vm567_vm2 = vcmask 1041408   ;;  %vm524_vm3 = vcmask 326656  }
   0xe   :  { %247 = vmatpush.bf16.msra.mxu0 %v939_v10  ;;  %v973_v16 = vld [vmem:[%s1158_s4 + $0x98] sm:$0xff]  ;;  %v94_v17 = vld [vmem:[#allocation1] sm:$0xff]  ;;  %v980_v20 = vld [vmem:[%s1158_s4 + $0x10] sm:$0xff]  ;;  %vm563_vm4 = vcmask 162816   ;;  %vm584_vm5 = vcmask 74752   ;;  %s605_s19 = sshll.u32 %s1166_s12, 4  ;;  %s606_s19 = int_to_ptr.hbm [resolvable:$true] %s605_s19 }
   0xf   :  { %260 = vmatpush.bf16.msra.mxu1 %v944_v11  ;;  %v96_v19 = vld [vmem:[#allocation1 + $0x12] sm:$0xff]  ;;  %v999_v23 = vld [vmem:[%s1158_s4 + $0x8] sm:$0xff]  ;;  %v1018_v26 = vld [vmem:[%s1158_s4] sm:$0xff] }
  0x10   :  { %273 = vmatpush.bf16.msra.mxu2 %v951_v12  ;;  %295 = vmatpush.bf16.msra.mxu3 %v939_v10  ;;  %285 = vst [vmem:[#allocation1] ss:$9 sm:$0xff] %v283_v15  ;;  %v985_v21 = vld [vmem:[%s1158_s4 + $0x50] sm:$0xff]  ;;  %v1004_v24 = vld [vmem:[%s1158_s4 + $0x48] sm:$0xff]  ;;  %v1023_v27 = vld [vmem:[%s1158_s4 + $0x40] sm:$0xff] }
  0x11   :  { %v992_v22 = vld [vmem:[%s1158_s4 + $0x90] sm:$0xff]  ;;  %v1011_v25 = vld [vmem:[%s1158_s4 + $0x88] sm:$0xff]  ;;  %v1030_v28 = vld [vmem:[%s1158_s4 + $0x80] sm:$0xff] }
  0x12   :  { %248 = vmatpush.bf16.msra.mxu0 %v958_v13  ;;  %v332_v32 = vld [vmem:[%s1156_s2] sm:$0x7]  ;;  %v772_v51 = vld [vmem:[%s1160_s6 + $0x18] sm:$0xff]  ;;  %v771_v52 = vld [vmem:[%s1160_s6 + $0x10] sm:$0xff] }
  0x13   :  { %261 = vmatpush.bf16.msra.mxu1 %v963_v14  ;;  %v381_v36 = vld [vmem:[%s1157_s3] sm:$0x7]  ;;  %v770_v57 = vld [vmem:[%s1160_s6 + $0x8] sm:$0xff]  ;;  %v504_v61 = vld [vmem:[%s1162_s8 + $0x10] sm:$0xf] }
  0x14   :  { %274 = vmatpush.bf16.msra.mxu2 %v973_v16  ;;  %296 = vmatpush.bf16.msra.mxu3 %v958_v13  ;;  %v773_v48 = vld [vmem:[%s1160_s6 + $0x20] sm:$0xff]  ;;  %v518_v62 = vunpack.c.l.b16 %v504_v61 }
  0x15   :  { %v769_v58 = vld [vmem:[%s1160_s6] sm:$0xff] }
  0x16   :  { %249 = vmatpush.bf16.msra.mxu0 %v980_v20  ;;  %v521_v63 = vpack.c.b16 %v518_v62, %v518_v62 }
  0x17   :  { %262 = vmatpush.bf16.msra.mxu1 %v985_v21  ;;  %v286_v29 = vld [vmem:[#allocation1] sm:$0xff]  ;;  %v287_v30 = vld [vmem:[#allocation1 + $0x9] sm:$0xff]  ;;  %v288_v31 = vld [vmem:[#allocation1 + $0x12] sm:$0xff] }
  0x18   :  { %275 = vmatpush.bf16.msra.mxu2 %v992_v22  ;;  %297 = vmatpush.bf16.msra.mxu3 %v980_v20  ;;  %334 = vst [vmem:[#allocation1] ss:$9 sm:$0xff] %v332_v32 }
  0x1a   :  { %250 = vmatpush.bf16.msra.mxu0 %v999_v23 }
  0x1b   :  { %263 = vmatpush.bf16.msra.mxu1 %v1004_v24 }
  0x1c   :  { %276 = vmatpush.bf16.msra.mxu2 %v1011_v25  ;;  %298 = vmatpush.bf16.msra.mxu3 %v999_v23 }
  0x1e   :  { %251 = vmatpush.bf16.msra.mxu0 %v1018_v26 }
  0x1f   :  { %264 = vmatpush.bf16.msra.mxu1 %v1023_v27  ;;  %v335_v33 = vld [vmem:[#allocation1] sm:$0xff]  ;;  %v336_v34 = vld [vmem:[#allocation1 + $0x9] sm:$0xff]  ;;  %v337_v35 = vld [vmem:[#allocation1 + $0x12] sm:$0xff] }
  0x20   :  { %277 = vmatpush.bf16.msra.mxu2 %v1030_v28  ;;  %299 = vmatpush.bf16.msra.mxu3 %v1018_v26  ;;  %383 = vst [vmem:[#allocation1] ss:$9 sm:$0xff] %v381_v36 }
  0x21   :  { %252 = vmatmul.bf16.vlgmr.msra.gmra.mxu0 %v94_v17 }
  0x22   :  { %305 = vmatpush.bf16.msrb.mxu0 %v886_v1  ;;  %265 = vmatmul.bf16.vlgmr.msra.gmra.mxu1 %v95_v18  ;;  %v778_v18 = vld [vmem:[%s1159_s5] ss:$0 sm:$0xff] }
  0x23   :  { %318 = vmatpush.bf16.msrb.mxu1 %v891_v2  ;;  %278 = vmatmul.bf16.vlgmr.msra.gmra.mxu2 %v96_v19 }
  0x24   :  { %341 = vmatpush.bf16.msrb.mxu2 %v881_v0  ;;  %354 = vmatpush.bf16.msrb.mxu3 %v886_v1 }
  0x25   :  { %300 = vmatmul.bf16.vlgmr.msra.gmra.mxu3 %v286_v29 }
  0x26   :  { %306 = vmatpush.bf16.msrb.mxu0 %v903_v4 }
  0x27   :  { %319 = vmatpush.bf16.msrb.mxu1 %v910_v5  ;;  %v384_v37 = vld [vmem:[#allocation1] sm:$0xff]  ;;  %v385_v38 = vld [vmem:[#allocation1 + $0x9] sm:$0xff]  ;;  %v386_v39 = vld [vmem:[#allocation1 + $0x12] sm:$0xff] }
  0x28   :  { %342 = vmatpush.bf16.msrb.mxu2 %v898_v3  ;;  %355 = vmatpush.bf16.msrb.mxu3 %v903_v4 }
  0x2a   :  { %307 = vmatpush.bf16.msrb.mxu0 %v922_v7 }
  0x2b   :  { %320 = vmatpush.bf16.msrb.mxu1 %v929_v8 }
  0x2c   :  { %343 = vmatpush.bf16.msrb.mxu2 %v917_v6  ;;  %356 = vmatpush.bf16.msrb.mxu3 %v922_v7 }
  0x2e   :  { %308 = vmatpush.bf16.msrb.mxu0 %v944_v11 }
  0x2f   :  { %321 = vmatpush.bf16.msrb.mxu1 %v951_v12 }
  0x30   :  { %344 = vmatpush.bf16.msrb.mxu2 %v939_v10  ;;  %357 = vmatpush.bf16.msrb.mxu3 %v944_v11 }
  0x32   :  { %309 = vmatpush.bf16.msrb.mxu0 %v963_v14 }
  0x33   :  { %322 = vmatpush.bf16.msrb.mxu1 %v973_v16 }
  0x34   :  { %345 = vmatpush.bf16.msrb.mxu2 %v958_v13  ;;  %358 = vmatpush.bf16.msrb.mxu3 %v963_v14 }
  0x36   :  { %310 = vmatpush.bf16.msrb.mxu0 %v985_v21 }
  0x37   :  { %323 = vmatpush.bf16.msrb.mxu1 %v992_v22 }
  0x38   :  { %346 = vmatpush.bf16.msrb.mxu2 %v980_v20  ;;  %359 = vmatpush.bf16.msrb.mxu3 %v985_v21 }
  0x3a   :  { %311 = vmatpush.bf16.msrb.mxu0 %v1004_v24 }
  0x3b   :  { %324 = vmatpush.bf16.msrb.mxu1 %v1011_v25 }
  0x3c   :  { %347 = vmatpush.bf16.msrb.mxu2 %v999_v23  ;;  %360 = vmatpush.bf16.msrb.mxu3 %v1004_v24 }
  0x3e   :  { %312 = vmatpush.bf16.msrb.mxu0 %v1023_v27 }
  0x3f   :  { %325 = vmatpush.bf16.msrb.mxu1 %v1030_v28 }
  0x40   :  { %348 = vmatpush.bf16.msrb.mxu2 %v1018_v26  ;;  %361 = vmatpush.bf16.msrb.mxu3 %v1023_v27 }
  0x41   :  { %313 = vmatmul.bf16.vlgmr.msrb.gmra.mxu0 %v287_v30  ;;  %v776_v30 = vld [vmem:[%s1164_s10] sm:$0xff] }
  0x42   :  { %367 = vmatpush.bf16.msra.mxu0 %v891_v2  ;;  %326 = vmatmul.bf16.vlgmr.msrb.gmra.mxu1 %v288_v31  ;;  %v779_v31 = vld [vmem:[%s1161_s7] ss:$0 sm:$0xff] }
  0x43   :  { %390 = vmatpush.bf16.msra.mxu1 %v881_v0  ;;  %349 = vmatmul.bf16.vlgmr.msrb.gmra.mxu2 %v335_v33  ;;  %v530_v0 = vsel %vm528_vm0, %v521_v63, 0 }
  0x44   :  { %403 = vmatpush.bf16.msra.mxu2 %v886_v1  ;;  %416 = vmatpush.bf16.msra.mxu3 %v891_v2  ;;  %v775_v1 = vld [vmem:[%s1162_s8 + $0x8] sm:$0xff] }
  0x45   :  { %362 = vmatmul.bf16.vlgmr.msrb.gmra.mxu3 %v336_v34 }
  0x46   :  { %368 = vmatpush.bf16.msra.mxu0 %v910_v5 }
  0x47   :  { %391 = vmatpush.bf16.msra.mxu1 %v898_v3 }
  0x48   :  { %404 = vmatpush.bf16.msra.mxu2 %v903_v4  ;;  %417 = vmatpush.bf16.msra.mxu3 %v910_v5 }
  0x4a   :  { %369 = vmatpush.bf16.msra.mxu0 %v929_v8 }
  0x4b   :  { %392 = vmatpush.bf16.msra.mxu1 %v917_v6 }
  0x4c   :  { %405 = vmatpush.bf16.msra.mxu2 %v922_v7  ;;  %418 = vmatpush.bf16.msra.mxu3 %v929_v8 }
  0x4e   :  { %370 = vmatpush.bf16.msra.mxu0 %v951_v12 }
  0x4f   :  { %393 = vmatpush.bf16.msra.mxu1 %v939_v10 }
  0x50   :  { %406 = vmatpush.bf16.msra.mxu2 %v944_v11  ;;  %419 = vmatpush.bf16.msra.mxu3 %v951_v12 }
  0x52   :  { %371 = vmatpush.bf16.msra.mxu0 %v973_v16 }
  0x53   :  { %394 = vmatpush.bf16.msra.mxu1 %v958_v13 }
  0x54   :  { %407 = vmatpush.bf16.msra.mxu2 %v963_v14  ;;  %420 = vmatpush.bf16.msra.mxu3 %v973_v16 }
  0x56   :  { %372 = vmatpush.bf16.msra.mxu0 %v992_v22 }
  0x57   :  { %395 = vmatpush.bf16.msra.mxu1 %v980_v20 }
  0x58   :  { %408 = vmatpush.bf16.msra.mxu2 %v985_v21  ;;  %421 = vmatpush.bf16.msra.mxu3 %v992_v22 }
  0x5a   :  { %373 = vmatpush.bf16.msra.mxu0 %v1011_v25 }
  0x5b   :  { %396 = vmatpush.bf16.msra.mxu1 %v999_v23 }
  0x5c   :  { %409 = vmatpush.bf16.msra.mxu2 %v1004_v24  ;;  %422 = vmatpush.bf16.msra.mxu3 %v1011_v25  ;;  %v774_v25 = vld [vmem:[%s1162_s8] sm:$0xff] }
  0x5e   :  { %374 = vmatpush.bf16.msra.mxu0 %v1030_v28 }
  0x5f   :  { %397 = vmatpush.bf16.msra.mxu1 %v1018_v26  ;;  %v549_v26 = vld [vmem:[%s1164_s10 + $0x8] sm:$0x3] }
  0x60   :  { %410 = vmatpush.bf16.msra.mxu2 %v1023_v27  ;;  %423 = vmatpush.bf16.msra.mxu3 %v1030_v28  ;;  %v559_v27 = vunpack.c.l.b16 %v549_v26 }
  0x61   :  { %375 = vmatmul.bf16.vlgmr.msra.gmra.mxu0 %v337_v35 }
  0x62   :  { %398 = vmatmul.bf16.vlgmr.msra.gmra.mxu1 %v384_v37  ;;  %488 = vmatpush.bf16.msrb.mxu0 %v773_v48  ;;  %v561_v28 = vpack.c.b16 %v559_v27, %v559_v27  ;;  %v780_v37 = vld [vmem:[%s1163_s9] ss:$0 sm:$0xff]  ;;  %s812_s9 = smov [#allocation2]  }
  0x63   :  { %411 = vmatmul.bf16.vlgmr.msra.gmra.mxu2 %v385_v38  ;;  %424 = vmatmul.bf16.vlgmr.msra.gmra.mxu3 %v386_v39 }
  0x64   :  { %537 = vmatpush.bf16.msrb.mxu1 %v530_v0  ;;  %v569_v29 = vsel %vm567_vm2, %v561_v28, 0 }
  0x65   :  { %577 = vmatpush.bf16.msrb.mxu2 %v569_v29 }
  0x66   :  { %489 = vmatpush.bf16.msrb.mxu0 %v772_v51 }
  0x68   :  { %538 = vmatpush.bf16.msrb.mxu1 %v775_v1 }
  0x69   :  { %578 = vmatpush.bf16.msrb.mxu2 %v776_v30 }
  0x6a   :  { %490 = vmatpush.bf16.msrb.mxu0 %v771_v52 }
  0x6c   :  { %539 = vmatpush.bf16.msrb.mxu1 %v774_v25 }
  0x6e   :  { %491 = vmatpush.bf16.msrb.mxu0 %v770_v57 }
  0x72   :  { %492 = vmatpush.bf16.msrb.mxu0 %v769_v58 }
  0x9e   :  { %v253_v40 = vpop.f32.mrf.mxu0 }
  0x9f   :  { %v266_v41 = vpop.f32.mrf.mxu1 }
  0xa0   :  { %v267_v2 = vadd.f32 %v266_v41, %v253_v40 }
  0xa6   :  { %v279_v42 = vpop.f32.mrf.mxu2  ;;  %v255_v44 = vpop.f32.mrf.mxu0 }
  0xa7   :  { %v268_v45 = vpop.f32.mrf.mxu1  ;;  %v280_v6 = vadd.f32 %v279_v42, %v267_v2 }
  0xa8   :  { %v301_v43 = vpop.f32.mrf.mxu3 }
  0xae   :  { %v281_v46 = vpop.f32.mrf.mxu2 }
  0xb0   :  { %v303_v47 = vpop.f32.mrf.mxu3 }
  0xbe   :  { %v314_v49 = vpop.f32.mrf.mxu0 }
  0xbf   :  { %v327_v50 = vpop.f32.mrf.mxu1  ;;  %v315_v3 = vadd.f32 %v314_v49, %v301_v43  ;;  %v781_v43 = vld [vmem:[%s1165_s11] ss:$0 sm:$0xff]  ;;  %s603_s11 = sshll.u32 %s812_s9, 4  ;;  %s604_s11 = int_to_ptr.vmem [resolvable:$true] %s603_s11 }
  0xc1   :  { %v328_v7 = vadd.f32 %v327_v50, %v315_v3 }
  0xc3   :  { %v331_v12 = vmax.f32 %v280_v6, %v328_v7 }
  0xc6   :  { %v350_v53 = vpop.f32.mrf.mxu2  ;;  %v316_v55 = vpop.f32.mrf.mxu0 }
  0xc7   :  { %v329_v56 = vpop.f32.mrf.mxu1 }
  0xc8   :  { %v363_v54 = vpop.f32.mrf.mxu3 }
  0xc9   :  { %v364_v8 = vadd.f32 %v363_v54, %v350_v53 }
  0xce   :  { %v352_v59 = vpop.f32.mrf.mxu2 }
  0xd0   :  { %v365_v60 = vpop.f32.mrf.mxu3 }
  0xde   :  { %v376_v4 = vpop.f32.mrf.mxu0 }
  0xdf   :  { %v399_v5 = vpop.f32.mrf.mxu1  ;;  %v377_v9 = vadd.f32 %v376_v4, %v364_v8 }
  0xe1   :  { %v380_v16 = vmax.f32 %v331_v12, %v377_v9 }
  0xe6   :  { %v412_v10 = vpop.f32.mrf.mxu2  ;;  %v425_v11 = vpop.f32.mrf.mxu3 }
  0xe7   :  { %v413_v13 = vadd.f32 %v412_v10, %v399_v5  ;;  %v378_v14 = vpop.f32.mrf.mxu0  ;;  %v401_v15 = vpop.f32.mrf.mxu1 }
  0xe9   :  { %v426_v17 = vadd.f32 %v425_v11, %v413_v13 }
  0xeb   :  { %v429_v19 = vmax.f32 %v380_v16, %v426_v17 }
  0xed   :  { %v434_v20 = vadd.f32 %v778_v18, %v429_v19 }
  0xee   :  { %v414_v21 = vpop.f32.mrf.mxu2  ;;  %v427_v22 = vpop.f32.mrf.mxu3 }
  0xef   :  { %v435_v23 = vmax.f32 %v434_v20, 0.0 }
  0xf1   :  { %v436_v24 = vpack.c.bf16 %v435_v23, %v435_v23 }
  0xf3   :  { %730 = vmatmul.msk.bf16.vlgmr.msrb.gmra.mxu0 %vm481_vm1, %v436_v24 }
 0x170   :  { %v494_v32 = vpop.f32.mrf.mxu0 }
 0x171   :  { %v495_v33 = vadd.f32 %v779_v31, %v494_v32 }
 0x173   :  { %v498_v34 = vmax.f32 %v495_v33, 0.0 }
 0x175   :  { %v499_v35 = vpack.c.bf16 %v498_v34, %v498_v34 }
 0x177   :  { %739 = vmatmul.msk.bf16.vlgmr.msrb.gmra.mxu1 %vm524_vm3, %v499_v35 }
 0x178   :  { %v496_v36 = vpop.f32.mrf.mxu0 }
 0x1f4   :  { %v541_v38 = vpop.f32.mrf.mxu1 }
 0x1f5   :  { %v542_v39 = vadd.f32 %v780_v37, %v541_v38 }
 0x1f7   :  { %v545_v40 = vmax.f32 %v542_v39, 0.0 }
 0x1f9   :  { %v546_v41 = vpack.c.bf16 %v545_v40, %v545_v40 }
 0x1fb   :  { %744 = vmatmul.msk.bf16.vlgmr.msrb.gmra.mxu2 %vm563_vm4, %v546_v41 }
 0x1fc   :  { %v543_v42 = vpop.f32.mrf.mxu1 }
 0x27e   :  { %v580_v44 = vpop.f32.mrf.mxu2 }
 0x27f   :  { %v581_v45 = vadd.f32 %v781_v43, %v580_v44 }
 0x281   :  { %v585_v46 = vsel %vm584_vm5, %v581_v45, -inf }
 0x282   :  { %586 = vmax.xlane.f32.xlu0 %v585_v46 }
 0x286   :  { %v582_v47 = vpop.f32.mrf.mxu2 }
 0x2f5   :  { %v587_v48 = vpop.xlane.xlu0 %586 }
 0x2f6   :  { %v588_v49 = vsub.f32 %v581_v45, %v587_v48 }
 0x2f8   :  { %v589_v50 = vmul.f32 1.442695, %v588_v49 }
 0x2fa   :  { %782 = vpow2.f32 %v589_v50 }
 0x300   :  { %v783_v51 = vpop.eup %782 }
 0x301   :  { %v591_v52 = vsel %vm584_vm5, %v783_v51, 0.0 }
 0x302   :  { %592 = vadd.xlane.f32.xlu0 %v591_v52 }
 0x375   :  { %v593_v53 = vpop.xlane.xlu0 %592 }
 0x376   :  { %784 = vlog2.f32 %v593_v53 }
 0x37c   :  { %v785_v54 = vpop.eup %784 }
 0x37d   :  { %v595_v55 = vmul.f32 0.6931472, %v785_v54 }
 0x37f   :  { %v596_v56 = vsub.f32 %v588_v49, %v595_v55 }
 0x381   :  { %597 = vst.msk [vmem:[#allocation2] sm:$0x3] %vm584_vm5, %v596_v56 }
 0x382   :  { %608 = dma.vmem_to_hbm [thread:$0]  %s604_s11, 32, %s606_s19, [#allocation3]  }
 0x383   :  { %810 = dma.done.wait [#allocation3], 32  }
 0x384   :  { %811 = vsyncadd [#allocation3], 4294967264 }
 0x385   :  { %613 = vsyncpa [#allocation3], 1 }

</bundles_post_ra>
